<compile_context>
chip_gen: v7x
topology: tpu7x:2x2x1
jax: 0.10.0
libtpu: 0.0.40
codegen_flags: <defaults>
</compile_context>

<pallas_src>
import functools

import jax
import jax.numpy as jnp
from jax.experimental import pallas as pl
from jax.experimental.pallas import tpu as pltpu


def _round_up(x, m):
    return ((x + m - 1) // m) * m


# Below v7x's 64 MiB physical VMEM (leaves headroom for compiler scratch);
# comfortably above the ~1 MiB per-step working set of these kernels.
_VMEM_LIMIT_BYTES = 48 * 1024 * 1024


def _compiler_params():
    return pltpu.CompilerParams(
        dimension_semantics=("parallel", "arbitrary"),
        vmem_limit_bytes=_VMEM_LIMIT_BYTES,
    )


# ---------------------------------------------------------------------------
# Kernel A: GCN embedding + extractor MLP + concrete sample + per-node info loss
#           + xa = att * x (bf16) for the masked conv.
# grid: (node-row tile i, contraction tile k); agg accumulated in f32 scratch.
# ---------------------------------------------------------------------------
def _node_att_kernel(adj_ref, xk_ref, xrows_ref, noise_ref,
                     w1_ref, b1_ref, we1_ref, be1_ref, we2_ref, be2_ref,
                     att_ref, info_ref, xa_ref,
                     agg_ref,
                     *, tile_n, n_valid, inv_temp, inv_r, inv_1mr):
    i = pl.program_id(0)
    k = pl.program_id(1)

    @pl.when(k == 0)
    def _():
        agg_ref[...] = jnp.zeros_like(agg_ref)

    # (A @ X) accumulated over the contraction (source-node) axis. bf16 MXU, f32 acc.
    agg_ref[...] += jnp.dot(adj_ref[...], xk_ref[...],
                            preferred_element_type=jnp.float32)

    @pl.when(k == pl.num_programs(1) - 1)
    def _():
        agg = agg_ref[...]                                                 # (TN, F)

        # conv_k.get_emb : relu((A @ X) @ W1 + b1)
        emb = jnp.maximum(
            jnp.dot(agg.astype(jnp.bfloat16), w1_ref[...],
                    preferred_element_type=jnp.float32) + b1_ref[...], 0.0)  # (TN, H)

        # extractor : 2-layer MLP -> per-node logit.  The narrow (H2 -> 1)
        # projection is a fused multiply + lane-reduce (no 1-lane-wide MXU matmul).
        h = jnp.maximum(
            jnp.dot(emb.astype(jnp.bfloat16), we1_ref[...],
                    preferred_element_type=jnp.float32) + be1_ref[...], 0.0)  # (TN, H2)
        logit = jnp.sum(h * we2_ref[...], axis=1, keepdims=True) + be2_ref[...]  # (TN,1)

        # concrete_sample : sigmoid((logit + noise) / temp)   (f32 VPU/EUP)
        att = jax.nn.sigmoid((logit + noise_ref[...]) * inv_temp)           # (TN, 1)

        # mask padded nodes
        row = jax.lax.broadcasted_iota(jnp.int32, (tile_n, 1), 0) + i * tile_n
        valid = row < n_valid
        att = jnp.where(valid, att, 0.0)
        att_ref[...] = att

        # __loss__ : per-node info terms (final mean is taken in the wrapper)
        info = (att * jnp.log(att * inv_r + 1e-6)
                + (1.0 - att) * jnp.log((1.0 - att) * inv_1mr + 1e-6))
        info_ref[...] = jnp.where(valid, info, 0.0)

        # xa = att_src * x for this node-row tile (consumed by Kernel B), bf16.
        xa_ref[...] = (att * xrows_ref[...].astype(jnp.float32)).astype(jnp.bfloat16)


# ---------------------------------------------------------------------------
# Kernel B: attention-masked GCN -> sp_emb = relu((att_i * (A @ xa)) @ W2 + b2)
# grid: (node-row tile i, contraction tile k); xa precomputed by Kernel A.
# ---------------------------------------------------------------------------
def _sp_conv_kernel(adj_ref, xa_ref, att_ref, w2_ref, b2_ref, sp_ref, agg_ref):
    k = pl.program_id(1)

    @pl.when(k == 0)
    def _():
        agg_ref[...] = jnp.zeros_like(agg_ref)

    agg_ref[...] += jnp.dot(adj_ref[...], xa_ref[...],
                            preferred_element_type=jnp.float32)             # (TN, F)

    @pl.when(k == pl.num_programs(1) - 1)
    def _():
        agg = agg_ref[...] * att_ref[...]                                    # att_dst scale
        sp = jnp.dot(agg.astype(jnp.bfloat16), w2_ref[...],
                     preferred_element_type=jnp.float32) + b2_ref[...]       # (TN, Hout)
        sp_ref[...] = jnp.maximum(sp, 0.0)


def get_r(decay_interval, decay_r, current_epoch, init_r=0.9, final_r=0.5):
    r = init_r - current_epoch // decay_interval * decay_r
    if r < final_r:
        r = final_r
    return r


def gsat_forward(edge_index, inputs, params, epoch, training, key,
                 fix_r=None, decay_interval=10, decay_r=0.1,
                 init_r=0.9, final_r=0.5, temp=1.0):
    """Returns (edge_att, loss, sp_emb, edge_weights, feat_weights)."""
    N, F = inputs.shape
    E = edge_index.shape[1]
    src = edge_index[0].astype(jnp.int32)
    dst = edge_index[1].astype(jnp.int32)
    H = params["w1"].shape[1]
    H2 = params["we1"].shape[1]
    Hout = params["w2"].shape[1]

    # --- padding / tiling: node axis padded to a multiple of 256; TN=256 always
    #     (256x256 MXU fill on v6e/v7x); K-tiling bounds VMEM independent of N. ---
    Np = max(_round_up(N, 256), 256)
    TN = 256
    TK = 256
    grid_n = Np // TN
    grid_k = Np // TK

    # --- glue: sym-normalized adjacency with self loops, built directly into the
    #     padded bf16 buffer (no NxN f32 intermediates).  Degree from the edge list;
    #     assumes no duplicate edges / pre-existing self loops (as in PyG gcn_norm). ---
    deg = jnp.ones((N,), jnp.float32).at[dst].add(1.0)        # self loop + in-degree
    dinv = jax.lax.rsqrt(jnp.maximum(deg, 1.0))
    adj_p = jnp.zeros((Np, Np), jnp.bfloat16)
    adj_p = adj_p.at[dst, src].set((dinv[dst] * dinv[src]).astype(jnp.bfloat16))
    diag = jnp.arange(N)
    adj_p = adj_p.at[diag, diag].set((dinv * dinv).astype(jnp.bfloat16))

    x_p = jnp.pad(inputs.astype(jnp.bfloat16), ((0, Np - N), (0, 0)))

    if training:
        u = jax.random.uniform(key, (Np, 1), jnp.float32, 1e-10, 1.0 - 1e-10)
        noise = jnp.log(u) - jnp.log(1.0 - u)
    else:
        noise = jnp.zeros((Np, 1), jnp.float32)

    r = float(fix_r) if fix_r is not None else float(
        get_r(decay_interval, decay_r, epoch, init_r=init_r, final_r=final_r))

    # matmul operands in bf16, elementwise params in f32
    w1 = params["w1"].astype(jnp.bfloat16)                         # (F, H)
    b1 = params["b1"].astype(jnp.float32).reshape(1, H)
    we1 = params["we1"].astype(jnp.bfloat16)                       # (H, H2)
    be1 = params["be1"].astype(jnp.float32).reshape(1, H2)
    we2 = params["we2"].astype(jnp.float32).reshape(1, H2)         # (H2,1) -> row
    be2 = params["be2"].astype(jnp.float32).reshape(1, 1)
    w2 = params["w2"].astype(jnp.bfloat16)                         # (F, Hout)
    b2 = params["b2"].astype(jnp.float32).reshape(1, Hout)

    cp = _compiler_params()

    # ---- Kernel A: node attention + per-node info terms + xa = att*x ----
    node_call = pl.pallas_call(
        functools.partial(_node_att_kernel, tile_n=TN, n_valid=N,
                          inv_temp=1.0 / float(temp),
                          inv_r=1.0 / r, inv_1mr=1.0 / (1.0 - r + 1e-6)),
        grid=(grid_n, grid_k),
        in_specs=[
            pl.BlockSpec((TN, TK), lambda i, k: (i, k)),   # adj tile
            pl.BlockSpec((TK, F), lambda i, k: (k, 0)),    # x, contraction blocks
            pl.BlockSpec((TN, F), lambda i, k: (i, 0)),    # x, row tile (for xa)
            pl.BlockSpec((TN, 1), lambda i, k: (i, 0)),    # noise
            pl.BlockSpec((F, H), lambda i, k: (0, 0)),
            pl.BlockSpec((1, H), lambda i, k: (0, 0)),
            pl.BlockSpec((H, H2), lambda i, k: (0, 0)),
            pl.BlockSpec((1, H2), lambda i, k: (0, 0)),
            pl.BlockSpec((1, H2), lambda i, k: (0, 0)),
            pl.BlockSpec((1, 1), lambda i, k: (0, 0)),
        ],
        out_specs=[
            pl.BlockSpec((TN, 1), lambda i, k: (i, 0)),    # att
            pl.BlockSpec((TN, 1), lambda i, k: (i, 0)),    # info terms
            pl.BlockSpec((TN, F), lambda i, k: (i, 0)),    # xa = att*x (bf16)
        ],
        out_shape=[
            jax.ShapeDtypeStruct((Np, 1), jnp.float32),
            jax.ShapeDtypeStruct((Np, 1), jnp.float32),
            jax.ShapeDtypeStruct((Np, F), jnp.bfloat16),
        ],
        scratch_shapes=[pltpu.VMEM((TN, F), jnp.float32)],
        compiler_params=cp,
    )
    att_col, info_col, xa = node_call(adj_p, x_p, x_p, noise,
                                      w1, b1, we1, be1, we2, be2)
    loss = jnp.sum(info_col) / N                       # mean over valid nodes

    # ---- Kernel B: attention-masked GCN -> sp_emb ----
    sp_call = pl.pallas_call(
        _sp_conv_kernel,
        grid=(grid_n, grid_k),
        in_specs=[
            pl.BlockSpec((TN, TK), lambda i, k: (i, k)),   # adj tile
            pl.BlockSpec((TK, F), lambda i, k: (k, 0)),    # xa, contraction blocks
            pl.BlockSpec((TN, 1), lambda i, k: (i, 0)),    # att (this row tile)
            pl.BlockSpec((F, Hout), lambda i, k: (0, 0)),
            pl.BlockSpec((1, Hout), lambda i, k: (0, 0)),
        ],
        out_specs=pl.BlockSpec((TN, Hout), lambda i, k: (i, 0)),
        out_shape=jax.ShapeDtypeStruct((Np, Hout), jnp.float32),
        scratch_shapes=[pltpu.VMEM((TN, F), jnp.float32)],
        compiler_params=cp,
    )
    sp_emb = sp_call(adj_p, xa, att_col, w2, b2)[:N]

    # ---- lift_node_att_to_edge_att: plain O(E) gather (per review; no Pallas kernel) ----
    att_n = att_col[:N, 0]
    edge_att = (att_n[src] * att_n[dst]).reshape(E, 1)

    # conv_k's auxiliary outputs (edge_weights / feat_weights): synthetic ones.
    edge_weights = jnp.ones((E,), jnp.float32)
    feat_weights = jnp.ones((F,), jnp.float32)
    return edge_att, loss, sp_emb, edge_weights, feat_weights


if __name__ == "__main__":
    key = jax.random.PRNGKey(0)
    N, F, H, H2, Hout = 300, 16, 32, 16, 32     # Np=512 -> 2x2 grid (tests pipeline)

    k_x, k1, k2, k3, k4, k_noise = jax.random.split(key, 6)
    inputs = jax.random.normal(k_x, (N, F), jnp.float32)

    # undirected ring graph: E = 2 * N directed edges
    s = jnp.arange(N, dtype=jnp.int32)
    d = (s + 1) % N
    edge_index = jnp.stack([jnp.concatenate([s, d]),
                            jnp.concatenate([d, s])])                 # (2, 600)

    params = {
        "w1":  0.1 * jax.random.normal(k1, (F, H), jnp.float32),
        "b1":  jnp.zeros((1, H), jnp.float32),
        "we1": 0.1 * jax.random.normal(k2, (H, H2), jnp.float32),
        "be1": jnp.zeros((1, H2), jnp.float32),
        "we2": 0.1 * jax.random.normal(k3, (H2, 1), jnp.float32),
        "be2": jnp.zeros((1, 1), jnp.float32),
        "w2":  0.1 * jax.random.normal(k4, (F, Hout), jnp.float32),
        "b2":  jnp.zeros((1, Hout), jnp.float32),
    }

    edge_att, loss, sp_emb, edge_w, feat_w = gsat_forward(
        edge_index, inputs, params, epoch=5, training=True, key=k_noise,
        fix_r=None, decay_interval=10, decay_r=0.1, init_r=0.9, final_r=0.5)

    jax.block_until_ready((edge_att, loss, sp_emb, edge_w, feat_w))
    assert edge_att.shape == (edge_index.shape[1], 1)
    assert sp_emb.shape == (N, Hout)
    assert bool(jnp.isfinite(loss))
    assert bool(jnp.all(jnp.isfinite(edge_att)))
    assert bool(jnp.all(jnp.isfinite(sp_emb)))
    print("KERNEL_OK")
</pallas_src>

<mosaic_0001>
module attributes {stable_mosaic.version = 11 : i64} {
  func.func @_node_att_kernel(%arg0: i32, %arg1: i32, %arg2: memref<256x256xbf16, #tpu.memory_space<vmem>>, %arg3: memref<256x16xbf16, #tpu.memory_space<vmem>>, %arg4: memref<256x16xbf16, #tpu.memory_space<vmem>>, %arg5: memref<256x1xf32, #tpu.memory_space<vmem>>, %arg6: memref<16x32xbf16, #tpu.memory_space<vmem>>, %arg7: memref<1x32xf32, #tpu.memory_space<vmem>>, %arg8: memref<32x16xbf16, #tpu.memory_space<vmem>>, %arg9: memref<1x16xf32, #tpu.memory_space<vmem>>, %arg10: memref<1x16xf32, #tpu.memory_space<vmem>>, %arg11: memref<1x1xf32, #tpu.memory_space<vmem>>, %arg12: memref<256x1xf32, #tpu.memory_space<vmem>>, %arg13: memref<256x1xf32, #tpu.memory_space<vmem>>, %arg14: memref<256x16xbf16, #tpu.memory_space<vmem>>, %arg15: memref<256x16xf32, #tpu.memory_space<vmem>>) attributes {dimension_semantics = [#tpu.dimension_semantics<parallel>, #tpu.dimension_semantics<arbitrary>], iteration_bounds = array<i64: 2, 2>, scalar_prefetch = 0 : i64, scratch_operands = 1 : i64, tpu.core_type = #tpu.core_type<tc>, window_params = [{transform_indices = @transform_0, window_bounds = array<i64: 256, 256>}, {transform_indices = @transform_1, window_bounds = array<i64: 256, 16>}, {transform_indices = @transform_2, window_bounds = array<i64: 256, 16>}, {transform_indices = @transform_3, window_bounds = array<i64: 256, 1>}, {pipeline_mode = #tpu.pipeline_mode<synchronous>, transform_indices = @transform_4, window_bounds = array<i64: 16, 32>}, {pipeline_mode = #tpu.pipeline_mode<synchronous>, transform_indices = @transform_5, window_bounds = array<i64: 1, 32>}, {pipeline_mode = #tpu.pipeline_mode<synchronous>, transform_indices = @transform_6, window_bounds = array<i64: 32, 16>}, {pipeline_mode = #tpu.pipeline_mode<synchronous>, transform_indices = @transform_7, window_bounds = array<i64: 1, 16>}, {pipeline_mode = #tpu.pipeline_mode<synchronous>, transform_indices = @transform_8, window_bounds = array<i64: 1, 16>}, {pipeline_mode = #tpu.pipeline_mode<synchronous>, transform_indices = @transform_9, window_bounds = array<i64: 1, 1>}, {transform_indices = @transform_10, window_bounds = array<i64: 256, 1>}, {transform_indices = @transform_11, window_bounds = array<i64: 256, 1>}, {transform_indices = @transform_12, window_bounds = array<i64: 256, 16>}]} {
    %c0_i32 = arith.constant 0 : i32
    %0 = arith.cmpi eq, %arg1, %c0_i32 : i32
    %1 = arith.extui %0 : i1 to i32
    %c0_i32_0 = arith.constant 0 : i32
    %2 = arith.cmpi ne, %1, %c0_i32_0 : i32
    scf.if %2 {
      %cst_9 = arith.constant 0.000000e+00 : f32
      %12 = vector.broadcast %cst_9 : f32 to vector<256x16xf32>
      %c0_10 = arith.constant 0 : index
      %c0_11 = arith.constant 0 : index
      %13 = vector.load %arg15[%c0_10, %c0_11] : memref<256x16xf32, #tpu.memory_space<vmem>>, vector<256x16xf32>
      tpu.vector_store %arg15[%c0_10, %c0_11], %12 {strides = array<i32>} : memref<256x16xf32, #tpu.memory_space<vmem>>, vector<256x16xf32>,
    } else {
    }
    %c0 = arith.constant 0 : index
    %c0_1 = arith.constant 0 : index
    %3 = vector.load %arg15[%c0, %c0_1] : memref<256x16xf32, #tpu.memory_space<vmem>>, vector<256x16xf32>
    %c0_2 = arith.constant 0 : index
    %c0_3 = arith.constant 0 : index
    %4 = vector.load %arg2[%c0_2, %c0_3] : memref<256x256xbf16, #tpu.memory_space<vmem>>, vector<256x256xbf16>
    %c0_4 = arith.constant 0 : index
    %c0_5 = arith.constant 0 : index
    %5 = vector.load %arg3[%c0_4, %c0_5] : memref<256x16xbf16, #tpu.memory_space<vmem>>, vector<256x16xbf16>
    %cst = arith.constant dense<0.000000e+00> : vector<256x16xf32>
    %6 = tpu.matmul %4, %5, %cst {dimension_numbers = #tpu.dot_dimension_numbers<[1], [0], [0], [1], [0, 0, 1, 1], [], []>} : vector<256x256xbf16>, vector<256x16xbf16>, vector<256x16xf32> -> vector<256x16xf32>
    %7 = arith.addf %3, %6 : vector<256x16xf32>
    %c0_6 = arith.constant 0 : index
    %c0_7 = arith.constant 0 : index
    %8 = vector.load %arg15[%c0_6, %c0_7] : memref<256x16xf32, #tpu.memory_space<vmem>>, vector<256x16xf32>
    tpu.vector_store %arg15[%c0_6, %c0_7], %7 {strides = array<i32>} : memref<256x16xf32, #tpu.memory_space<vmem>>, vector<256x16xf32>,
    %c1_i32 = arith.constant 1 : i32
    %9 = arith.cmpi eq, %arg1, %c1_i32 : i32
    %10 = arith.extui %9 : i1 to i32
    %c0_i32_8 = arith.constant 0 : i32
    %11 = arith.cmpi ne, %10, %c0_i32_8 : i32
    scf.if %11 {
      %c0_9 = arith.constant 0 : index
      %c0_10 = arith.constant 0 : index
      %12 = vector.load %arg15[%c0_9, %c0_10] : memref<256x16xf32, #tpu.memory_space<vmem>>, vector<256x16xf32>
      %13 = arith.truncf %12 : vector<256x16xf32> to vector<256x16xbf16>
      %c0_11 = arith.constant 0 : index
      %c0_12 = arith.constant 0 : index
      %14 = vector.load %arg6[%c0_11, %c0_12] : memref<16x32xbf16, #tpu.memory_space<vmem>>, vector<16x32xbf16>
      %cst_13 = arith.constant dense<0.000000e+00> : vector<256x32xf32>
      %15 = tpu.matmul %13, %14, %cst_13 {dimension_numbers = #tpu.dot_dimension_numbers<[1], [0], [0], [1], [0, 0, 1, 1], [], []>} : vector<256x16xbf16>, vector<16x32xbf16>, vector<256x32xf32> -> vector<256x32xf32>
      %c0_14 = arith.constant 0 : index
      %c0_15 = arith.constant 0 : index
      %16 = vector.load %arg7[%c0_14, %c0_15] : memref<1x32xf32, #tpu.memory_space<vmem>>, vector<1x32xf32>
      %17 = vector.broadcast %16 : vector<1x32xf32> to vector<256x32xf32>
      %18 = arith.addf %15, %17 : vector<256x32xf32>
      %cst_16 = arith.constant 0.000000e+00 : f32
      %19 = vector.broadcast %cst_16 : f32 to vector<256x32xf32>
      %20 = arith.maximumf %18, %19 : vector<256x32xf32>
      %21 = arith.truncf %20 : vector<256x32xf32> to vector<256x32xbf16>
      %c0_17 = arith.constant 0 : index
      %c0_18 = arith.constant 0 : index
      %22 = vector.load %arg8[%c0_17, %c0_18] : memref<32x16xbf16, #tpu.memory_space<vmem>>, vector<32x16xbf16>
      %cst_19 = arith.constant dense<0.000000e+00> : vector<256x16xf32>
      %23 = tpu.matmul %21, %22, %cst_19 {dimension_numbers = #tpu.dot_dimension_numbers<[1], [0], [0], [1], [0, 0, 1, 1], [], []>} : vector<256x32xbf16>, vector<32x16xbf16>, vector<256x16xf32> -> vector<256x16xf32>
      %c0_20 = arith.constant 0 : index
      %c0_21 = arith.constant 0 : index
      %24 = vector.load %arg9[%c0_20, %c0_21] : memref<1x16xf32, #tpu.memory_space<vmem>>, vector<1x16xf32>
      %25 = vector.broadcast %24 : vector<1x16xf32> to vector<256x16xf32>
      %26 = arith.addf %23, %25 : vector<256x16xf32>
      %cst_22 = arith.constant 0.000000e+00 : f32
      %27 = vector.broadcast %cst_22 : f32 to vector<256x16xf32>
      %28 = arith.maximumf %26, %27 : vector<256x16xf32>
      %c0_23 = arith.constant 0 : index
      %c0_24 = arith.constant 0 : index
      %29 = vector.load %arg10[%c0_23, %c0_24] : memref<1x16xf32, #tpu.memory_space<vmem>>, vector<1x16xf32>
      %30 = vector.broadcast %29 : vector<1x16xf32> to vector<256x16xf32>
      %31 = arith.mulf %28, %30 : vector<256x16xf32>
      %cst_25 = arith.constant dense<0.000000e+00> : vector<256xf32>
      %32 = vector.multi_reduction <add>, %31, %cst_25 [1] : vector<256x16xf32> to vector<256xf32>
      %33 = vector.shape_cast %32 : vector<256xf32> to vector<256x1xf32>
      %c0_26 = arith.constant 0 : index
      %c0_27 = arith.constant 0 : index
      %34 = vector.load %arg11[%c0_26, %c0_27] : memref<1x1xf32, #tpu.memory_space<vmem>>, vector<1x1xf32>
      %35 = vector.broadcast %34 : vector<1x1xf32> to vector<256x1xf32>
      %36 = arith.addf %33, %35 : vector<256x1xf32>
      %c0_28 = arith.constant 0 : index
      %c0_29 = arith.constant 0 : index
      %37 = vector.load %arg5[%c0_28, %c0_29] : memref<256x1xf32, #tpu.memory_space<vmem>>, vector<256x1xf32>
      %38 = arith.addf %36, %37 : vector<256x1xf32>
      %cst_30 = arith.constant 1.000000e+00 : f32
      %39 = vector.broadcast %cst_30 : f32 to vector<256x1xf32>
      %40 = arith.mulf %38, %39 : vector<256x1xf32>
      %41 = arith.negf %40 : vector<256x1xf32>
      %42 = math.exp %41 : vector<256x1xf32>
      %cst_31 = arith.constant 1.000000e+00 : f32
      %43 = vector.broadcast %cst_31 : f32 to vector<256x1xf32>
      %44 = arith.addf %43, %42 : vector<256x1xf32>
      %45 = arith.divf %43, %44 : vector<256x1xf32>
      %46 = tpu.iota {dimensions = array<i32: 0>} : vector<256x1xi32>
      %c256_i32 = arith.constant 256 : i32
      %47 = arith.muli %arg0, %c256_i32 : i32
      %48 = vector.broadcast %47 : i32 to vector<256x1xi32>
      %49 = arith.addi %46, %48 : vector<256x1xi32>
      %c300_i32 = arith.constant 300 : i32
      %50 = vector.broadcast %c300_i32 : i32 to vector<256x1xi32>
      %51 = arith.cmpi slt, %49, %50 : vector<256x1xi32>
      %cst_32 = arith.constant 0.000000e+00 : f32
      %52 = vector.broadcast %cst_32 : f32 to vector<256x1xf32>
      %53 = arith.select %51, %45, %52 : vector<256x1xi1>, vector<256x1xf32>
      %c0_33 = arith.constant 0 : index
      %c0_34 = arith.constant 0 : index
      %54 = vector.load %arg12[%c0_33, %c0_34] : memref<256x1xf32, #tpu.memory_space<vmem>>, vector<256x1xf32>
      tpu.vector_store %arg12[%c0_33, %c0_34], %53 {strides = array<i32>} : memref<256x1xf32, #tpu.memory_space<vmem>>, vector<256x1xf32>,
      %cst_35 = arith.constant 1.11111116 : f32
      %55 = vector.broadcast %cst_35 : f32 to vector<256x1xf32>
      %56 = arith.mulf %53, %55 : vector<256x1xf32>
      %cst_36 = arith.constant 9.99999997E-7 : f32
      %57 = vector.broadcast %cst_36 : f32 to vector<256x1xf32>
      %58 = arith.addf %56, %57 : vector<256x1xf32>
      %59 = math.log %58 : vector<256x1xf32>
      %60 = arith.mulf %53, %59 : vector<256x1xf32>
      %cst_37 = arith.constant 1.000000e+00 : f32
      %61 = vector.broadcast %cst_37 : f32 to vector<256x1xf32>
      %62 = arith.subf %61, %53 : vector<256x1xf32>
      %cst_38 = arith.constant 1.000000e+00 : f32
      %63 = vector.broadcast %cst_38 : f32 to vector<256x1xf32>
      %64 = arith.subf %63, %53 : vector<256x1xf32>
      %cst_39 = arith.constant 9.99989986 : f32
      %65 = vector.broadcast %cst_39 : f32 to vector<256x1xf32>
      %66 = arith.mulf %64, %65 : vector<256x1xf32>
      %cst_40 = arith.constant 9.99999997E-7 : f32
      %67 = vector.broadcast %cst_40 : f32 to vector<256x1xf32>
      %68 = arith.addf %66, %67 : vector<256x1xf32>
      %69 = math.log %68 : vector<256x1xf32>
      %70 = arith.mulf %62, %69 : vector<256x1xf32>
      %71 = arith.addf %60, %70 : vector<256x1xf32>
      %cst_41 = arith.constant 0.000000e+00 : f32
      %72 = vector.broadcast %cst_41 : f32 to vector<256x1xf32>
      %73 = arith.select %51, %71, %72 : vector<256x1xi1>, vector<256x1xf32>
      %c0_42 = arith.constant 0 : index
      %c0_43 = arith.constant 0 : index
      %74 = vector.load %arg13[%c0_42, %c0_43] : memref<256x1xf32, #tpu.memory_space<vmem>>, vector<256x1xf32>
      tpu.vector_store %arg13[%c0_42, %c0_43], %73 {strides = array<i32>} : memref<256x1xf32, #tpu.memory_space<vmem>>, vector<256x1xf32>,
      %c0_44 = arith.constant 0 : index
      %c0_45 = arith.constant 0 : index
      %75 = vector.load %arg4[%c0_44, %c0_45] : memref<256x16xbf16, #tpu.memory_space<vmem>>, vector<256x16xbf16>
      %76 = arith.extf %75 : vector<256x16xbf16> to vector<256x16xf32>
      %77 = vector.broadcast %53 : vector<256x1xf32> to vector<256x16xf32>
      %78 = arith.mulf %77, %76 : vector<256x16xf32>
      %79 = arith.truncf %78 : vector<256x16xf32> to vector<256x16xbf16>
      %c0_46 = arith.constant 0 : index
      %c0_47 = arith.constant 0 : index
      %80 = vector.load %arg14[%c0_46, %c0_47] : memref<256x16xbf16, #tpu.memory_space<vmem>>, vector<256x16xbf16>
      tpu.vector_store %arg14[%c0_46, %c0_47], %79 {strides = array<i32>} : memref<256x16xbf16, #tpu.memory_space<vmem>>, vector<256x16xbf16>,
    } else {
    }
    return
  }
  func.func @transform_0(%arg0: i32, %arg1: i32) -> (i32, i32) {
    %c0_i32 = arith.constant 0 : i32
    return %arg0, %arg1 : i32, i32
  }
  func.func @transform_1(%arg0: i32, %arg1: i32) -> (i32, i32) {
    %c0_i32 = arith.constant 0 : i32
    %c0_i32_0 = arith.constant 0 : i32
    return %arg1, %c0_i32 : i32, i32
  }
  func.func @transform_2(%arg0: i32, %arg1: i32) -> (i32, i32) {
    %c0_i32 = arith.constant 0 : i32
    %c0_i32_0 = arith.constant 0 : i32
    return %arg0, %c0_i32 : i32, i32
  }
  func.func @transform_3(%arg0: i32, %arg1: i32) -> (i32, i32) {
    %c0_i32 = arith.constant 0 : i32
    %c0_i32_0 = arith.constant 0 : i32
    return %arg0, %c0_i32 : i32, i32
  }
  func.func @transform_4(%arg0: i32, %arg1: i32) -> (i32, i32) {
    %c0_i32 = arith.constant 0 : i32
    %c0_i32_0 = arith.constant 0 : i32
    %c0_i32_1 = arith.constant 0 : i32
    return %c0_i32, %c0_i32_0 : i32, i32
  }
  func.func @transform_5(%arg0: i32, %arg1: i32) -> (i32, i32) {
    %c0_i32 = arith.constant 0 : i32
    %c0_i32_0 = arith.constant 0 : i32
    %c0_i32_1 = arith.constant 0 : i32
    return %c0_i32, %c0_i32_0 : i32, i32
  }
  func.func @transform_6(%arg0: i32, %arg1: i32) -> (i32, i32) {
    %c0_i32 = arith.constant 0 : i32
    %c0_i32_0 = arith.constant 0 : i32
    %c0_i32_1 = arith.constant 0 : i32
    return %c0_i32, %c0_i32_0 : i32, i32
  }
  func.func @transform_7(%arg0: i32, %arg1: i32) -> (i32, i32) {
    %c0_i32 = arith.constant 0 : i32
    %c0_i32_0 = arith.constant 0 : i32
    %c0_i32_1 = arith.constant 0 : i32
    return %c0_i32, %c0_i32_0 : i32, i32
  }
  func.func @transform_8(%arg0: i32, %arg1: i32) -> (i32, i32) {
    %c0_i32 = arith.constant 0 : i32
    %c0_i32_0 = arith.constant 0 : i32
    %c0_i32_1 = arith.constant 0 : i32
    return %c0_i32, %c0_i32_0 : i32, i32
  }
  func.func @transform_9(%arg0: i32, %arg1: i32) -> (i32, i32) {
    %c0_i32 = arith.constant 0 : i32
    %c0_i32_0 = arith.constant 0 : i32
    %c0_i32_1 = arith.constant 0 : i32
    return %c0_i32, %c0_i32_0 : i32, i32
  }
  func.func @transform_10(%arg0: i32, %arg1: i32) -> (i32, i32) {
    %c0_i32 = arith.constant 0 : i32
    %c0_i32_0 = arith.constant 0 : i32
    return %arg0, %c0_i32 : i32, i32
  }
  func.func @transform_11(%arg0: i32, %arg1: i32) -> (i32, i32) {
    %c0_i32 = arith.constant 0 : i32
    %c0_i32_0 = arith.constant 0 : i32
    return %arg0, %c0_i32 : i32, i32
  }
  func.func @transform_12(%arg0: i32, %arg1: i32) -> (i32, i32) {
    %c0_i32 = arith.constant 0 : i32
    %c0_i32_0 = arith.constant 0 : i32
    return %arg0, %c0_i32 : i32, i32
  }
}

</mosaic_0001>

<bundles_post_ra>
// kernel: tpu_custom_call.1
= control target key start
LH: loop header
LB: loop body
LE: loop exit
PB: predicated region body
PF: predicated region fallthrough
CT: control target
= control target key end

     0   :  { %s6092_s0 = inlined_call_operand.vmem [shape: bf16[512,512], index: 0, kind: input, shape index: {}]   ;;  %s6093_s1 = inlined_call_operand.vmem [shape: bf16[512,16], index: 1, kind: input, shape index: {}]   ;;  %s6094_s2 = inlined_call_operand.vmem [shape: bf16[512,16], index: 2, kind: input, shape index: {}]   ;;  %s6095_s3 = inlined_call_operand.vmem [shape: f32[512,1], index: 3, kind: input, shape index: {}]   ;;  %s6096_s4 = inlined_call_operand.vmem [shape: bf16[16,32], index: 4, kind: input, shape index: {}]   ;;  %s6097_s5 = inlined_call_operand.vmem [shape: f32[1,32], index: 5, kind: input, shape index: {}]   ;;  %s6098_s6 = inlined_call_operand.vmem [shape: bf16[32,16], index: 6, kind: input, shape index: {}]   ;;  %s6099_s7 = inlined_call_operand.vmem [shape: f32[1,16], index: 7, kind: input, shape index: {}]   ;;  %s6100_s8 = inlined_call_operand.vmem [shape: f32[1,16], index: 8, kind: input, shape index: {}]   ;;  %s6101_s9 = inlined_call_operand.<no memory space> [shape: f32[1,1], index: 9, kind: input, shape index: {}]   ;;  %s6102_s10 = inlined_call_operand.vmem [shape: f32[512,1], index: 10, kind: output, shape index: {0}]   ;;  %s6103_s11 = inlined_call_operand.vmem [shape: f32[512,1], index: 11, kind: output, shape index: {1}]   ;;  %s6104_s12 = inlined_call_operand.vmem [shape: bf16[512,16], index: 12, kind: output, shape index: {2}]  }
   0x1   :  { %6124 = sst [smem:[#allocation20_spill]] %s6092_s0  ;;  %v18_v0 = vstv %s6101_s9 }
   0x2   :  { %6125 = sst [smem:[#allocation21_spill]] %s6093_s1  ;;  %19 = vst [vmem:[#allocation3] sm:$0x1] %v18_v0 }
   0x3   :  { %6126 = sst [smem:[#allocation22_spill]] %s6100_s8 }
   0x4   :  { %s4567_s23 = smov 0   ;;  %s4569_s24 = smov 0  }
   0x5   :  { %s4571_s25 = smov 0   ;;  %s4573_s26 = smov 0  }
   0x6   :  { %s4575_s27 = smov 0   ;;  %s4577_s28 = smov 0  }
   0x7   :  { %s4579_s29 = smov 0  }
   0x8 LB: > { %6127 = sst [smem:[#allocation5_spill]] %s4487_s27  ;;  %s34_s9 = sadd.s32 1, %s4487_s27  ;;  %s4495_s29 = sphi %s4579_s29, %s25_s29   ;;  %s4491_s28 = sphi %s4577_s28, %s6164_s28   ;;  %s4487_s27 = sphi %s4575_s27, %s6163_s27   ;;  %s4483_s26 = sphi %s4573_s26, %s6162_s26   ;;  %s4479_s25 = sphi %s4571_s25, %s6161_s25   ;;  %s4475_s24 = sphi %s4569_s24, %s6166_s24   ;;  %s4471_s23 = sphi %s4567_s23, %s6165_s23  }
   0x9   : > { %6128 = sst [smem:[#allocation6_spill]] %s4491_s28  ;;  %p35_p0 = scmp.ge.s32.totalorder %s34_s9, 2 }
   0xa   : > { %s37_s30 = sadd.s32 1, %s4491_s28  ;;  %p53_p1 = scmp.ne.s32.totalorder %s4475_s24, %s4471_s23 }
   0xb   : > { %p54_p2 = scmp.eq.s32.totalorder %s4495_s29, 0  ;;  %s6168_s9 = smov (%p35_p0, %s34_s9), 0 }
   0xc   : > { %6129 = sst [smem:[#allocation7_spill]] %s6168_s9  ;;  %s6170_s30 = smov (!%p35_p0, %s37_s30), %s4491_s28 }
   0xd   : > { %p55_p3 = por %p54_p2, %p53_p1  ;;  %p39_p4 = scmp.ge.s32.totalorder %s6170_s30, 2 }
   0xe   : > { %s42_s13 = ssub.s32 %s4487_s27, %s6168_s9  ;;  %s46_s16 = sadd.s32 1, %s4475_s24 }
   0xf   : > { %s6172_s30 = smov (%p39_p4, %s6170_s30), 0  ;;  %p3536_p6 = scmp.ge.s32.totalorder %s4495_s29, 4 }
  0x10   : > { %6130 = sst [smem:[#allocation8_spill]] %s6172_s30  ;;  %s41_s14 = ssub.s32 %s4491_s28, %s6172_s30 }
  0x11   : > { %s43_s15 = sor.u32 %s42_s13, %s41_s14  ;;  %379 = sbr.rel (%p3536_p6) target bundleno = 50 (0x32), region = 40 }
  0x12   : > { %p44_p5 = scmp.eq.s32.totalorder %s43_s15, 0 }
  0x14   : > { %s4618_s17 = scalar_select %p44_p5, %s4475_s24, %s46_s16  }
  0x16   : > { %6131 = sst [smem:[#allocation9_spill]] %s4618_s17 }
  0x18   : > { %382 = sbr.rel (!%p55_p3) target bundleno = 50 (0x32), region = 44  ;;  %s384_s18 = sand.u32 (%p55_p3), 1, %s4475_s24  }
  0x19   : > { %s3539_s19 = sshll.u32 (%p55_p3), %s4487_s27, 1  ;;  %s3537_s20 = sshll.u32 (%p55_p3), %s384_s18, 8 }
  0x1a   : > { %s3712_s21 = sshll.u32 (%p55_p3), %s4491_s28, 7  ;;  %s6132_s0 = sld [smem:[#allocation20_spill]] (%p55_p3) }
  0x1b   : > { %s390_s22 = sadd.s32 (%p55_p3), %s3712_s21, %s3539_s19  ;;  %s4632_s14 = scalar_lea.vmem (%p55_p3), [#allocation4], %s3537_s20 }
  0x1c   : > { %s3541_s9 = sshll.u32 (%p55_p3), %s390_s22, 2 }
  0x20   : > { %s4627_s13 = scalar_lea.vmem %s6132_s0, %s3541_s9 }
  0x21   : > { %v482_v1 = vld [vmem:[%s4627_s13] sm:$0xff]  ;;  %v484_v2 = vld [vmem:[%s4627_s13 + $0x10] sm:$0xff] }
  0x22   : > { %v486_v3 = vld [vmem:[%s4627_s13 + $0x20] sm:$0xff]  ;;  %483 = vst [vmem:[%s4632_s14] sm:$0xff] %v482_v1  ;;  %485 = vst [vmem:[%s4632_s14 + $0x8] sm:$0xff] %v484_v2  ;;  %v488_v4 = vld [vmem:[%s4627_s13 + $0x30] sm:$0xff] }
  0x23   : > { %487 = vst [vmem:[%s4632_s14 + $0x10] sm:$0xff] %v486_v3  ;;  %v490_v5 = vld [vmem:[%s4627_s13 + $0x40] sm:$0xff]  ;;  %v492_v6 = vld [vmem:[%s4627_s13 + $0x50] sm:$0xff]  ;;  %489 = vst [vmem:[%s4632_s14 + $0x18] sm:$0xff] %v488_v4 }
  0x24   : > { %491 = vst [vmem:[%s4632_s14 + $0x20] sm:$0xff] %v490_v5  ;;  %493 = vst [vmem:[%s4632_s14 + $0x28] sm:$0xff] %v492_v6  ;;  %v494_v7 = vld [vmem:[%s4627_s13 + $0x60] sm:$0xff]  ;;  %v496_v8 = vld [vmem:[%s4627_s13 + $0x70] sm:$0xff] }
  0x25   : > { %v498_v9 = vld [vmem:[%s4627_s13 + $0x80] sm:$0xff]  ;;  %495 = vst [vmem:[%s4632_s14 + $0x30] sm:$0xff] %v494_v7  ;;  %497 = vst [vmem:[%s4632_s14 + $0x38] sm:$0xff] %v496_v8  ;;  %v500_v10 = vld [vmem:[%s4627_s13 + $0x90] sm:$0xff] }
  0x26   : > { %499 = vst [vmem:[%s4632_s14 + $0x40] sm:$0xff] %v498_v9  ;;  %v502_v11 = vld [vmem:[%s4627_s13 + $0xa0] sm:$0xff]  ;;  %v504_v12 = vld [vmem:[%s4627_s13 + $0xb0] sm:$0xff]  ;;  %501 = vst [vmem:[%s4632_s14 + $0x48] sm:$0xff] %v500_v10 }
  0x27   : > { %503 = vst [vmem:[%s4632_s14 + $0x50] sm:$0xff] %v502_v11  ;;  %505 = vst [vmem:[%s4632_s14 + $0x58] sm:$0xff] %v504_v12  ;;  %v506_v13 = vld [vmem:[%s4627_s13 + $0xc0] sm:$0xff]  ;;  %v508_v14 = vld [vmem:[%s4627_s13 + $0xd0] sm:$0xff] }
  0x28   : > { %v510_v15 = vld [vmem:[%s4627_s13 + $0xe0] sm:$0xff]  ;;  %507 = vst [vmem:[%s4632_s14 + $0x60] sm:$0xff] %v506_v13  ;;  %509 = vst [vmem:[%s4632_s14 + $0x68] sm:$0xff] %v508_v14  ;;  %v512_v16 = vld [vmem:[%s4627_s13 + $0xf0] sm:$0xff] }
  0x29   : > { %511 = vst [vmem:[%s4632_s14 + $0x70] sm:$0xff] %v510_v15  ;;  %v514_v17 = vld [vmem:[%s4627_s13 + $0x100] sm:$0xff]  ;;  %v516_v18 = vld [vmem:[%s4627_s13 + $0x110] sm:$0xff]  ;;  %513 = vst [vmem:[%s4632_s14 + $0x78] sm:$0xff] %v512_v16 }
  0x2a   : > { %515 = vst [vmem:[%s4632_s14 + $0x80] sm:$0xff] %v514_v17  ;;  %517 = vst [vmem:[%s4632_s14 + $0x88] sm:$0xff] %v516_v18  ;;  %v518_v19 = vld [vmem:[%s4627_s13 + $0x120] sm:$0xff]  ;;  %v520_v20 = vld [vmem:[%s4627_s13 + $0x130] sm:$0xff] }
  0x2b   : > { %v522_v21 = vld [vmem:[%s4627_s13 + $0x140] sm:$0xff]  ;;  %519 = vst [vmem:[%s4632_s14 + $0x90] sm:$0xff] %v518_v19  ;;  %521 = vst [vmem:[%s4632_s14 + $0x98] sm:$0xff] %v520_v20  ;;  %v524_v22 = vld [vmem:[%s4627_s13 + $0x150] sm:$0xff] }
  0x2c   : > { %523 = vst [vmem:[%s4632_s14 + $0xa0] sm:$0xff] %v522_v21  ;;  %v526_v23 = vld [vmem:[%s4627_s13 + $0x160] sm:$0xff]  ;;  %v528_v24 = vld [vmem:[%s4627_s13 + $0x170] sm:$0xff]  ;;  %525 = vst [vmem:[%s4632_s14 + $0xa8] sm:$0xff] %v524_v22 }
  0x2d   : > { %527 = vst [vmem:[%s4632_s14 + $0xb0] sm:$0xff] %v526_v23  ;;  %529 = vst [vmem:[%s4632_s14 + $0xb8] sm:$0xff] %v528_v24  ;;  %v530_v25 = vld [vmem:[%s4627_s13 + $0x180] sm:$0xff]  ;;  %v532_v26 = vld [vmem:[%s4627_s13 + $0x190] sm:$0xff] }
  0x2e   : > { %v534_v27 = vld [vmem:[%s4627_s13 + $0x1a0] sm:$0xff]  ;;  %531 = vst [vmem:[%s4632_s14 + $0xc0] sm:$0xff] %v530_v25  ;;  %533 = vst [vmem:[%s4632_s14 + $0xc8] sm:$0xff] %v532_v26  ;;  %v536_v28 = vld [vmem:[%s4627_s13 + $0x1b0] sm:$0xff] }
  0x2f   : > { %535 = vst [vmem:[%s4632_s14 + $0xd0] sm:$0xff] %v534_v27  ;;  %v538_v29 = vld [vmem:[%s4627_s13 + $0x1c0] sm:$0xff]  ;;  %v540_v30 = vld [vmem:[%s4627_s13 + $0x1d0] sm:$0xff]  ;;  %537 = vst [vmem:[%s4632_s14 + $0xd8] sm:$0xff] %v536_v28 }
  0x30   : > { %539 = vst [vmem:[%s4632_s14 + $0xe0] sm:$0xff] %v538_v29  ;;  %541 = vst [vmem:[%s4632_s14 + $0xe8] sm:$0xff] %v540_v30  ;;  %v542_v31 = vld [vmem:[%s4627_s13 + $0x1e0] sm:$0xff]  ;;  %v544_v32 = vld [vmem:[%s4627_s13 + $0x1f0] sm:$0xff] }
  0x31   : > { %543 = vst [vmem:[%s4632_s14 + $0xf0] sm:$0xff] %v542_v31  ;;  %545 = vst [vmem:[%s4632_s14 + $0xf8] sm:$0xff] %v544_v32 }
  0x32 PF: > { %p3542_p7 = scmp.ge.s32.totalorder %s4495_s29, 1  ;;  %p577_p8 = scmp.lt.s32.totalorder %s4495_s29, 5 }
  0x34   : > { %p578_p9 = pnand %p3542_p7, %p577_p8 }
  0x35   : > { %s584_s8 = sand.u32 (!%p578_p9), 1, %s4471_s23   ;;  %s3544_s9 = sshll.u32 (!%p578_p9), %s4479_s25, 5 }
  0x36   : > { %581 = sbr.rel (%p578_p9) target bundleno = 1282 (0x502), region = 94  ;;  %s3543_s30 = sshll.u32 (!%p578_p9), %s584_s8, 8 }
  0x37   : > { %p653_p10 = scmp.lt.s32.totalorder (!%p578_p9), %s3544_s9, 63  ;;  %s3546_s15 = sshll.u32 (!%p578_p9), %s4483_s26, 5 }
  0x38   : > { %p659_p11 = scmp.lt.s32.totalorder (!%p578_p9), %s3546_s15, 63  ;;  %s6133_s1 = sld [smem:[#allocation21_spill]] (!%p578_p9) }
  0x39   : > { %s4730_s14 = scalar_lea.vmem (!%p578_p9), [#allocation4], %s3543_s30  ;;  %p3556_p12 = scmp.ne.s32.totalorder (!%p578_p9), %s4479_s25, 0 }
  0x3d   : > { %s6174_s9 = smov (!%p653_p10, %s3544_s9), 63  ;;  %s6176_s15 = smov (!%p659_p11, %s3546_s15), 63 }
  0x3e   : > { %s3545_s16 = sshll.u32 %s6174_s9, 2  ;;  %s3547_s21 = sshll.u32 %s6176_s15, 2  ;;  %vm693_vm0 = vcmask (!%p3556_p12), 130048   ;;  %v4497_v33 = vmov (!%p3556_p12), 0.0  }
  0x3f   : > { %s4703_s20 = scalar_lea.vmem %s6133_s1, %s3545_s16  ;;  %s3549_s22 = sshll.u32 %s6176_s15, 3  ;;  %694 = vst.msk [vmem:[#allocation2] sm:$0xff] (!%p3556_p12), %vm693_vm0, %v4497_v33  ;;  %695 = vst.msk [vmem:[#allocation2 + $0x8] sm:$0xff] (!%p3556_p12), %vm693_vm0, %v4497_v33 }
  0x40   : > { %s4708_s0 = scalar_lea.vmem %s6094_s2, %s3547_s21  ;;  %s4713_s28 = scalar_lea.vmem %s6095_s3, %s3549_s22  ;;  %696 = vst.msk [vmem:[#allocation2 + $0x10] sm:$0xff] (!%p3556_p12), %vm693_vm0, %v4497_v33  ;;  %697 = vst.msk [vmem:[#allocation2 + $0x18] sm:$0xff] (!%p3556_p12), %vm693_vm0, %v4497_v33 }
  0x41   : > { %s4718_s17 = scalar_lea.vmem %s6102_s10, %s3549_s22  ;;  %s4723_s19 = scalar_lea.vmem %s6103_s11, %s3549_s22  ;;  %698 = vst.msk [vmem:[#allocation2 + $0x20] sm:$0xff] (!%p3556_p12), %vm693_vm0, %v4497_v33  ;;  %699 = vst.msk [vmem:[#allocation2 + $0x28] sm:$0xff] (!%p3556_p12), %vm693_vm0, %v4497_v33 }
  0x42   : > { %s4728_s13 = scalar_lea.vmem %s6104_s12, %s3547_s21  ;;  %692 = sbr.rel (%p3556_p12) target bundleno = 79 (0x4f), region = 102  ;;  %700 = vst.msk [vmem:[#allocation2 + $0x30] sm:$0xff] (!%p3556_p12), %vm693_vm0, %v4497_v33  ;;  %701 = vst.msk [vmem:[#allocation2 + $0x38] sm:$0xff] (!%p3556_p12), %vm693_vm0, %v4497_v33 }
  0x43   : > { %702 = vst.msk [vmem:[#allocation2 + $0x40] sm:$0xff] (!%p3556_p12), %vm693_vm0, %v4497_v33  ;;  %703 = vst.msk [vmem:[#allocation2 + $0x48] sm:$0xff] (!%p3556_p12), %vm693_vm0, %v4497_v33 }
  0x44   : > { %704 = vst.msk [vmem:[#allocation2 + $0x50] sm:$0xff] (!%p3556_p12), %vm693_vm0, %v4497_v33  ;;  %705 = vst.msk [vmem:[#allocation2 + $0x58] sm:$0xff] (!%p3556_p12), %vm693_vm0, %v4497_v33 }
  0x45   : > { %706 = vst.msk [vmem:[#allocation2 + $0x60] sm:$0xff] (!%p3556_p12), %vm693_vm0, %v4497_v33  ;;  %707 = vst.msk [vmem:[#allocation2 + $0x68] sm:$0xff] (!%p3556_p12), %vm693_vm0, %v4497_v33 }
  0x46   : > { %708 = vst.msk [vmem:[#allocation2 + $0x70] sm:$0xff] (!%p3556_p12), %vm693_vm0, %v4497_v33  ;;  %709 = vst.msk [vmem:[#allocation2 + $0x78] sm:$0xff] (!%p3556_p12), %vm693_vm0, %v4497_v33 }
  0x47   : > { %710 = vst.msk [vmem:[#allocation2 + $0x80] sm:$0xff] (!%p3556_p12), %vm693_vm0, %v4497_v33  ;;  %711 = vst.msk [vmem:[#allocation2 + $0x88] sm:$0xff] (!%p3556_p12), %vm693_vm0, %v4497_v33 }
  0x48   : > { %712 = vst.msk [vmem:[#allocation2 + $0x90] sm:$0xff] (!%p3556_p12), %vm693_vm0, %v4497_v33  ;;  %713 = vst.msk [vmem:[#allocation2 + $0x98] sm:$0xff] (!%p3556_p12), %vm693_vm0, %v4497_v33 }
  0x49   : > { %714 = vst.msk [vmem:[#allocation2 + $0xa0] sm:$0xff] %vm693_vm0, %v4497_v33  ;;  %715 = vst.msk [vmem:[#allocation2 + $0xa8] sm:$0xff] %vm693_vm0, %v4497_v33 }
  0x4a   : > { %716 = vst.msk [vmem:[#allocation2 + $0xb0] sm:$0xff] %vm693_vm0, %v4497_v33  ;;  %717 = vst.msk [vmem:[#allocation2 + $0xb8] sm:$0xff] %vm693_vm0, %v4497_v33 }
  0x4b   : > { %718 = vst.msk [vmem:[#allocation2 + $0xc0] sm:$0xff] %vm693_vm0, %v4497_v33  ;;  %719 = vst.msk [vmem:[#allocation2 + $0xc8] sm:$0xff] %vm693_vm0, %v4497_v33 }
  0x4c   : > { %720 = vst.msk [vmem:[#allocation2 + $0xd0] sm:$0xff] %vm693_vm0, %v4497_v33  ;;  %721 = vst.msk [vmem:[#allocation2 + $0xd8] sm:$0xff] %vm693_vm0, %v4497_v33 }
  0x4d   : > { %722 = vst.msk [vmem:[#allocation2 + $0xe0] sm:$0xff] %vm693_vm0, %v4497_v33  ;;  %723 = vst.msk [vmem:[#allocation2 + $0xe8] sm:$0xff] %vm693_vm0, %v4497_v33 }
  0x4e   : > { %724 = vst.msk [vmem:[#allocation2 + $0xf0] sm:$0xff] %vm693_vm0, %v4497_v33  ;;  %725 = vst.msk [vmem:[#allocation2 + $0xf8] sm:$0xff] %vm693_vm0, %v4497_v33 }
  0x4f PF: > { %v4115_v34 = vld [vmem:[%s4703_s20 + $0x40] sm:$0xff]   ;;  %v4117_v36 = vld [vmem:[%s4703_s20 + $0x48] sm:$0xff]   ;;  %v4119_v38 = vld [vmem:[%s4703_s20 + $0x50] sm:$0xff]   ;;  %vm1271_vm1 = vcmask 130048   ;;  %p3605_p13 = scmp.ne.s32.totalorder %s4479_s25, 1 }
  0x50   : > { %v4116_v35 = vld [vmem:[%s4703_s20] sm:$0xff]   ;;  %3824 = vmatprep.subr.bf16.mxu0 %v4115_v34  ;;  %4041 = vmatprep.subr.bf16.mxu1 %v4115_v34  ;;  %v4118_v37 = vld [vmem:[%s4703_s20 + $0x8] sm:$0xff]   ;;  %v4120_v39 = vld [vmem:[%s4703_s20 + $0x10] sm:$0xff]  }
  0x51   : > { %3825 = vmatpush3.bf16.msra.mxu0 %v4116_v35  ;;  %4049 = vmatpush3.bf16.msra.mxu1 %v4116_v35  ;;  %v4121_v40 = vld [vmem:[%s4703_s20 + $0x58] sm:$0xff]   ;;  %v4123_v42 = vld [vmem:[%s4703_s20 + $0x60] sm:$0xff]   ;;  %v4125_v44 = vld [vmem:[%s4703_s20 + $0x68] sm:$0xff]  }
  0x52   : > { %3826 = vmatprep.subr.bf16.mxu0 %v4117_v36  ;;  %4042 = vmatprep.subr.bf16.mxu1 %v4117_v36  ;;  %v4122_v41 = vld [vmem:[%s4703_s20 + $0x18] sm:$0xff]   ;;  %v4124_v43 = vld [vmem:[%s4703_s20 + $0x20] sm:$0xff]   ;;  %v4126_v47 = vld [vmem:[%s4703_s20 + $0x28] sm:$0xff]  }
  0x53   : > { %v4133_v45 = vld [vmem:[%s4730_s14 + $0x4] ss:$8 sps:$4 sm:$0xff]   ;;  %v4129_v50 = vld [vmem:[%s4703_s20 + $0x78] sm:$0xff]   ;;  %v4131_v52 = vld [vmem:[%s4730_s14] ss:$8 sps:$4 sm:$0xff]  }
  0x54   : > { %v4136_v46 = vld [vmem:[%s4730_s14 + $0x84] ss:$8 sps:$4 sm:$0xff]   ;;  %1110 = vmatprep.mubr.bf16.mxu0 %v4133_v45  ;;  %v4130_v51 = vld [vmem:[%s4703_s20 + $0x38] sm:$0xff]   ;;  %v4134_v53 = vld [vmem:[%s4730_s14 + $0x80] ss:$8 sps:$4 sm:$0xff]  }
  0x55   : > { %3827 = vmatpush3.bf16.msra.mxu0 %v4118_v37  ;;  %4050 = vmatpush3.bf16.msra.mxu1 %v4118_v37  ;;  %v4127_v48 = vld [vmem:[%s4703_s20 + $0x70] sm:$0xff]   ;;  %v4147_v60 = vld [vmem:[%s4730_s14 + $0x20] ss:$8 sps:$4 sm:$0xff]  }
  0x56   : > { %3828 = vmatprep.subr.bf16.mxu0 %v4119_v38  ;;  %4043 = vmatprep.subr.bf16.mxu1 %v4119_v38  ;;  %v4128_v49 = vld [vmem:[%s4703_s20 + $0x30] sm:$0xff]   ;;  %v4148_v61 = vld [vmem:[%s4730_s14 + $0xa0] ss:$8 sps:$4 sm:$0xff]  }
  0x57   : > { %1174 = vmatprep.mubr.bf16.mxu1 %v4136_v46  ;;  %v4137_v54 = vld [vmem:[%s4730_s14 + $0x14] ss:$8 sps:$4 sm:$0xff]   ;;  %v4141_v56 = vld [vmem:[%s4730_s14 + $0x10] ss:$8 sps:$4 sm:$0xff]   ;;  %v4143_v58 = vld [vmem:[%s4730_s14 + $0x24] ss:$8 sps:$4 sm:$0xff]  }
  0x58   : > { %v4139_v55 = vld [vmem:[%s4730_s14 + $0x94] ss:$8 sps:$4 sm:$0xff]   ;;  %v4142_v57 = vld [vmem:[%s4730_s14 + $0x90] ss:$8 sps:$4 sm:$0xff]   ;;  %v4145_v59 = vld [vmem:[%s4730_s14 + $0xa4] ss:$8 sps:$4 sm:$0xff]  }
  0x59   : > { %3829 = vmatpush3.bf16.msra.mxu0 %v4120_v39  ;;  %4051 = vmatpush3.bf16.msra.mxu1 %v4120_v39  ;;  %v4149_v62 = vld [vmem:[%s4730_s14 + $0x34] ss:$8 sps:$4 sm:$0xff]   ;;  %v4153_v0 = vld [vmem:[%s4730_s14 + $0x30] ss:$8 sps:$4 sm:$0xff]   ;;  %v4155_v2 = vld [vmem:[%s4730_s14 + $0x44] ss:$8 sps:$4 sm:$0xff]  }
  0x5a   : > { %3830 = vmatprep.subr.bf16.mxu0 %v4121_v40  ;;  %4044 = vmatprep.subr.bf16.mxu1 %v4121_v40  ;;  %v4151_v63 = vld [vmem:[%s4730_s14 + $0xb4] ss:$8 sps:$4 sm:$0xff]   ;;  %v4154_v1 = vld [vmem:[%s4730_s14 + $0xb0] ss:$8 sps:$4 sm:$0xff]   ;;  %v4157_v3 = vld [vmem:[%s4730_s14 + $0xc4] ss:$8 sps:$4 sm:$0xff]  }
  0x5b   : > { %v4159_v4 = vld [vmem:[%s4730_s14 + $0x40] ss:$8 sps:$4 sm:$0xff]   ;;  %v4161_v6 = vld [vmem:[%s4730_s14 + $0x54] ss:$8 sps:$4 sm:$0xff]   ;;  %v4165_v8 = vld [vmem:[%s4730_s14 + $0x50] ss:$8 sps:$4 sm:$0xff]  }
  0x5c   : > { %v4160_v5 = vld [vmem:[%s4730_s14 + $0xc0] ss:$8 sps:$4 sm:$0xff]   ;;  %v4163_v7 = vld [vmem:[%s4730_s14 + $0xd4] ss:$8 sps:$4 sm:$0xff]   ;;  %v4166_v9 = vld [vmem:[%s4730_s14 + $0xd0] ss:$8 sps:$4 sm:$0xff]  }
  0x5d   : > { %3831 = vmatpush3.bf16.msra.mxu0 %v4122_v41  ;;  %4052 = vmatpush3.bf16.msra.mxu1 %v4122_v41  ;;  %v4167_v10 = vld [vmem:[%s4730_s14 + $0x64] ss:$8 sps:$4 sm:$0xff]   ;;  %v4171_v12 = vld [vmem:[%s4730_s14 + $0x60] ss:$8 sps:$4 sm:$0xff]   ;;  %v4173_v14 = vld [vmem:[%s4730_s14 + $0x74] ss:$8 sps:$4 sm:$0xff]  }
  0x5e   : > { %3832 = vmatprep.subr.bf16.mxu0 %v4123_v42  ;;  %4045 = vmatprep.subr.bf16.mxu1 %v4123_v42  ;;  %v4169_v11 = vld [vmem:[%s4730_s14 + $0xe4] ss:$8 sps:$4 sm:$0xff]   ;;  %v4172_v13 = vld [vmem:[%s4730_s14 + $0xe0] ss:$8 sps:$4 sm:$0xff]   ;;  %v4175_v15 = vld [vmem:[%s4730_s14 + $0xf4] ss:$8 sps:$4 sm:$0xff]  }
  0x5f   : > { %v4177_v16 = vld [vmem:[%s4730_s14 + $0x70] ss:$8 sps:$4 sm:$0xff]   ;;  %v726_v20 = vld [vmem:[#allocation2] sm:$0xff]  ;;  %v727_v28 = vld [vmem:[#allocation2 + $0x8] sm:$0xff] }
  0x60   : > { %v4178_v17 = vld [vmem:[%s4730_s14 + $0xf0] ss:$8 sps:$4 sm:$0xff]   ;;  %v742_v22 = vld [vmem:[#allocation2 + $0x80] sm:$0xff]  ;;  %v743_v30 = vld [vmem:[#allocation2 + $0x88] sm:$0xff] }
  0x61   : > { %3833 = vmatpush3.bf16.msra.mxu0 %v4124_v43  ;;  %4053 = vmatpush3.bf16.msra.mxu1 %v4124_v43  ;;  %v728_v40 = vld [vmem:[#allocation2 + $0x10] sm:$0xff] }
  0x62   : > { %3834 = vmatprep.subr.bf16.mxu0 %v4125_v44  ;;  %4046 = vmatprep.subr.bf16.mxu1 %v4125_v44  ;;  %v744_v42 = vld [vmem:[#allocation2 + $0x90] sm:$0xff] }
  0x65   : > { %3835 = vmatpush3.bf16.msra.mxu0 %v4126_v47  ;;  %4054 = vmatpush3.bf16.msra.mxu1 %v4126_v47 }
  0x66   : > { %3836 = vmatprep.subr.bf16.mxu0 %v4127_v48  ;;  %4047 = vmatprep.subr.bf16.mxu1 %v4127_v48  ;;  %v729_v48 = vld [vmem:[#allocation2 + $0x18] sm:$0xff] }
  0x69   : > { %3837 = vmatpush3.bf16.msra.mxu0 %v4128_v49  ;;  %4055 = vmatpush3.bf16.msra.mxu1 %v4128_v49 }
  0x6a   : > { %3838 = vmatprep.subr.bf16.mxu0 %v4129_v50  ;;  %4048 = vmatprep.subr.bf16.mxu1 %v4129_v50  ;;  %v745_v50 = vld [vmem:[#allocation2 + $0x98] sm:$0xff] }
  0x6d   : > { %3839 = vmatpush3.bf16.msra.mxu0 %v4130_v51  ;;  %4056 = vmatpush3.bf16.msra.mxu1 %v4130_v51 }
  0x70   : > { %1111 = vmatmul.mubr.bf16.vlgmr.msra.gmra.mrb[0].mxu0 %v4131_v52  ;;  %1175 = vmatmul.mubr.bf16.vlgmr.msra.gmra.mrb[0].mxu1 %v4134_v53 }
  0x71   : > { %1118 = vmatprep.mubr.bf16.mxu0 %v4137_v54  ;;  %1182 = vmatprep.mubr.bf16.mxu1 %v4139_v55 }
  0x78   : > { %1119 = vmatmul.mubr.bf16.gmra.mrb[4].mxu0 %v4141_v56  ;;  %1183 = vmatmul.mubr.bf16.gmra.mrb[4].mxu1 %v4142_v57 }
  0x79   : > { %1126 = vmatprep.mubr.bf16.mxu0 %v4143_v58  ;;  %1190 = vmatprep.mubr.bf16.mxu1 %v4145_v59 }
  0x80   : > { %1127 = vmatmul.mubr.bf16.gmra.mrb[8].mxu0 %v4147_v60  ;;  %1191 = vmatmul.mubr.bf16.gmra.mrb[8].mxu1 %v4148_v61  ;;  %v730_v60 = vld [vmem:[#allocation2 + $0x20] sm:$0xff] }
  0x81   : > { %1134 = vmatprep.mubr.bf16.mxu0 %v4149_v62  ;;  %1198 = vmatprep.mubr.bf16.mxu1 %v4151_v63  ;;  %v746_v62 = vld [vmem:[#allocation2 + $0xa0] sm:$0xff] }
  0x88   : > { %1135 = vmatmul.mubr.bf16.gmra.mrb[12].mxu0 %v4153_v0  ;;  %1199 = vmatmul.mubr.bf16.gmra.mrb[12].mxu1 %v4154_v1 }
  0x89   : > { %1142 = vmatprep.mubr.bf16.mxu0 %v4155_v2  ;;  %1206 = vmatprep.mubr.bf16.mxu1 %v4157_v3 }
  0x90   : > { %1143 = vmatmul.mubr.bf16.gmra.mrb[16].mxu0 %v4159_v4  ;;  %1207 = vmatmul.mubr.bf16.gmra.mrb[16].mxu1 %v4160_v5  ;;  %v731_v4 = vld [vmem:[#allocation2 + $0x28] sm:$0xff] }
  0x91   : > { %1150 = vmatprep.mubr.bf16.mxu0 %v4161_v6  ;;  %1214 = vmatprep.mubr.bf16.mxu1 %v4163_v7  ;;  %v747_v6 = vld [vmem:[#allocation2 + $0xa8] sm:$0xff] }
  0x98   : > { %1151 = vmatmul.mubr.bf16.gmra.mrb[20].mxu0 %v4165_v8  ;;  %1215 = vmatmul.mubr.bf16.gmra.mrb[20].mxu1 %v4166_v9 }
  0x99   : > { %1158 = vmatprep.mubr.bf16.mxu0 %v4167_v10  ;;  %1222 = vmatprep.mubr.bf16.mxu1 %v4169_v11 }
  0xa0   : > { %1159 = vmatmul.mubr.bf16.gmra.mrb[24].mxu0 %v4171_v12  ;;  %1223 = vmatmul.mubr.bf16.gmra.mrb[24].mxu1 %v4172_v13 }
  0xa1   : > { %1166 = vmatprep.mubr.bf16.mxu0 %v4173_v14  ;;  %1230 = vmatprep.mubr.bf16.mxu1 %v4175_v15 }
  0xa8   : > { %1167 = vmatmul.mubr.bf16.gmra.mrb[28].mxu0 %v4177_v16  ;;  %1231 = vmatmul.mubr.bf16.gmra.mrb[28].mxu1 %v4178_v17  ;;  %v732_v16 = vld [vmem:[#allocation2 + $0x30] sm:$0xff] }
 0x143   : > { %v3840_v18 = vpop.f32.mrb[0].mxu0  ;;  %v3888_v19 = vpop.f32.mrb[0].mxu1 }
 0x144   : > { %v3841_v21 = vpop.f32.mrb[1].mxu0  ;;  %v3889_v23 = vpop.f32.mrb[1].mxu1 }
 0x145   : > { %v3842_v24 = vadd.f32 %v3841_v21, %v3840_v18  ;;  %v3890_v25 = vadd.f32 %v3889_v23, %v3888_v19  ;;  %v3843_v26 = vpop.f32.mrb[2].mxu0  ;;  %v3891_v27 = vpop.f32.mrb[2].mxu1  ;;  %v748_v18 = vld [vmem:[#allocation2 + $0xb0] sm:$0xff] }
 0x146   : > { %v3844_v29 = vpop.f32.mrb[3].mxu0  ;;  %v3892_v31 = vpop.f32.mrb[3].mxu1 }
 0x147   : > { %v1239_v32 = vadd.f32 %v3842_v24, %v726_v20  ;;  %v1255_v33 = vadd.f32 %v3890_v25, %v742_v22  ;;  %v3845_v34 = vadd.f32 %v3844_v29, %v3843_v26  ;;  %v3893_v35 = vadd.f32 %v3892_v31, %v3891_v27  ;;  %v733_v24 = vld [vmem:[#allocation2 + $0x38] sm:$0xff] }
 0x148   : > { %v749_v26 = vld [vmem:[#allocation2 + $0xb8] sm:$0xff] }
 0x149   : > { %1272 = vst.msk [vmem:[#allocation2] sm:$0xff] %vm1271_vm1, %v1239_v32  ;;  %1288 = vst.msk [vmem:[#allocation2 + $0x80] sm:$0xff] %vm1271_vm1, %v1255_v33  ;;  %v1240_v36 = vadd.f32 %v3845_v34, %v727_v28  ;;  %v1256_v37 = vadd.f32 %v3893_v35, %v743_v30 }
 0x14b   : > { %1273 = vst.msk [vmem:[#allocation2 + $0x8] sm:$0xff] %vm1271_vm1, %v1240_v36  ;;  %1289 = vst.msk [vmem:[#allocation2 + $0x88] sm:$0xff] %vm1271_vm1, %v1256_v37  ;;  %v3846_v38 = vpop.f32.mrb[4].mxu0  ;;  %v3894_v39 = vpop.f32.mrb[4].mxu1  ;;  %v734_v36 = vld [vmem:[#allocation2 + $0x40] sm:$0xff] }
 0x14c   : > { %v3847_v41 = vpop.f32.mrb[5].mxu0  ;;  %v3895_v43 = vpop.f32.mrb[5].mxu1 }
 0x14d   : > { %v3848_v44 = vadd.f32 %v3847_v41, %v3846_v38  ;;  %v3896_v45 = vadd.f32 %v3895_v43, %v3894_v39  ;;  %v3849_v46 = vpop.f32.mrb[6].mxu0  ;;  %v3897_v47 = vpop.f32.mrb[6].mxu1  ;;  %v750_v38 = vld [vmem:[#allocation2 + $0xc0] sm:$0xff] }
 0x14e   : > { %v3850_v49 = vpop.f32.mrb[7].mxu0  ;;  %v3898_v51 = vpop.f32.mrb[7].mxu1 }
 0x14f   : > { %v1241_v52 = vadd.f32 %v3848_v44, %v728_v40  ;;  %v1257_v53 = vadd.f32 %v3896_v45, %v744_v42  ;;  %v3851_v54 = vadd.f32 %v3850_v49, %v3849_v46  ;;  %v3899_v55 = vadd.f32 %v3898_v51, %v3897_v47  ;;  %v735_v44 = vld [vmem:[#allocation2 + $0x48] sm:$0xff] }
 0x150   : > { %v751_v46 = vld [vmem:[#allocation2 + $0xc8] sm:$0xff] }
 0x151   : > { %1274 = vst.msk [vmem:[#allocation2 + $0x10] sm:$0xff] %vm1271_vm1, %v1241_v52  ;;  %1290 = vst.msk [vmem:[#allocation2 + $0x90] sm:$0xff] %vm1271_vm1, %v1257_v53  ;;  %v1242_v56 = vadd.f32 %v3851_v54, %v729_v48  ;;  %v1258_v57 = vadd.f32 %v3899_v55, %v745_v50 }
 0x153   : > { %1275 = vst.msk [vmem:[#allocation2 + $0x18] sm:$0xff] %vm1271_vm1, %v1242_v56  ;;  %1291 = vst.msk [vmem:[#allocation2 + $0x98] sm:$0xff] %vm1271_vm1, %v1258_v57  ;;  %v3852_v58 = vpop.f32.mrb[8].mxu0  ;;  %v3900_v59 = vpop.f32.mrb[8].mxu1  ;;  %v736_v56 = vld [vmem:[#allocation2 + $0x50] sm:$0xff] }
 0x154   : > { %v3853_v61 = vpop.f32.mrb[9].mxu0  ;;  %v3901_v63 = vpop.f32.mrb[9].mxu1 }
 0x155   : > { %v3854_v0 = vadd.f32 %v3853_v61, %v3852_v58  ;;  %v3902_v1 = vadd.f32 %v3901_v63, %v3900_v59  ;;  %v3855_v2 = vpop.f32.mrb[10].mxu0  ;;  %v3903_v3 = vpop.f32.mrb[10].mxu1  ;;  %v752_v58 = vld [vmem:[#allocation2 + $0xd0] sm:$0xff] }
 0x156   : > { %v3856_v5 = vpop.f32.mrb[11].mxu0  ;;  %v3904_v7 = vpop.f32.mrb[11].mxu1 }
 0x157   : > { %v1243_v8 = vadd.f32 %v3854_v0, %v730_v60  ;;  %v1259_v9 = vadd.f32 %v3902_v1, %v746_v62  ;;  %v3857_v10 = vadd.f32 %v3856_v5, %v3855_v2  ;;  %v3905_v11 = vadd.f32 %v3904_v7, %v3903_v3  ;;  %v737_v0 = vld [vmem:[#allocation2 + $0x58] sm:$0xff] }
 0x158   : > { %v753_v2 = vld [vmem:[#allocation2 + $0xd8] sm:$0xff] }
 0x159   : > { %1276 = vst.msk [vmem:[#allocation2 + $0x20] sm:$0xff] %vm1271_vm1, %v1243_v8  ;;  %1292 = vst.msk [vmem:[#allocation2 + $0xa0] sm:$0xff] %vm1271_vm1, %v1259_v9  ;;  %v1244_v12 = vadd.f32 %v3857_v10, %v731_v4  ;;  %v1260_v13 = vadd.f32 %v3905_v11, %v747_v6 }
 0x15b   : > { %1277 = vst.msk [vmem:[#allocation2 + $0x28] sm:$0xff] %vm1271_vm1, %v1244_v12  ;;  %1293 = vst.msk [vmem:[#allocation2 + $0xa8] sm:$0xff] %vm1271_vm1, %v1260_v13  ;;  %v3858_v14 = vpop.f32.mrb[12].mxu0  ;;  %v3906_v15 = vpop.f32.mrb[12].mxu1  ;;  %v738_v12 = vld [vmem:[#allocation2 + $0x60] sm:$0xff] }
 0x15c   : > { %v3859_v17 = vpop.f32.mrb[13].mxu0  ;;  %v3907_v19 = vpop.f32.mrb[13].mxu1 }
 0x15d   : > { %v3860_v20 = vadd.f32 %v3859_v17, %v3858_v14  ;;  %v3908_v21 = vadd.f32 %v3907_v19, %v3906_v15  ;;  %v3861_v22 = vpop.f32.mrb[14].mxu0  ;;  %v3909_v23 = vpop.f32.mrb[14].mxu1  ;;  %v754_v14 = vld [vmem:[#allocation2 + $0xe0] sm:$0xff] }
 0x15e   : > { %v3862_v25 = vpop.f32.mrb[15].mxu0  ;;  %v3910_v27 = vpop.f32.mrb[15].mxu1 }
 0x15f   : > { %v1245_v28 = vadd.f32 %v3860_v20, %v732_v16  ;;  %v1261_v29 = vadd.f32 %v3908_v21, %v748_v18  ;;  %v3863_v30 = vadd.f32 %v3862_v25, %v3861_v22  ;;  %v3911_v31 = vadd.f32 %v3910_v27, %v3909_v23  ;;  %v739_v20 = vld [vmem:[#allocation2 + $0x68] sm:$0xff] }
 0x160   : > { %v755_v22 = vld [vmem:[#allocation2 + $0xe8] sm:$0xff] }
 0x161   : > { %1278 = vst.msk [vmem:[#allocation2 + $0x30] sm:$0xff] %vm1271_vm1, %v1245_v28  ;;  %1294 = vst.msk [vmem:[#allocation2 + $0xb0] sm:$0xff] %vm1271_vm1, %v1261_v29  ;;  %v1246_v32 = vadd.f32 %v3863_v30, %v733_v24  ;;  %v1262_v33 = vadd.f32 %v3911_v31, %v749_v26 }
 0x163   : > { %1279 = vst.msk [vmem:[#allocation2 + $0x38] sm:$0xff] %vm1271_vm1, %v1246_v32  ;;  %1295 = vst.msk [vmem:[#allocation2 + $0xb8] sm:$0xff] %vm1271_vm1, %v1262_v33  ;;  %v3864_v34 = vpop.f32.mrb[16].mxu0  ;;  %v3912_v35 = vpop.f32.mrb[16].mxu1  ;;  %v740_v32 = vld [vmem:[#allocation2 + $0x70] sm:$0xff] }
 0x164   : > { %v3865_v37 = vpop.f32.mrb[17].mxu0  ;;  %v3913_v39 = vpop.f32.mrb[17].mxu1 }
 0x165   : > { %v3866_v40 = vadd.f32 %v3865_v37, %v3864_v34  ;;  %v3914_v41 = vadd.f32 %v3913_v39, %v3912_v35  ;;  %v3867_v42 = vpop.f32.mrb[18].mxu0  ;;  %v3915_v43 = vpop.f32.mrb[18].mxu1  ;;  %v756_v34 = vld [vmem:[#allocation2 + $0xf0] sm:$0xff] }
 0x166   : > { %v3868_v45 = vpop.f32.mrb[19].mxu0  ;;  %v3916_v47 = vpop.f32.mrb[19].mxu1 }
 0x167   : > { %v1247_v48 = vadd.f32 %v3866_v40, %v734_v36  ;;  %v1263_v49 = vadd.f32 %v3914_v41, %v750_v38  ;;  %v3869_v50 = vadd.f32 %v3868_v45, %v3867_v42  ;;  %v3917_v51 = vadd.f32 %v3916_v47, %v3915_v43  ;;  %v741_v40 = vld [vmem:[#allocation2 + $0x78] sm:$0xff] }
 0x168   : > { %v757_v42 = vld [vmem:[#allocation2 + $0xf8] sm:$0xff] }
 0x169   : > { %1280 = vst.msk [vmem:[#allocation2 + $0x40] sm:$0xff] %vm1271_vm1, %v1247_v48  ;;  %1296 = vst.msk [vmem:[#allocation2 + $0xc0] sm:$0xff] %vm1271_vm1, %v1263_v49  ;;  %v1248_v52 = vadd.f32 %v3869_v50, %v735_v44  ;;  %v1264_v53 = vadd.f32 %v3917_v51, %v751_v46 }
 0x16b   : > { %1281 = vst.msk [vmem:[#allocation2 + $0x48] sm:$0xff] %vm1271_vm1, %v1248_v52  ;;  %1297 = vst.msk [vmem:[#allocation2 + $0xc8] sm:$0xff] %vm1271_vm1, %v1264_v53  ;;  %v3870_v54 = vpop.f32.mrb[20].mxu0  ;;  %v3918_v55 = vpop.f32.mrb[20].mxu1 }
 0x16c   : > { %v3871_v57 = vpop.f32.mrb[21].mxu0  ;;  %v3919_v59 = vpop.f32.mrb[21].mxu1 }
 0x16d   : > { %v3872_v60 = vadd.f32 %v3871_v57, %v3870_v54  ;;  %v3920_v61 = vadd.f32 %v3919_v59, %v3918_v55  ;;  %v3873_v62 = vpop.f32.mrb[22].mxu0  ;;  %v3921_v63 = vpop.f32.mrb[22].mxu1 }
 0x16e   : > { %v3874_v1 = vpop.f32.mrb[23].mxu0  ;;  %v3922_v3 = vpop.f32.mrb[23].mxu1 }
 0x16f   : > { %v1249_v4 = vadd.f32 %v3872_v60, %v736_v56  ;;  %v1265_v5 = vadd.f32 %v3920_v61, %v752_v58  ;;  %v3875_v6 = vadd.f32 %v3874_v1, %v3873_v62  ;;  %v3923_v7 = vadd.f32 %v3922_v3, %v3921_v63 }
 0x171   : > { %1282 = vst.msk [vmem:[#allocation2 + $0x50] sm:$0xff] %vm1271_vm1, %v1249_v4  ;;  %1298 = vst.msk [vmem:[#allocation2 + $0xd0] sm:$0xff] %vm1271_vm1, %v1265_v5  ;;  %v1250_v8 = vadd.f32 %v3875_v6, %v737_v0  ;;  %v1266_v9 = vadd.f32 %v3923_v7, %v753_v2 }
 0x173   : > { %1283 = vst.msk [vmem:[#allocation2 + $0x58] sm:$0xff] %vm1271_vm1, %v1250_v8  ;;  %1299 = vst.msk [vmem:[#allocation2 + $0xd8] sm:$0xff] %vm1271_vm1, %v1266_v9  ;;  %v3876_v10 = vpop.f32.mrb[24].mxu0  ;;  %v3924_v11 = vpop.f32.mrb[24].mxu1 }
 0x174   : > { %v3877_v13 = vpop.f32.mrb[25].mxu0  ;;  %v3925_v15 = vpop.f32.mrb[25].mxu1 }
 0x175   : > { %v3878_v16 = vadd.f32 %v3877_v13, %v3876_v10  ;;  %v3926_v17 = vadd.f32 %v3925_v15, %v3924_v11  ;;  %v3879_v18 = vpop.f32.mrb[26].mxu0  ;;  %v3927_v19 = vpop.f32.mrb[26].mxu1 }
 0x176   : > { %v3880_v21 = vpop.f32.mrb[27].mxu0  ;;  %v3928_v23 = vpop.f32.mrb[27].mxu1 }
 0x177   : > { %v1251_v24 = vadd.f32 %v3878_v16, %v738_v12  ;;  %v1267_v25 = vadd.f32 %v3926_v17, %v754_v14  ;;  %v3881_v26 = vadd.f32 %v3880_v21, %v3879_v18  ;;  %v3929_v27 = vadd.f32 %v3928_v23, %v3927_v19 }
 0x179   : > { %1284 = vst.msk [vmem:[#allocation2 + $0x60] sm:$0xff] %vm1271_vm1, %v1251_v24  ;;  %1300 = vst.msk [vmem:[#allocation2 + $0xe0] sm:$0xff] %vm1271_vm1, %v1267_v25  ;;  %v1252_v28 = vadd.f32 %v3881_v26, %v739_v20  ;;  %v1268_v29 = vadd.f32 %v3929_v27, %v755_v22 }
 0x17b   : > { %1285 = vst.msk [vmem:[#allocation2 + $0x68] sm:$0xff] %vm1271_vm1, %v1252_v28  ;;  %1301 = vst.msk [vmem:[#allocation2 + $0xe8] sm:$0xff] %vm1271_vm1, %v1268_v29  ;;  %v3882_v30 = vpop.f32.mrb[28].mxu0  ;;  %v3930_v31 = vpop.f32.mrb[28].mxu1 }
 0x17c   : > { %v3883_v33 = vpop.f32.mrb[29].mxu0  ;;  %v3931_v35 = vpop.f32.mrb[29].mxu1 }
 0x17d   : > { %v3884_v36 = vadd.f32 %v3883_v33, %v3882_v30  ;;  %v3932_v37 = vadd.f32 %v3931_v35, %v3930_v31  ;;  %v3885_v38 = vpop.f32.mrb[30].mxu0  ;;  %v3933_v39 = vpop.f32.mrb[30].mxu1  ;;  %1307 = sbr.rel (%p3605_p13) target bundleno = 1282 (0x502), region = 106 }
 0x17e   : > { %v3886_v41 = vpop.f32.mrb[31].mxu0  ;;  %v3934_v43 = vpop.f32.mrb[31].mxu1 }
 0x17f   : > { %v1253_v44 = vadd.f32 %v3884_v36, %v740_v32  ;;  %v1269_v45 = vadd.f32 %v3932_v37, %v756_v34  ;;  %v3887_v46 = vadd.f32 %v3886_v41, %v3885_v38  ;;  %v3935_v47 = vadd.f32 %v3934_v43, %v3933_v39 }
 0x181   : > { %1286 = vst.msk [vmem:[#allocation2 + $0x70] sm:$0xff] %vm1271_vm1, %v1253_v44  ;;  %1302 = vst.msk [vmem:[#allocation2 + $0xf0] sm:$0xff] %vm1271_vm1, %v1269_v45  ;;  %v1254_v48 = vadd.f32 %v3887_v46, %v741_v40  ;;  %v1270_v49 = vadd.f32 %v3935_v47, %v757_v42 }
 0x183   : > { %1287 = vst.msk [vmem:[#allocation2 + $0x78] sm:$0xff] %vm1271_vm1, %v1254_v48  ;;  %1303 = vst.msk [vmem:[#allocation2 + $0xf8] sm:$0xff] %vm1271_vm1, %v1270_v49 }
 0x184   : > { %v4181_v50 = vld [vmem:[%s6096_s4] sm:$0xff]   ;;  %v1309_v52 = vld [vmem:[#allocation2 + $0x8] sm:$0xff]  ;;  %v1310_v53 = vld [vmem:[#allocation2 + $0x10] sm:$0xff]  ;;  %vm1651_vm2 = vcmask 261120   ;;  %s6134_s15 = sld [smem:[#allocation22_spill]]  ;;  %s3677_s14 = sshll.u32 %s4483_s26, 8 }
 0x185   : > { %v1308_v51 = vld [vmem:[#allocation2] sm:$0xff]  ;;  %3971 = vmatprep.subr.bf16.mxu0 %v4181_v50  ;;  %v1311_v55 = vld [vmem:[#allocation2 + $0x18] sm:$0xff]  ;;  %v1313_v57 = vld [vmem:[#allocation2 + $0x28] sm:$0xff]  ;;  %vm2454_vm4 = vcmask 7168  }
 0x186   : > { %v1340_v54 = vpack.c.bf16 %v1309_v52, %v1308_v51  ;;  %v1312_v56 = vld [vmem:[#allocation2 + $0x20] sm:$0xff]  ;;  %3972 = vmatpush3.bf16.msra.mxu0 %v4181_v50  ;;  %v1341_v58 = vpack.c.bf16 %v1311_v55, %v1310_v53  ;;  %v1314_v60 = vld [vmem:[#allocation2 + $0x30] sm:$0xff]  ;;  %v1315_v61 = vld [vmem:[#allocation2 + $0x38] sm:$0xff] }
 0x187   : > { %v1342_v59 = vpack.c.bf16 %v1313_v57, %v1312_v56  ;;  %v1316_v62 = vld [vmem:[#allocation2 + $0x40] sm:$0xff]  ;;  %v1317_v63 = vld [vmem:[#allocation2 + $0x48] sm:$0xff]  ;;  %v1343_v0 = vpack.c.bf16 %v1315_v61, %v1314_v60  ;;  %v1318_v2 = vld [vmem:[#allocation2 + $0x50] sm:$0xff] }
 0x188   : > { %3973 = vmatprep.mubr.msk.bf16.mxu0 %vm1271_vm1, %v1340_v54  ;;  %v1344_v1 = vpack.c.bf16 %v1317_v63, %v1316_v62  ;;  %v1319_v3 = vld [vmem:[#allocation2 + $0x58] sm:$0xff]  ;;  %v1320_v4 = vld [vmem:[#allocation2 + $0x60] sm:$0xff]  ;;  %v1321_v5 = vld [vmem:[#allocation2 + $0x68] sm:$0xff] }
 0x189   : > { %3974 = vmatmul.mubr.msk.bf16.vlgmr.msra.gmra.mrb[0].mxu0 %vm1271_vm1, %v1341_v58  ;;  %v1345_v6 = vpack.c.bf16 %v1319_v3, %v1318_v2  ;;  %v1346_v7 = vpack.c.bf16 %v1321_v5, %v1320_v4  ;;  %v1322_v8 = vld [vmem:[#allocation2 + $0x70] sm:$0xff]  ;;  %v1324_v10 = vld [vmem:[#allocation2 + $0x80] sm:$0xff]  ;;  %v1325_v11 = vld [vmem:[#allocation2 + $0x88] sm:$0xff] }
 0x18a   : > { %3977 = vmatprep.mubr.msk.bf16.mxu0 %vm1271_vm1, %v1342_v59  ;;  %v1323_v9 = vld [vmem:[#allocation2 + $0x78] sm:$0xff]  ;;  %v1348_v13 = vpack.c.bf16 %v1325_v11, %v1324_v10  ;;  %v1326_v14 = vld [vmem:[#allocation2 + $0x90] sm:$0xff]  ;;  %v1328_v16 = vld [vmem:[#allocation2 + $0xa0] sm:$0xff] }
 0x18b   : > { %v1347_v12 = vpack.c.bf16 %v1323_v9, %v1322_v8  ;;  %v1327_v15 = vld [vmem:[#allocation2 + $0x98] sm:$0xff]  ;;  %v1329_v17 = vld [vmem:[#allocation2 + $0xa8] sm:$0xff]  ;;  %v1330_v20 = vld [vmem:[#allocation2 + $0xb0] sm:$0xff] }
 0x18c   : > { %v1349_v18 = vpack.c.bf16 %v1327_v15, %v1326_v14  ;;  %v1350_v19 = vpack.c.bf16 %v1329_v17, %v1328_v16  ;;  %v1331_v21 = vld [vmem:[#allocation2 + $0xb8] sm:$0xff]  ;;  %v1332_v22 = vld [vmem:[#allocation2 + $0xc0] sm:$0xff]  ;;  %v1333_v23 = vld [vmem:[#allocation2 + $0xc8] sm:$0xff] }
 0x18d   : > { %v1351_v24 = vpack.c.bf16 %v1331_v21, %v1330_v20  ;;  %v1352_v25 = vpack.c.bf16 %v1333_v23, %v1332_v22  ;;  %v1334_v26 = vld [vmem:[#allocation2 + $0xd0] sm:$0xff]  ;;  %v1335_v27 = vld [vmem:[#allocation2 + $0xd8] sm:$0xff]  ;;  %v1336_v28 = vld [vmem:[#allocation2 + $0xe0] sm:$0xff] }
 0x18e   : > { %v1337_v29 = vld [vmem:[#allocation2 + $0xe8] sm:$0xff]  ;;  %v1353_v30 = vpack.c.bf16 %v1335_v27, %v1334_v26  ;;  %v1338_v32 = vld [vmem:[#allocation2 + $0xf0] sm:$0xff]  ;;  %v1339_v33 = vld [vmem:[#allocation2 + $0xf8] sm:$0xff] }
 0x18f   : > { %v1354_v31 = vpack.c.bf16 %v1337_v29, %v1336_v28  ;;  %v1355_v34 = vpack.c.bf16 %v1339_v33, %v1338_v32  ;;  %v4182_v35 = vld [vmem:[%s6098_s6] sm:$0xff]   ;;  %v4183_v36 = vld [vmem:[%s6098_s6 + $0x8] sm:$0xff]  }
 0x190   : > { %4005 = vmatprep.subr.bf16.mxu1 %v4182_v35  ;;  %v4874_v37 = vld [vmem:[%s6097_s5] ss:$0 sm:$0xff] }
 0x191   : > { %3978 = vmatmul.mubr.msk.bf16.gmra.mrb[4].mxu0 %vm1271_vm1, %v1343_v0  ;;  %4006 = vmatpush3.bf16.msra.mxu1 %v4182_v35 }
 0x192   : > { %3981 = vmatprep.mubr.msk.bf16.mxu0 %vm1271_vm1, %v1344_v1  ;;  %4007 = vmatprep.subr.bf16.mxu1 %v4183_v36 }
 0x195   : > { %4008 = vmatpush3.bf16.msra.mxu1 %v4183_v36 }
 0x199   : > { %3982 = vmatmul.mubr.msk.bf16.gmra.mrb[8].mxu0 %vm1271_vm1, %v1345_v6 }
 0x19a   : > { %3985 = vmatprep.mubr.msk.bf16.mxu0 %vm1271_vm1, %v1346_v7 }
 0x1a1   : > { %3986 = vmatmul.mubr.msk.bf16.gmra.mrb[12].mxu0 %vm1271_vm1, %v1347_v12 }
 0x1a2   : > { %3989 = vmatprep.mubr.msk.bf16.mxu0 %vm1271_vm1, %v1348_v13 }
 0x1a9   : > { %3990 = vmatmul.mubr.msk.bf16.gmra.mrb[16].mxu0 %vm1271_vm1, %v1349_v18 }
 0x1aa   : > { %3993 = vmatprep.mubr.msk.bf16.mxu0 %vm1271_vm1, %v1350_v19 }
 0x1b1   : > { %3994 = vmatmul.mubr.msk.bf16.gmra.mrb[20].mxu0 %vm1271_vm1, %v1351_v24 }
 0x1b2   : > { %3997 = vmatprep.mubr.msk.bf16.mxu0 %vm1271_vm1, %v1352_v25 }
 0x1b9   : > { %3998 = vmatmul.mubr.msk.bf16.gmra.mrb[24].mxu0 %vm1271_vm1, %v1353_v30 }
 0x1ba   : > { %4001 = vmatprep.mubr.msk.bf16.mxu0 %vm1271_vm1, %v1354_v31 }
 0x1c1   : > { %4002 = vmatmul.mubr.msk.bf16.gmra.mrb[28].mxu0 %vm1271_vm1, %v1355_v34 }
 0x25c   : > { %v3975_v38 = vpop.f32.mrb[0].mxu0 }
 0x25d   : > { %v1462_v39 = vadd.f32 %v3975_v38, %v4874_v37  ;;  %v1453_v40 = vpop.f32.mrb[1].mxu0 }
 0x25e   : > { %v1454_v41 = vadd.f32 %v4874_v37, %v1453_v40  ;;  %v3976_v42 = vpop.f32.mrb[2].mxu0 }
 0x25f   : > { %v1465_v43 = vadd.f32 %v3976_v42, %v4874_v37  ;;  %v1456_v44 = vpop.f32.mrb[3].mxu0  ;;  %v1582_v46 = vmax.f32 %v1462_v39, 0.0 }
 0x260   : > { %v1457_v45 = vadd.f32 %v4874_v37, %v1456_v44  ;;  %v1580_v48 = vmax.f32 %v1454_v41, 0.0 }
 0x261   : > { %v1583_v47 = vmax.f32 %v1465_v43, 0.0 }
 0x262   : > { %v1581_v49 = vmax.f32 %v1457_v45, 0.0 }
 0x263   : > { %v1613_v50 = vpack.c.bf16 %v1583_v47, %v1582_v46 }
 0x264   : > { %v3979_v51 = vpop.f32.mrb[4].mxu0  ;;  %v1612_v52 = vpack.c.bf16 %v1581_v49, %v1580_v48 }
 0x265   : > { %v1478_v53 = vadd.f32 %v3979_v51, %v4874_v37  ;;  %v1469_v54 = vpop.f32.mrb[5].mxu0 }
 0x266   : > { %v1470_v55 = vadd.f32 %v4874_v37, %v1469_v54  ;;  %v3980_v56 = vpop.f32.mrb[6].mxu0  ;;  %4009 = vmatprep.mubr.msk.bf16.mxu1 %vm1651_vm2, %v1612_v52 }
 0x267   : > { %v1586_v57 = vmax.f32 %v1478_v53, 0.0  ;;  %v1481_v58 = vadd.f32 %v3980_v56, %v4874_v37  ;;  %v1472_v59 = vpop.f32.mrb[7].mxu0  ;;  %4010 = vmatmul.mubr.msk.bf16.vlgmr.msra.gmra.mrb[0].mxu1 %vm1651_vm2, %v1613_v50 }
 0x268   : > { %v1584_v60 = vmax.f32 %v1470_v55, 0.0  ;;  %v1473_v61 = vadd.f32 %v4874_v37, %v1472_v59 }
 0x269   : > { %v1587_v62 = vmax.f32 %v1481_v58, 0.0 }
 0x26a   : > { %v1585_v63 = vmax.f32 %v1473_v61, 0.0 }
 0x26b   : > { %v1615_v0 = vpack.c.bf16 %v1587_v62, %v1586_v57 }
 0x26c   : > { %v1614_v1 = vpack.c.bf16 %v1585_v63, %v1584_v60  ;;  %v3983_v2 = vpop.f32.mrb[8].mxu0 }
 0x26d   : > { %v1494_v3 = vadd.f32 %v3983_v2, %v4874_v37  ;;  %v1485_v4 = vpop.f32.mrb[9].mxu0 }
 0x26e   : > { %v1486_v5 = vadd.f32 %v4874_v37, %v1485_v4  ;;  %v3984_v6 = vpop.f32.mrb[10].mxu0  ;;  %4013 = vmatprep.mubr.msk.bf16.mxu1 %vm1651_vm2, %v1614_v1 }
 0x26f   : > { %v1590_v7 = vmax.f32 %v1494_v3, 0.0  ;;  %v1497_v8 = vadd.f32 %v3984_v6, %v4874_v37  ;;  %v1488_v9 = vpop.f32.mrb[11].mxu0  ;;  %4014 = vmatmul.mubr.msk.bf16.gmra.mrb[4].mxu1 %vm1651_vm2, %v1615_v0 }
 0x270   : > { %v1588_v10 = vmax.f32 %v1486_v5, 0.0  ;;  %v1489_v11 = vadd.f32 %v4874_v37, %v1488_v9 }
 0x271   : > { %v1591_v12 = vmax.f32 %v1497_v8, 0.0 }
 0x272   : > { %v1589_v13 = vmax.f32 %v1489_v11, 0.0 }
 0x273   : > { %v1617_v14 = vpack.c.bf16 %v1591_v12, %v1590_v7 }
 0x274   : > { %v1616_v15 = vpack.c.bf16 %v1589_v13, %v1588_v10  ;;  %v3987_v16 = vpop.f32.mrb[12].mxu0 }
 0x275   : > { %v1510_v17 = vadd.f32 %v3987_v16, %v4874_v37  ;;  %v1501_v18 = vpop.f32.mrb[13].mxu0 }
 0x276   : > { %v1502_v19 = vadd.f32 %v4874_v37, %v1501_v18  ;;  %v3988_v20 = vpop.f32.mrb[14].mxu0  ;;  %4017 = vmatprep.mubr.msk.bf16.mxu1 %vm1651_vm2, %v1616_v15 }
 0x277   : > { %v1594_v21 = vmax.f32 %v1510_v17, 0.0  ;;  %v1513_v22 = vadd.f32 %v3988_v20, %v4874_v37  ;;  %v1504_v23 = vpop.f32.mrb[15].mxu0  ;;  %4018 = vmatmul.mubr.msk.bf16.gmra.mrb[8].mxu1 %vm1651_vm2, %v1617_v14 }
 0x278   : > { %v1592_v24 = vmax.f32 %v1502_v19, 0.0  ;;  %v1505_v25 = vadd.f32 %v4874_v37, %v1504_v23  ;;  %v4927_v23 = vld [vmem:[%s6099_s7] ss:$0 sm:$0xff] }
 0x279   : > { %v1595_v26 = vmax.f32 %v1513_v22, 0.0 }
 0x27a   : > { %v1593_v27 = vmax.f32 %v1505_v25, 0.0 }
 0x27b   : > { %v1619_v28 = vpack.c.bf16 %v1595_v26, %v1594_v21 }
 0x27c   : > { %v1618_v29 = vpack.c.bf16 %v1593_v27, %v1592_v24  ;;  %v3991_v30 = vpop.f32.mrb[16].mxu0 }
 0x27d   : > { %v1526_v31 = vadd.f32 %v3991_v30, %v4874_v37  ;;  %v1517_v32 = vpop.f32.mrb[17].mxu0 }
 0x27e   : > { %v1518_v33 = vadd.f32 %v4874_v37, %v1517_v32  ;;  %v3992_v34 = vpop.f32.mrb[18].mxu0  ;;  %4021 = vmatprep.mubr.msk.bf16.mxu1 %vm1651_vm2, %v1618_v29 }
 0x27f   : > { %v1598_v35 = vmax.f32 %v1526_v31, 0.0  ;;  %v1529_v36 = vadd.f32 %v3992_v34, %v4874_v37  ;;  %v1520_v38 = vpop.f32.mrb[19].mxu0  ;;  %4022 = vmatmul.mubr.msk.bf16.gmra.mrb[12].mxu1 %vm1651_vm2, %v1619_v28  ;;  %v4934_v28 = vld [vmem:[%s6134_s15] ss:$0 sm:$0xff] }
 0x280   : > { %v1596_v39 = vmax.f32 %v1518_v33, 0.0  ;;  %v1521_v40 = vadd.f32 %v4874_v37, %v1520_v38 }
 0x281   : > { %v1599_v41 = vmax.f32 %v1529_v36, 0.0 }
 0x282   : > { %v1597_v42 = vmax.f32 %v1521_v40, 0.0 }
 0x283   : > { %v1621_v43 = vpack.c.bf16 %v1599_v41, %v1598_v35 }
 0x284   : > { %v1620_v44 = vpack.c.bf16 %v1597_v42, %v1596_v39  ;;  %v3995_v45 = vpop.f32.mrb[20].mxu0 }
 0x285   : > { %v1542_v46 = vadd.f32 %v3995_v45, %v4874_v37  ;;  %v1533_v47 = vpop.f32.mrb[21].mxu0 }
 0x286   : > { %v1534_v48 = vadd.f32 %v4874_v37, %v1533_v47  ;;  %v3996_v49 = vpop.f32.mrb[22].mxu0  ;;  %4025 = vmatprep.mubr.msk.bf16.mxu1 %vm1651_vm2, %v1620_v44 }
 0x287   : > { %v1602_v50 = vmax.f32 %v1542_v46, 0.0  ;;  %v1545_v51 = vadd.f32 %v3996_v49, %v4874_v37  ;;  %v1536_v52 = vpop.f32.mrb[23].mxu0  ;;  %4026 = vmatmul.mubr.msk.bf16.gmra.mrb[16].mxu1 %vm1651_vm2, %v1621_v43 }
 0x288   : > { %v1600_v53 = vmax.f32 %v1534_v48, 0.0  ;;  %v1537_v54 = vadd.f32 %v4874_v37, %v1536_v52 }
 0x289   : > { %v1603_v55 = vmax.f32 %v1545_v51, 0.0 }
 0x28a   : > { %v1601_v56 = vmax.f32 %v1537_v54, 0.0 }
 0x28b   : > { %v1623_v57 = vpack.c.bf16 %v1603_v55, %v1602_v50 }
 0x28c   : > { %v1622_v58 = vpack.c.bf16 %v1601_v56, %v1600_v53  ;;  %v3999_v59 = vpop.f32.mrb[24].mxu0 }
 0x28d   : > { %v1558_v60 = vadd.f32 %v3999_v59, %v4874_v37  ;;  %v1549_v61 = vpop.f32.mrb[25].mxu0 }
 0x28e   : > { %v1550_v62 = vadd.f32 %v4874_v37, %v1549_v61  ;;  %v4000_v63 = vpop.f32.mrb[26].mxu0  ;;  %4029 = vmatprep.mubr.msk.bf16.mxu1 %vm1651_vm2, %v1622_v58 }
 0x28f   : > { %v1606_v0 = vmax.f32 %v1558_v60, 0.0  ;;  %v1561_v1 = vadd.f32 %v4000_v63, %v4874_v37  ;;  %v1552_v2 = vpop.f32.mrb[27].mxu0  ;;  %4030 = vmatmul.mubr.msk.bf16.gmra.mrb[20].mxu1 %vm1651_vm2, %v1623_v57 }
 0x290   : > { %v1604_v3 = vmax.f32 %v1550_v62, 0.0  ;;  %v1553_v4 = vadd.f32 %v4874_v37, %v1552_v2 }
 0x291   : > { %v1607_v5 = vmax.f32 %v1561_v1, 0.0 }
 0x292   : > { %v1605_v6 = vmax.f32 %v1553_v4, 0.0 }
 0x293   : > { %v1625_v7 = vpack.c.bf16 %v1607_v5, %v1606_v0 }
 0x294   : > { %v1624_v8 = vpack.c.bf16 %v1605_v6, %v1604_v3  ;;  %v4003_v9 = vpop.f32.mrb[28].mxu0 }
 0x295   : > { %v1574_v10 = vadd.f32 %v4003_v9, %v4874_v37  ;;  %v1565_v11 = vpop.f32.mrb[29].mxu0 }
 0x296   : > { %v1566_v12 = vadd.f32 %v4874_v37, %v1565_v11  ;;  %v4004_v13 = vpop.f32.mrb[30].mxu0  ;;  %4033 = vmatprep.mubr.msk.bf16.mxu1 %vm1651_vm2, %v1624_v8 }
 0x297   : > { %v1610_v14 = vmax.f32 %v1574_v10, 0.0  ;;  %v1577_v15 = vadd.f32 %v4004_v13, %v4874_v37  ;;  %v1568_v16 = vpop.f32.mrb[31].mxu0  ;;  %4034 = vmatmul.mubr.msk.bf16.gmra.mrb[24].mxu1 %vm1651_vm2, %v1625_v7 }
 0x298   : > { %v1608_v17 = vmax.f32 %v1566_v12, 0.0  ;;  %v1569_v18 = vadd.f32 %v4874_v37, %v1568_v16 }
 0x299   : > { %v1611_v19 = vmax.f32 %v1577_v15, 0.0 }
 0x29a   : > { %v1609_v20 = vmax.f32 %v1569_v18, 0.0 }
 0x29b   : > { %v1627_v21 = vpack.c.bf16 %v1611_v19, %v1610_v14 }
 0x29c   : > { %v1626_v22 = vpack.c.bf16 %v1609_v20, %v1608_v17 }
 0x29e   : > { %4037 = vmatprep.mubr.msk.bf16.mxu1 %vm1651_vm2, %v1626_v22 }
 0x29f   : > { %4038 = vmatmul.mubr.msk.bf16.gmra.mrb[28].mxu1 %vm1651_vm2, %v1627_v21 }
 0x33a   : > { %v4011_v24 = vpop.f32.mrb[0].mxu1 }
 0x33b   : > { %v1743_v25 = vadd.f32 %v4011_v24, %v4927_v23  ;;  %v1734_v26 = vpop.f32.mrb[1].mxu1 }
 0x33c   : > { %v1735_v27 = vadd.f32 %v4927_v23, %v1734_v26  ;;  %v4012_v37 = vpop.f32.mrb[2].mxu1 }
 0x33d   : > { %v1863_v29 = vmax.f32 %v1743_v25, 0.0  ;;  %v1746_v30 = vadd.f32 %v4012_v37, %v4927_v23  ;;  %v1737_v31 = vpop.f32.mrb[3].mxu1 }
 0x33e   : > { %v1861_v32 = vmax.f32 %v1735_v27, 0.0  ;;  %v1738_v33 = vadd.f32 %v4927_v23, %v1737_v31 }
 0x33f   : > { %v1864_v34 = vmax.f32 %v1746_v30, 0.0  ;;  %v1902_v35 = vmul.f32 %v4934_v28, %v1863_v29 }
 0x340   : > { %v1862_v36 = vmax.f32 %v1738_v33, 0.0  ;;  %v1900_v38 = vmul.f32 %v4934_v28, %v1861_v32 }
 0x341   : > { %v1938_v39 = vsel %vm1271_vm1, %v1902_v35, 0.0  ;;  %v1903_v40 = vmul.f32 %v4934_v28, %v1864_v34 }
 0x342   : > { %1939 = vadd.xlane.f32.xlu1 %v1938_v39  ;;  %v4015_v41 = vpop.f32.mrb[4].mxu1  ;;  %v1932_v42 = vsel %vm1271_vm1, %v1900_v38, 0.0  ;;  %v1901_v43 = vmul.f32 %v4934_v28, %v1862_v36 }
 0x343   : > { %v1759_v44 = vadd.f32 %v4015_v41, %v4927_v23  ;;  %v1750_v45 = vpop.f32.mrb[5].mxu1  ;;  %1933 = vadd.xlane.f32.xlu0 %v1932_v42  ;;  %v1941_v51 = vsel %vm1271_vm1, %v1903_v40, 0.0 }
 0x344   : > { %v1751_v46 = vadd.f32 %v4927_v23, %v1750_v45  ;;  %v4016_v47 = vpop.f32.mrb[6].mxu1  ;;  %v1935_v54 = vsel %vm1271_vm1, %v1901_v43, 0.0 }
 0x345   : > { %v1867_v48 = vmax.f32 %v1759_v44, 0.0  ;;  %v1762_v49 = vadd.f32 %v4016_v47, %v4927_v23  ;;  %v1753_v50 = vpop.f32.mrb[7].mxu1 }
 0x346   : > { %v1865_v52 = vmax.f32 %v1751_v46, 0.0  ;;  %v1754_v53 = vadd.f32 %v4927_v23, %v1753_v50  ;;  %1942 = vadd.xlane.f32.xlu1 %v1941_v51 }
 0x347   : > { %v1868_v55 = vmax.f32 %v1762_v49, 0.0  ;;  %1936 = vadd.xlane.f32.xlu0 %v1935_v54  ;;  %v1906_v56 = vmul.f32 %v4934_v28, %v1867_v48 }
 0x348   : > { %v1866_v57 = vmax.f32 %v1754_v53, 0.0  ;;  %v1904_v61 = vmul.f32 %v4934_v28, %v1865_v52 }
 0x349   : > { %v1950_v58 = vsel %vm1271_vm1, %v1906_v56, 0.0  ;;  %v1907_v59 = vmul.f32 %v4934_v28, %v1868_v55 }
 0x34a   : > { %v4019_v60 = vpop.f32.mrb[8].mxu1  ;;  %v1905_v1 = vmul.f32 %v4934_v28, %v1866_v57  ;;  %v1944_v9 = vsel %vm1271_vm1, %v1904_v61, 0.0 }
 0x34b   : > { %v1775_v62 = vadd.f32 %v4019_v60, %v4927_v23  ;;  %v1766_v63 = vpop.f32.mrb[9].mxu1  ;;  %1951 = vadd.xlane.f32.xlu0 %v1950_v58  ;;  %v1953_v0 = vsel %vm1271_vm1, %v1907_v59, 0.0 }
 0x34c   : > { %v1767_v2 = vadd.f32 %v4927_v23, %v1766_v63  ;;  %1954 = vadd.xlane.f32.xlu1 %v1953_v0  ;;  %v4020_v3 = vpop.f32.mrb[10].mxu1  ;;  %v1947_v11 = vsel %vm1271_vm1, %v1905_v1, 0.0 }
 0x34d   : > { %v1871_v4 = vmax.f32 %v1775_v62, 0.0  ;;  %v1778_v5 = vadd.f32 %v4020_v3, %v4927_v23  ;;  %v1769_v6 = vpop.f32.mrb[11].mxu1 }
 0x34e   : > { %v1869_v7 = vmax.f32 %v1767_v2, 0.0  ;;  %v1770_v8 = vadd.f32 %v4927_v23, %v1769_v6 }
 0x34f   : > { %v1872_v10 = vmax.f32 %v1778_v5, 0.0  ;;  %1945 = vadd.xlane.f32.xlu0 %v1944_v9  ;;  %v1910_v12 = vmul.f32 %v4934_v28, %v1871_v4 }
 0x350   : > { %v1870_v13 = vmax.f32 %v1770_v8, 0.0  ;;  %1948 = vadd.xlane.f32.xlu1 %v1947_v11  ;;  %v1908_v17 = vmul.f32 %v4934_v28, %v1869_v7 }
 0x351   : > { %v1962_v14 = vsel %vm1271_vm1, %v1910_v12, 0.0  ;;  %v1911_v15 = vmul.f32 %v4934_v28, %v1872_v10 }
 0x352   : > { %v4023_v16 = vpop.f32.mrb[12].mxu1  ;;  %v1909_v21 = vmul.f32 %v4934_v28, %v1870_v13  ;;  %v1956_v30 = vsel %vm1271_vm1, %v1908_v17, 0.0 }
 0x353   : > { %v1791_v18 = vadd.f32 %v4023_v16, %v4927_v23  ;;  %v1782_v19 = vpop.f32.mrb[13].mxu1  ;;  %1963 = vadd.xlane.f32.xlu0 %v1962_v14  ;;  %v1965_v20 = vsel %vm1271_vm1, %v1911_v15, 0.0 }
 0x354   : > { %v1783_v22 = vadd.f32 %v4927_v23, %v1782_v19  ;;  %v4024_v24 = vpop.f32.mrb[14].mxu1  ;;  %1966 = vadd.xlane.f32.xlu1 %v1965_v20  ;;  %v1959_v32 = vsel %vm1271_vm1, %v1909_v21, 0.0 }
 0x355   : > { %v1875_v25 = vmax.f32 %v1791_v18, 0.0  ;;  %v1794_v26 = vadd.f32 %v4024_v24, %v4927_v23  ;;  %v1785_v27 = vpop.f32.mrb[15].mxu1 }
 0x356   : > { %v1873_v37 = vmax.f32 %v1783_v22, 0.0  ;;  %v1786_v29 = vadd.f32 %v4927_v23, %v1785_v27 }
 0x357   : > { %v1876_v31 = vmax.f32 %v1794_v26, 0.0  ;;  %1957 = vadd.xlane.f32.xlu0 %v1956_v30  ;;  %v1914_v33 = vmul.f32 %v4934_v28, %v1875_v25 }
 0x358   : > { %v1874_v34 = vmax.f32 %v1786_v29, 0.0  ;;  %1960 = vadd.xlane.f32.xlu1 %v1959_v32  ;;  %v1912_v39 = vmul.f32 %v4934_v28, %v1873_v37 }
 0x359   : > { %v1974_v35 = vsel %vm1271_vm1, %v1914_v33, 0.0  ;;  %v1915_v36 = vmul.f32 %v4934_v28, %v1876_v31  ;;  %v4498_v33 = vmov 0  }
 0x35a   : > { %v4027_v38 = vpop.f32.mrb[16].mxu1  ;;  %v1913_v43 = vmul.f32 %v4934_v28, %v1874_v34  ;;  %v1968_v51 = vsel %vm1271_vm1, %v1912_v39, 0.0  ;;  %4180 = vset.pattern.permute.xlu0 %v4498_v33  ;;  %4179 = vset.pattern.permute.xlu1 %v4498_v33 }
 0x35b   : > { %v1807_v40 = vadd.f32 %v4027_v38, %v4927_v23  ;;  %v1798_v41 = vpop.f32.mrb[17].mxu1  ;;  %1975 = vadd.xlane.f32.xlu0 %v1974_v35  ;;  %v1977_v42 = vsel %vm1271_vm1, %v1915_v36, 0.0 }
 0x35c   : > { %v1799_v44 = vadd.f32 %v4927_v23, %v1798_v41  ;;  %v4028_v45 = vpop.f32.mrb[18].mxu1  ;;  %1978 = vadd.xlane.f32.xlu1 %v1977_v42  ;;  %v1971_v53 = vsel %vm1271_vm1, %v1913_v43, 0.0 }
 0x35d   : > { %v1879_v46 = vmax.f32 %v1807_v40, 0.0  ;;  %v1810_v47 = vadd.f32 %v4028_v45, %v4927_v23  ;;  %v1801_v48 = vpop.f32.mrb[19].mxu1 }
 0x35e   : > { %v1877_v49 = vmax.f32 %v1799_v44, 0.0  ;;  %v1802_v50 = vadd.f32 %v4927_v23, %v1801_v48 }
 0x35f   : > { %v1880_v52 = vmax.f32 %v1810_v47, 0.0  ;;  %1969 = vadd.xlane.f32.xlu0 %v1968_v51  ;;  %v1918_v54 = vmul.f32 %v4934_v28, %v1879_v46 }
 0x360   : > { %v1878_v55 = vmax.f32 %v1802_v50, 0.0  ;;  %1972 = vadd.xlane.f32.xlu1 %v1971_v53  ;;  %v1916_v59 = vmul.f32 %v4934_v28, %v1877_v49 }
 0x361   : > { %v1986_v56 = vsel %vm1271_vm1, %v1918_v54, 0.0  ;;  %v1919_v57 = vmul.f32 %v4934_v28, %v1880_v52 }
 0x362   : > { %v4031_v58 = vpop.f32.mrb[20].mxu1  ;;  %v1917_v63 = vmul.f32 %v4934_v28, %v1878_v55  ;;  %v1980_v7 = vsel %vm1271_vm1, %v1916_v59, 0.0 }
 0x363   : > { %v1823_v60 = vadd.f32 %v4031_v58, %v4927_v23  ;;  %v1814_v61 = vpop.f32.mrb[21].mxu1  ;;  %1987 = vadd.xlane.f32.xlu0 %v1986_v56  ;;  %v1989_v62 = vsel %vm1271_vm1, %v1919_v57, 0.0 }
 0x364   : > { %v1815_v0 = vadd.f32 %v4927_v23, %v1814_v61  ;;  %v4032_v1 = vpop.f32.mrb[22].mxu1  ;;  %1990 = vadd.xlane.f32.xlu1 %v1989_v62  ;;  %v1983_v9 = vsel %vm1271_vm1, %v1917_v63, 0.0  ;;  %v2323_v61 = vlaneseq }
 0x365   : > { %v1883_v2 = vmax.f32 %v1823_v60, 0.0  ;;  %v1826_v3 = vadd.f32 %v4032_v1, %v4927_v23  ;;  %v1817_v4 = vpop.f32.mrb[23].mxu1  ;;  %v5036_v1 = vstv %s3677_s14 }
 0x366   : > { %v1881_v5 = vmax.f32 %v1815_v0, 0.0  ;;  %v1818_v6 = vadd.f32 %v4927_v23, %v1817_v4  ;;  %v5030_v62 = vshrl.u32 %v2323_v61, 7  ;;  %v5034_v0 = vld [vmem:[#allocation3] ss:$0 sm:$0xff]  ;;  %6136 = vst [vmem:[#allocation11_spill] sm:$0xff] %v5036_v1  ;;  %v2069_v4 = vld [vmem:[%s4713_s28 + $0x10] sm:$0xff] }
 0x367   : > { %v1884_v8 = vmax.f32 %v1826_v3, 0.0  ;;  %1981 = vadd.xlane.f32.xlu0 %v1980_v7  ;;  %v1922_v10 = vmul.f32 %v4934_v28, %v1883_v2 }
 0x368   : > { %v1882_v11 = vmax.f32 %v1818_v6, 0.0  ;;  %1984 = vadd.xlane.f32.xlu1 %v1983_v9  ;;  %v1920_v15 = vmul.f32 %v4934_v28, %v1881_v5  ;;  %6135 = vst [vmem:[#allocation10_spill] sm:$0xff] %v5030_v62  ;;  %v2326_v63 = vadd.s32 16, %v5030_v62  ;;  %v2325_v2 = vadd.s32 8, %v5030_v62  ;;  %v2067_v9 = vld [vmem:[%s4713_s28] sm:$0xff] }
 0x369   : > { %v1998_v12 = vsel %vm1271_vm1, %v1922_v10, 0.0  ;;  %v1923_v13 = vmul.f32 %v4934_v28, %v1884_v8  ;;  %v2330_v3 = vadd.s32 48, %v5030_v62  ;;  %v2328_v6 = vadd.s32 32, %v5030_v62 }
 0x36a   : > { %v4035_v14 = vpop.f32.mrb[24].mxu1  ;;  %v1921_v19 = vmul.f32 %v4934_v28, %v1882_v11  ;;  %v1992_v37 = vsel %vm1271_vm1, %v1920_v15, 0.0  ;;  %v2331_v7 = vadd.s32 56, %v5030_v62  ;;  %v5047_v11 = vadd.s32 %v5036_v1, %v2326_v63 }
 0x36b   : > { %v1839_v16 = vadd.f32 %v4035_v14, %v4927_v23  ;;  %v1830_v17 = vpop.f32.mrb[25].mxu1  ;;  %1999 = vadd.xlane.f32.xlu0 %v1998_v12  ;;  %v2001_v18 = vsel %vm1271_vm1, %v1923_v13, 0.0  ;;  %v2335_v12 = vadd.s32 88, %v5030_v62  ;;  %v2329_v13 = vadd.s32 40, %v5030_v62 }
 0x36c   : > { %v1831_v20 = vadd.f32 %v4927_v23, %v1830_v17  ;;  %v4036_v21 = vpop.f32.mrb[26].mxu1  ;;  %2002 = vadd.xlane.f32.xlu1 %v2001_v18  ;;  %v1995_v30 = vsel %vm1271_vm1, %v1921_v19, 0.0  ;;  %v5054_v15 = vadd.s32 %v5036_v1, %v5030_v62  ;;  %v2334_v17 = vadd.s32 80, %v5030_v62 }
 0x36d   : > { %v1887_v22 = vmax.f32 %v1839_v16, 0.0  ;;  %v1842_v24 = vadd.f32 %v4036_v21, %v4927_v23  ;;  %v1833_v25 = vpop.f32.mrb[27].mxu1  ;;  %v5061_v19 = vadd.s32 %v5036_v1, %v2325_v2  ;;  %v2333_v21 = vadd.s32 72, %v5030_v62  ;;  %v2071_v2 = vld [vmem:[%s4713_s28 + $0x20] sm:$0xff] }
 0x36e   : > { %v1885_v26 = vmax.f32 %v1831_v20, 0.0  ;;  %v1834_v27 = vadd.f32 %v4927_v23, %v1833_v25  ;;  %v5064_v20 = vadd.s32 %v5036_v1, %v2330_v3  ;;  %v5078_v33 = vadd.s32 %v5036_v1, %v2335_v12 }
 0x36f   : > { %v1888_v29 = vmax.f32 %v1842_v24, 0.0  ;;  %1993 = vadd.xlane.f32.xlu0 %v1992_v37  ;;  %v1926_v31 = vmul.f32 %v4934_v28, %v1887_v22  ;;  %v2070_v24 = vld [vmem:[%s4713_s28 + $0x18] sm:$0xff]  ;;  %v2339_v37 = vadd.s32 120, %v5030_v62  ;;  %v2347_v63 = vadd.s32 184, %v5030_v62 }
 0x370   : > { %v1886_v32 = vmax.f32 %v1834_v27, 0.0  ;;  %1996 = vadd.xlane.f32.xlu1 %v1995_v30  ;;  %v1924_v38 = vmul.f32 %v4934_v28, %v1885_v26  ;;  %v5069_v26 = vadd.s32 %v5036_v1, %v2328_v6  ;;  %v5072_v27 = vadd.s32 %v5036_v1, %v2331_v7 }
 0x371   : > { %v2010_v34 = vsel %vm1271_vm1, %v1926_v31, 0.0  ;;  %v1927_v35 = vmul.f32 %v4934_v28, %v1888_v29  ;;  %v2068_v31 = vld [vmem:[%s4713_s28 + $0x8] sm:$0xff]  ;;  %vm2392_vm3 = vcmp.lt.s32.totalorder %v5047_v11, 300  ;;  %vm2390_vm5 = vcmp.lt.s32.totalorder %v5054_v15, 300 }
 0x372   : > { %v4039_v36 = vpop.f32.mrb[28].mxu1  ;;  %v1925_v42 = vmul.f32 %v4934_v28, %v1886_v32  ;;  %v2004_v50 = vsel %vm1271_vm1, %v1924_v38, 0.0  ;;  %v5085_v38 = vadd.s32 %v5036_v1, %v2334_v17  ;;  %vm2391_vm7 = vcmp.lt.s32.totalorder %v5061_v19, 300 }
 0x373   : > { %v1855_v39 = vadd.f32 %v4039_v36, %v4927_v23  ;;  %v1846_v40 = vpop.f32.mrb[29].mxu1  ;;  %2011 = vadd.xlane.f32.xlu0 %v2010_v34  ;;  %v2013_v41 = vsel %vm1271_vm1, %v1927_v35, 0.0  ;;  %v5081_v34 = vadd.s32 %v5036_v1, %v2329_v13  ;;  %v2345_v13 = vadd.s32 168, %v5030_v62 }
 0x374   : > { %v1847_v43 = vadd.f32 %v4927_v23, %v1846_v40  ;;  %v4040_v44 = vpop.f32.mrb[30].mxu1  ;;  %2014 = vadd.xlane.f32.xlu1 %v2013_v41  ;;  %v2007_v52 = vsel %vm1271_vm1, %v1925_v42, 0.0  ;;  %v5089_v41 = vadd.s32 %v5036_v1, %v2333_v21  ;;  %v2337_v42 = vadd.s32 104, %v5030_v62 }
 0x375   : > { %v1858_v45 = vadd.f32 %v4040_v44, %v4927_v23  ;;  %v1849_v46 = vpop.f32.mrb[31].mxu1  ;;  %v1891_v47 = vmax.f32 %v1855_v39, 0.0  ;;  %v2332_v39 = vadd.s32 64, %v5030_v62  ;;  %v5093_v44 = vadd.s32 %v5036_v1, %v2339_v37 }
 0x376   : > { %v1889_v48 = vmax.f32 %v1847_v43, 0.0  ;;  %v1850_v49 = vadd.f32 %v4927_v23, %v1849_v46  ;;  %v2346_v21 = vadd.s32 176, %v5030_v62  ;;  %vm2396_vm8 = vcmp.lt.s32.totalorder %v5064_v20, 300 }
 0x377   : > { %v1892_v51 = vmax.f32 %v1858_v45, 0.0  ;;  %2005 = vadd.xlane.f32.xlu0 %v2004_v50  ;;  %v1930_v57 = vmul.f32 %v4934_v28, %v1891_v47  ;;  %v2338_v45 = vadd.s32 112, %v5030_v62  ;;  %v2073_v47 = vld [vmem:[%s4713_s28 + $0x30] sm:$0xff]  ;;  %v2336_v50 = vadd.s32 96, %v5030_v62 }
 0x378   : > { %v1890_v53 = vmax.f32 %v1850_v49, 0.0  ;;  %2008 = vadd.xlane.f32.xlu1 %v2007_v52  ;;  %v1928_v54 = vmul.f32 %v4934_v28, %v1889_v48  ;;  %v2343_v49 = vadd.s32 152, %v5030_v62  ;;  %vm2394_vm9 = vcmp.lt.s32.totalorder %v5069_v26, 300 }
 0x379   : > { %v1931_v55 = vmul.f32 %v4934_v28, %v1892_v51  ;;  %v2022_v59 = vsel %vm1271_vm1, %v1930_v57, 0.0  ;;  %v2342_v51 = vadd.s32 144, %v5030_v62  ;;  %v2341_v57 = vadd.s32 136, %v5030_v62 }
 0x37a   : > { %v2016_v56 = vsel %vm1271_vm1, %v1928_v54, 0.0  ;;  %v1929_v58 = vmul.f32 %v4934_v28, %v1890_v53  ;;  %v2327_v28 = vadd.s32 24, %v5030_v62  ;;  %v2074_v54 = vld [vmem:[%s4713_s28 + $0x38] sm:$0xff]  ;;  %v5112_v61 = vadd.s32 %v5036_v1, %v2338_v45 }
 0x37b   : > { %2017 = vadd.xlane.f32.xlu0 %v2016_v56  ;;  %v2025_v23 = vsel %vm1271_vm1, %v1931_v55, 0.0  ;;  %v5103_v56 = vadd.s32 %v5036_v1, %v2332_v39  ;;  %v5123_v6 = vadd.s32 %v5036_v1, %v2342_v51  ;;  %v5128_v12 = vadd.s32 %v5036_v1, %v2341_v57  ;;  %v2075_v57 = vld [vmem:[%s4713_s28 + $0x40] sm:$0xff] }
 0x37c   : > { %2026 = vadd.xlane.f32.xlu1 %v2025_v23  ;;  %v2019_v60 = vsel %vm1271_vm1, %v1929_v58, 0.0  ;;  %v5057_v16 = vadd.s32 %v5036_v1, %v2327_v28  ;;  %v5108_v58 = vadd.s32 %v5036_v1, %v2337_v42  ;;  %vm2401_vm10 = vcmp.lt.s32.totalorder %v5078_v33, 300 }
 0x37d   : > { %vm2397_vm11 = vcmp.lt.s32.totalorder %v5072_v27, 300  ;;  %vm2399_vm12 = vcmp.lt.s32.totalorder %v5089_v41, 300  ;;  %vm2395_vm13 = vcmp.lt.s32.totalorder %v5081_v34, 300  ;;  %vm2405_vm14 = vcmp.lt.s32.totalorder %v5093_v44, 300 }
 0x37e   : > { %vm2393_vm6 = vcmp.lt.s32.totalorder %v5057_v16, 300  ;;  %vm2400_vm15 = vcmp.lt.s32.totalorder %v5085_v38, 300  ;;  %vm2403_vm0 = vcmp.lt.s32.totalorder %v5108_v58, 300  ;;  %vm2398_vm1 = vcmp.lt.s32.totalorder %v5103_v56, 300 }
 0x37f   : > { %2023 = vadd.xlane.f32.xlu0 %v2022_v59  ;;  %v2340_v59 = vadd.s32 128, %v5030_v62 }
 0x380   : > { %2020 = vadd.xlane.f32.xlu1 %v2019_v60 }
 0x3cf   : > { %v1940_v5 = vpop.xlane.xlu1 %1939 }
 0x3d0   : > { %v2037_v8 = vadd.f32 %v5034_v0, %v1940_v5  ;;  %v1934_v10 = vpop.xlane.xlu0 %1933  ;;  %v5120_v5 = vadd.s32 %v5036_v1, %v2336_v50  ;;  %v5150_v50 = vadd.s32 %v5036_v1, %v2346_v21  ;;  %v2348_v21 = vadd.s32 192, %v5030_v62 }
 0x3d1   : > { %v2035_v14 = vadd.f32 %v5034_v0, %v1934_v10 }
 0x3d2   : > { %v2101_v18 = vadd.f32 %v2069_v4, %v2037_v8  ;;  %v5117_v4 = vadd.s32 %v5036_v1, %v2343_v49  ;;  %6137 = vst [vmem:[#allocation12_spill] sm:$0xff] %v5150_v50 }
 0x3d3   : > { %v2099_v22 = vadd.f32 %v2067_v9, %v2035_v14  ;;  %v1943_v25 = vpop.xlane.xlu1 %1942  ;;  %v2072_v9 = vld [vmem:[%s4713_s28 + $0x28] sm:$0xff] }
 0x3d4   : > { %v3647_v29 = vmul.f32 -1.442695, %v2101_v18  ;;  %v2038_v30 = vadd.f32 %v5034_v0, %v1943_v25  ;;  %v1937_v32 = vpop.xlane.xlu0 %1936  ;;  %v5133_v18 = vadd.s32 %v5036_v1, %v2340_v59  ;;  %v2344_v25 = vadd.s32 160, %v5030_v62 }
 0x3d5   : > { %v3645_v35 = vmul.f32 -1.442695, %v2099_v22  ;;  %v2036_v36 = vadd.f32 %v5034_v0, %v1937_v32  ;;  %v2351_v32 = vadd.s32 216, %v5030_v62  ;;  %vm2409_vm2 = vcmp.lt.s32.totalorder %v5117_v4, 300 }
 0x3d6   : > { %4184 = vpow2.f32 %v3647_v29  ;;  %v2102_v40 = vadd.f32 %v2070_v24, %v2038_v30  ;;  %v5137_v24 = vadd.s32 %v5036_v1, %v2347_v63  ;;  %v2077_v30 = vld [vmem:[%s4713_s28 + $0x50] sm:$0xff] }
 0x3d7   : > { %4186 = vpow2.f32 %v3645_v35  ;;  %v2100_v43 = vadd.f32 %v2068_v31, %v2036_v36  ;;  %v2350_v35 = vadd.s32 208, %v5030_v62  ;;  %v5159_v59 = vadd.s32 %v5036_v1, %v2351_v32 }
 0x3d8   : > { %v3648_v46 = vmul.f32 -1.442695, %v2102_v40  ;;  %v1952_v48 = vpop.xlane.xlu0 %1951 }
 0x3d9   : > { %v3646_v52 = vmul.f32 -1.442695, %v2100_v43  ;;  %v2041_v53 = vadd.f32 %v5034_v0, %v1952_v48  ;;  %v1955_v55 = vpop.xlane.xlu1 %1954  ;;  %v2078_v43 = vld [vmem:[%s4713_s28 + $0x58] sm:$0xff] }
 0x3da   : > { %4188 = vpow2.f32 %v3648_v46  ;;  %v2042_v23 = vadd.f32 %v5034_v0, %v1955_v55  ;;  %v5146_v46 = vadd.s32 %v5036_v1, %v2345_v13 }
 0x3db   : > { %4190 = vpow2.f32 %v3646_v52  ;;  %v2105_v60 = vadd.f32 %v2073_v47, %v2041_v53  ;;  %v2349_v52 = vadd.s32 200, %v5030_v62  ;;  %v5155_v53 = vadd.s32 %v5036_v1, %v2344_v25  ;;  %v2081_v25 = vld [vmem:[%s4713_s28 + $0x70] sm:$0xff] }
 0x3dc   : > { %v2106_v28 = vadd.f32 %v2074_v54, %v2042_v23  ;;  %v1946_v3 = vpop.xlane.xlu0 %1945 }
 0x3dd   : > { %v3651_v7 = vmul.f32 -1.442695, %v2105_v60  ;;  %v2039_v8 = vadd.f32 %v5034_v0, %v1946_v3  ;;  %v1949_v10 = vpop.xlane.xlu1 %1948  ;;  %6138 = vst [vmem:[#allocation13_spill] sm:$0xff] %v5155_v53  ;;  %v5162_v60 = vadd.s32 %v5036_v1, %v2350_v35 }
 0x3de   : > { %v3652_v14 = vmul.f32 -1.442695, %v2106_v28  ;;  %v2040_v17 = vadd.f32 %v5034_v0, %v1949_v10 }
 0x3df   : > { %4192 = vpow2.f32 %v3651_v7  ;;  %v2103_v22 = vadd.f32 %v2071_v2, %v2039_v8  ;;  %6139 = vst [vmem:[#allocation14_spill] sm:$0xff] %v5162_v60  ;;  %v2076_v7 = vld [vmem:[%s4713_s28 + $0x48] sm:$0xff]  ;;  %v2093_v60 = vld [vmem:[%s4713_s28 + $0xd0] sm:$0xff] }
 0x3e0   : > { %v4185_v37 = vpop.eup %4184  ;;  %4194 = vpow2.f32 %v3652_v14  ;;  %v2104_v29 = vadd.f32 %v2072_v9, %v2040_v17  ;;  %v1964_v31 = vpop.xlane.xlu0 %1963  ;;  %v5169_v17 = vadd.s32 %v5036_v1, %v2349_v52 }
 0x3e1   : > { %v4187_v36 = vpop.eup %4186  ;;  %v2229_v39 = vadd.f32 1.0, %v4185_v37  ;;  %v3649_v40 = vmul.f32 -1.442695, %v2103_v22  ;;  %v2045_v42 = vadd.f32 %v5034_v0, %v1964_v31  ;;  %v1967_v45 = vpop.xlane.xlu1 %1966 }
 0x3e2   : > { %v2227_v47 = vadd.f32 1.0, %v4187_v36  ;;  %v3650_v48 = vmul.f32 -1.442695, %v2104_v29  ;;  %v2046_v49 = vadd.f32 %v5034_v0, %v1967_v45  ;;  %6140 = vst [vmem:[#allocation15_spill] sm:$0xff] %v5169_v17  ;;  %v2355_v29 = vadd.s32 248, %v5030_v62  ;;  %v2082_v36 = vld [vmem:[%s4713_s28 + $0x78] sm:$0xff] }
 0x3e3   : > { %4196 = vrcp.f32 %v2229_v39  ;;  %v2109_v51 = vadd.f32 %v2077_v30, %v2045_v42  ;;  %v2352_v30 = vadd.s32 224, %v5030_v62 }
 0x3e4   : > { %v4189_v54 = vpop.eup %4188  ;;  %4198 = vrcp.f32 %v2227_v47  ;;  %v2110_v55 = vadd.f32 %v2078_v43, %v2046_v49  ;;  %v1958_v23 = vpop.xlane.xlu0 %1957 }
 0x3e5   : > { %v4191_v63 = vpop.eup %4190  ;;  %v2230_v28 = vadd.f32 1.0, %v4189_v54  ;;  %4200 = vpow2.f32 %v3649_v40  ;;  %v3655_v2 = vmul.f32 -1.442695, %v2109_v51  ;;  %v2043_v3 = vadd.f32 %v5034_v0, %v1958_v23  ;;  %v1961_v8 = vpop.xlane.xlu1 %1960  ;;  %v2079_v54 = vld [vmem:[%s4713_s28 + $0x60] sm:$0xff] }
 0x3e6   : > { %v2228_v9 = vadd.f32 1.0, %v4191_v63  ;;  %4202 = vpow2.f32 %v3650_v48  ;;  %v3656_v10 = vmul.f32 -1.442695, %v2110_v55  ;;  %v2044_v13 = vadd.f32 %v5034_v0, %v1961_v8 }
 0x3e7   : > { %4204 = vrcp.f32 %v2230_v28  ;;  %v2107_v14 = vadd.f32 %v2075_v57, %v2043_v3  ;;  %v2353_v40 = vadd.s32 232, %v5030_v62  ;;  %v5181_v51 = vadd.s32 %v5036_v1, %v2348_v21  ;;  %v2080_v3 = vld [vmem:[%s4713_s28 + $0x68] sm:$0xff] }
 0x3e8   : > { %4206 = vrcp.f32 %v2228_v9  ;;  %v2108_v22 = vadd.f32 %v2076_v7, %v2044_v13  ;;  %v1976_v37 = vpop.xlane.xlu0 %1975  ;;  %v5188_v23 = vadd.s32 %v5036_v1, %v2355_v29  ;;  %v5193_v8 = vadd.s32 %v5036_v1, %v2352_v30 }
 0x3e9   : > { %v4193_v31 = vpop.eup %4192  ;;  %4208 = vpow2.f32 %v3655_v2  ;;  %v3653_v32 = vmul.f32 -1.442695, %v2107_v14  ;;  %v2049_v35 = vadd.f32 %v5034_v0, %v1976_v37  ;;  %v1979_v39 = vpop.xlane.xlu1 %1978  ;;  %6141 = vst [vmem:[#allocation16_spill] sm:$0xff] %v5181_v51  ;;  %v5185_v57 = vadd.s32 %v5036_v1, %v2353_v40 }
 0x3ea   : > { %v4195_v42 = vpop.eup %4194  ;;  %v2233_v43 = vadd.f32 1.0, %v4193_v31  ;;  %4210 = vpow2.f32 %v3656_v10  ;;  %v3654_v45 = vmul.f32 -1.442695, %v2108_v22  ;;  %v2050_v47 = vadd.f32 %v5034_v0, %v1979_v39  ;;  %6143 = vst [vmem:[#allocation18_spill] sm:$0xff] %v5188_v23  ;;  %6144 = vst [vmem:[#allocation19_spill] sm:$0xff] %v5193_v8 }
 0x3eb   : > { %v2234_v48 = vadd.f32 1.0, %v4195_v42  ;;  %4212 = vpow2.f32 %v3653_v32  ;;  %v2113_v49 = vadd.f32 %v2081_v25, %v2049_v35  ;;  %6142 = vst [vmem:[#allocation17_spill] sm:$0xff] %v5185_v57  ;;  %v2085_v35 = vld [vmem:[%s4713_s28 + $0x90] sm:$0xff] }
 0x3ec   : > { %4214 = vrcp.f32 %v2233_v43  ;;  %v2114_v52 = vadd.f32 %v2082_v36, %v2050_v47  ;;  %v1970_v55 = vpop.xlane.xlu0 %1969 }
 0x3ed   : > { %v4197_v63 = vpop.eup %4196  ;;  %4216 = vrcp.f32 %v2234_v48  ;;  %v3659_v28 = vmul.f32 -1.442695, %v2113_v49  ;;  %v2047_v2 = vadd.f32 %v5034_v0, %v1970_v55  ;;  %v1973_v7 = vpop.xlane.xlu1 %1972 }
 0x3ee   : > { %v4199_v9 = vpop.eup %4198  ;;  %4218 = vpow2.f32 %v3654_v45  ;;  %v3660_v10 = vmul.f32 -1.442695, %v2114_v52  ;;  %v2048_v13 = vadd.f32 %v5034_v0, %v1973_v7  ;;  %v5198_v14 = vsel %vm2392_vm3, %v4197_v63, 0.0 }
 0x3ef   : > { %v4201_v21 = vpop.eup %4200  ;;  %4220 = vpow2.f32 %v3659_v28  ;;  %v2111_v22 = vadd.f32 %v2079_v54, %v2047_v2  ;;  %2457 = vst.msk [vmem:[%s4718_s17 + $0x10] sm:$0xff] %vm2454_vm4, %v5198_v14  ;;  %v2489_v25 = vmul.f32 1.1111112, %v5198_v14  ;;  %v6110_v37 = vsub.f32 1.0, %v5198_v14  ;;  %3011 = vperm.xlu1 %4179, %v5198_v14   ;;  %v2086_v2 = vld [vmem:[%s4713_s28 + $0x98] sm:$0xff] }
 0x3f0   : > { %v4203_v29 = vpop.eup %4202  ;;  %v2231_v30 = vadd.f32 1.0, %v4201_v21  ;;  %4222 = vpow2.f32 %v3660_v10  ;;  %v2112_v31 = vadd.f32 %v2080_v3, %v2048_v13  ;;  %v5208_v32 = vsel %vm2390_vm5, %v4199_v9, 0.0  ;;  %v1988_v36 = vpop.xlane.xlu0 %1987 }
 0x3f1   : > { %v4205_v39 = vpop.eup %4204  ;;  %v2232_v40 = vadd.f32 1.0, %v4203_v29  ;;  %v3657_v42 = vmul.f32 -1.442695, %v2111_v22  ;;  %v2521_v43 = vadd.f32 1e-06, %v2489_v25  ;;  %3001 = vperm.xlu0 %4180, %v5208_v32   ;;  %2455 = vst.msk [vmem:[%s4718_s17] sm:$0xff] %vm2454_vm4, %v5208_v32  ;;  %v1991_v47 = vpop.xlane.xlu1 %1990  ;;  %v2053_v28 = vadd.f32 %v5034_v0, %v1988_v36 }
 0x3f2   : > { %v6109_v45 = vsub.f32 1.0, %v5208_v32  ;;  %v4207_v48 = vpop.eup %4206  ;;  %4224 = vrcp.f32 %v2231_v30  ;;  %v3658_v49 = vmul.f32 -1.442695, %v2112_v31  ;;  %v2681_v52 = vmul.f32 9.9999, %v6110_v37 }
 0x3f3   : > { %v2487_v54 = vmul.f32 1.1111112, %v5208_v32  ;;  %v4209_v55 = vpop.eup %4208  ;;  %4226 = vrcp.f32 %v2232_v40  ;;  %v2054_v3 = vadd.f32 %v5034_v0, %v1991_v47  ;;  %v2117_v30 = vadd.f32 %v2085_v35, %v2053_v28 }
 0x3f4   : > { %v2679_v63 = vmul.f32 9.9999, %v6109_v45  ;;  %v4211_v7 = vpop.eup %4210  ;;  %v2237_v9 = vadd.f32 1.0, %v4209_v55  ;;  %4228 = vpow2.f32 %v3657_v42  ;;  %v2713_v10 = vadd.f32 1e-06, %v2681_v52  ;;  %v1982_v21 = vpop.xlane.xlu0 %1981  ;;  %v2083_v42 = vld [vmem:[%s4713_s28 + $0x80] sm:$0xff] }
 0x3f5   : > { %v2519_v13 = vadd.f32 1e-06, %v2487_v54  ;;  %v4213_v22 = vpop.eup %4212  ;;  %v2238_v25 = vadd.f32 1.0, %v4211_v7  ;;  %4230 = vpow2.f32 %v3658_v49  ;;  %v1985_v31 = vpop.xlane.xlu1 %1984  ;;  %v2118_v47 = vadd.f32 %v2086_v2, %v2054_v3 }
 0x3f6   : > { %v2711_v29 = vadd.f32 1e-06, %v2679_v63  ;;  %v4215_v36 = vpop.eup %4214  ;;  %4232 = vrcp.f32 %v2237_v9  ;;  %v2235_v40 = vadd.f32 1.0, %v4213_v22  ;;  %v5228_v55 = vsel %vm2393_vm6, %v4205_v39, 0.0  ;;  %v2084_v63 = vld [vmem:[%s4713_s28 + $0x88] sm:$0xff] }
 0x3f7   : > { %v5231_v52 = vpop.eup %4216  ;;  %4234 = vrcp.f32 %v2238_v25  ;;  %v3663_v54 = vmul.f32 -1.442695, %v2117_v30  ;;  %2458 = vst.msk [vmem:[%s4718_s17 + $0x18] sm:$0xff] %vm2454_vm4, %v5228_v55  ;;  %v2490_v49 = vmul.f32 1.1111112, %v5228_v55  ;;  %v6112_v35 = vsub.f32 1.0, %v5228_v55  ;;  %3016 = vperm.xlu1 %4179, %v5228_v55  }
 0x3f8   : > { %v4219_v28 = vpop.eup %4218  ;;  %4236 = vrcp.f32 %v2235_v40  ;;  %v5240_v2 = vmul.f32 -1.442695, %v2118_v47  ;;  %v2051_v39 = vadd.f32 %v5034_v0, %v1982_v21  ;;  %v2052_v3 = vadd.f32 %v5034_v0, %v1985_v31  ;;  %v2000_v7 = vpop.xlane.xlu0 %1999 }
 0x3f9   : > { %v4221_v9 = vpop.eup %4220  ;;  %v2236_v22 = vadd.f32 1.0, %v4219_v28  ;;  %4238 = vlog2.f32 %v2521_v43  ;;  %v5245_v25 = vadd.f32 1e-06, %v2490_v49  ;;  %v2682_v30 = vmul.f32 9.9999, %v6112_v35  ;;  %v2003_v45 = vpop.xlane.xlu1 %2002  ;;  %v2089_v49 = vld [vmem:[%s4713_s28 + $0xb0] sm:$0xff] }
 0x3fa   : > { %v4223_v40 = vpop.eup %4222  ;;  %v2241_v47 = vadd.f32 1.0, %v4221_v9  ;;  %4240 = vlog2.f32 %v2713_v10  ;;  %v2115_v21 = vadd.f32 %v2083_v42, %v2051_v39  ;;  %v2116_v37 = vadd.f32 %v2084_v63, %v2052_v3  ;;  %v2090_v3 = vld [vmem:[%s4713_s28 + $0xb8] sm:$0xff] }
 0x3fb   : > { %4242 = vrcp.f32 %v2236_v22  ;;  %v2242_v31 = vadd.f32 1.0, %v4223_v40  ;;  %v5249_v1 = vadd.f32 1e-06, %v2682_v30  ;;  %v5253_v43 = vsel %vm2391_vm7, %v4207_v48, 0.0 }
 0x3fc   : > { %v4225_v28 = vpop.eup %4224  ;;  %4244 = vrcp.f32 %v2241_v47  ;;  %v5256_v35 = vmul.f32 -1.442695, %v2115_v21  ;;  %v5258_v62 = vmul.f32 -1.442695, %v2116_v37  ;;  %3006 = vperm.xlu1 %4179, %v5253_v43   ;;  %2456 = vst.msk [vmem:[%s4718_s17 + $0x8] sm:$0xff] %vm2454_vm4, %v5253_v43  ;;  %v1994_v42 = vpop.xlane.xlu0 %1993  ;;  %v6115_v48 = vsub.f32 1.0, %v5253_v43 }
 0x3fd   : > { %v2488_v10 = vmul.f32 1.1111112, %v5253_v43  ;;  %v5265_v63 = vpop.eup %4226  ;;  %4246 = vrcp.f32 %v2242_v31  ;;  %v2057_v39 = vadd.f32 %v5034_v0, %v2000_v7  ;;  %v2058_v37 = vadd.f32 %v5034_v0, %v2003_v45  ;;  %v2087_v45 = vld [vmem:[%s4713_s28 + $0xa0] sm:$0xff]  ;;  %v1997_v8 = vpop.xlane.xlu1 %1996 }
 0x3fe   : > { %v4229_v9 = vpop.eup %4228  ;;  %4248 = vlog2.f32 %v2519_v13  ;;  %v5274_v30 = vsel %vm2396_vm8, %v4215_v36, 0.0  ;;  %v2055_v40 = vadd.f32 %v5034_v0, %v1994_v42  ;;  %v2680_v7 = vmul.f32 9.9999, %v6115_v48 }
 0x3ff   : > { %v2520_v22 = vadd.f32 1e-06, %v2488_v10  ;;  %v4231_v47 = vpop.eup %4230  ;;  %v2239_v21 = vadd.f32 1.0, %v4229_v9  ;;  %4250 = vlog2.f32 %v2711_v29  ;;  %v2121_v31 = vadd.f32 %v2089_v49, %v2057_v39  ;;  %2461 = vst.msk [vmem:[%s4718_s17 + $0x30] sm:$0xff] %vm2454_vm4, %v5274_v30 }
 0x400   : > { %v5283_v13 = vpop.eup %4232  ;;  %v2240_v10 = vadd.f32 1.0, %v4231_v47  ;;  %4252 = vpow2.f32 %v3663_v54  ;;  %v2122_v36 = vadd.f32 %v2090_v3, %v2058_v37  ;;  %3031 = vperm.xlu1 %4179, %v5274_v30   ;;  %v2493_v42 = vmul.f32 1.1111112, %v5274_v30  ;;  %v2088_v47 = vld [vmem:[%s4713_s28 + $0xa8] sm:$0xff] }
 0x401   : > { %v4235_v29 = vpop.eup %4234  ;;  %4254 = vrcp.f32 %v2239_v21  ;;  %v2712_v9 = vadd.f32 1e-06, %v2680_v7  ;;  %v3667_v48 = vmul.f32 -1.442695, %v2121_v31  ;;  %v6119_v49 = vsub.f32 1.0, %v5274_v30 }
 0x402   : > { %v5288_v39 = vpop.eup %4236  ;;  %4256 = vrcp.f32 %v2240_v10  ;;  %v3668_v23 = vmul.f32 -1.442695, %v2122_v36  ;;  %v2525_v51 = vadd.f32 1e-06, %v2493_v42  ;;  %v2119_v57 = vadd.f32 %v2087_v45, %v2055_v40  ;;  %v2012_v45 = vpop.xlane.xlu0 %2011 }
 0x403   : > { %v4239_v54 = vpop.eup %4238  ;;  %4258 = vpow2.f32 %v5240_v2  ;;  %v2685_v3 = vmul.f32 9.9999, %v6119_v49  ;;  %v2056_v37 = vadd.f32 %v5034_v0, %v1997_v8  ;;  %v5298_v21 = vsel %vm2394_vm9, %v4225_v28, 0.0 }
 0x404   : > { %v4241_v7 = vpop.eup %4240  ;;  %v2556_v31 = vmul.f32 0.6931472, %v4239_v54  ;;  %4260 = vlog2.f32 %v5245_v25  ;;  %v5301_v40 = vmul.f32 -1.442695, %v2119_v57  ;;  %3021 = vperm.xlu1 %4179, %v5298_v21   ;;  %2459 = vst.msk [vmem:[%s4718_s17 + $0x20] sm:$0xff] %vm2454_vm4, %v5298_v21  ;;  %v2015_v25 = vpop.xlane.xlu1 %2014  ;;  %v2651_v49 = vsub.f32 1.0, %v5298_v21 }
 0x405   : > { %v2491_v2 = vmul.f32 1.1111112, %v5298_v21  ;;  %v5308_v8 = vpop.eup %4242  ;;  %v2748_v10 = vmul.f32 0.6931472, %v4241_v7  ;;  %4262 = vlog2.f32 %v5249_v1  ;;  %v2717_v28 = vadd.f32 1e-06, %v2685_v3 }
 0x406   : > { %v2120_v36 = vadd.f32 %v2088_v47, %v2056_v37  ;;  %v5311_v57 = vpop.eup %4244  ;;  %v2617_v42 = vmul.f32 %v2556_v31, %v5198_v14  ;;  %4264 = vpow2.f32 %v5256_v35  ;;  %v6145_v7 = vsub.f32 1.0, %v5198_v14  ;;  %v2094_v37 = vld [vmem:[%s4713_s28 + $0xd8] sm:$0xff] }
 0x407   : > { %v5315_v54 = vadd.f32 1e-06, %v2491_v2  ;;  %v5319_v53 = vpop.eup %4246  ;;  %4266 = vpow2.f32 %v5258_v62  ;;  %v2061_v3 = vadd.f32 %v5034_v0, %v2012_v45  ;;  %v2683_v35 = vmul.f32 9.9999, %v2651_v49 }
 0x408   : > { %v2809_v1 = vmul.f32 %v2748_v10, %v6145_v7  ;;  %v3666_v47 = vmul.f32 -1.442695, %v2120_v36  ;;  %v4249_v31 = vpop.eup %4248  ;;  %4268 = vlog2.f32 %v2520_v22  ;;  %v2062_v2 = vadd.f32 %v5034_v0, %v2015_v25 }
 0x409   : > { %v5331_v17 = vsel %vm2401_vm10, %v4235_v29, 0.0  ;;  %v4251_v14 = vpop.eup %4250  ;;  %v2552_v10 = vmul.f32 0.6931472, %v4249_v31  ;;  %4270 = vlog2.f32 %v2712_v9  ;;  %v2125_v62 = vadd.f32 %v2093_v60, %v2061_v3 }
 0x40a   : > { %v2841_v50 = vadd.f32 %v2809_v1, %v2617_v42  ;;  %2466 = vst.msk [vmem:[%s4718_s17 + $0x58] sm:$0xff] %vm2454_vm4, %v5331_v17  ;;  %3056 = vperm.xlu0 %4180, %v5331_v17   ;;  %v4253_v22 = vpop.eup %4252  ;;  %v2744_v45 = vmul.f32 0.6931472, %v4251_v14  ;;  %4272 = vpow2.f32 %v3667_v48  ;;  %v5337_v36 = vadd.f32 1e-06, %v2683_v35 }
 0x40b   : > { %v2126_v25 = vadd.f32 %v2094_v37, %v2062_v2  ;;  %v5339_v7 = vpop.eup %4254  ;;  %v2615_v42 = vmul.f32 %v2552_v10, %v5208_v32  ;;  %v2245_v9 = vadd.f32 1.0, %v4253_v22  ;;  %4274 = vpow2.f32 %v3668_v23 }
 0x40c   : > { %v2873_v29 = vsel %vm2392_vm3, %v2841_v50, 0.0  ;;  %v5344_v60 = vpop.eup %4256  ;;  %v6146_v1 = vsub.f32 1.0, %v5208_v32  ;;  %4276 = vlog2.f32 %v2525_v51  ;;  %v3671_v3 = vmul.f32 -1.442695, %v2125_v62 }
 0x40d   : > { %2905 = vst.msk [vmem:[%s4723_s19 + $0x10] sm:$0xff] %vm2454_vm4, %v2873_v29  ;;  %v5350_v37 = vmul.f32 -1.442695, %v2126_v25  ;;  %v4259_v31 = vpop.eup %4258  ;;  %4278 = vrcp.f32 %v2245_v9  ;;  %v2498_v11 = vmul.f32 1.1111112, %v5331_v17  ;;  %v2658_v50 = vsub.f32 1.0, %v5331_v17  ;;  %v2006_v29 = vpop.xlane.xlu0 %2005 }
 0x40e   : > { %v2807_v48 = vmul.f32 %v2744_v45, %v6146_v1  ;;  %v5357_v23 = vsel %vm2397_vm11, %v5231_v52, 0.0  ;;  %v4261_v35 = vpop.eup %4260  ;;  %v2246_v2 = vadd.f32 1.0, %v4259_v31  ;;  %4280 = vlog2.f32 %v2717_v28 }
 0x40f   : > { %2462 = vst.msk [vmem:[%s4718_s17 + $0x38] sm:$0xff] %vm2454_vm4, %v5357_v23  ;;  %v2494_v51 = vmul.f32 1.1111112, %v5357_v23  ;;  %3036 = vperm.xlu1 %4179, %v5357_v23   ;;  %v4263_v14 = vpop.eup %4262  ;;  %v2558_v10 = vmul.f32 0.6931472, %v4261_v35  ;;  %4282 = vpow2.f32 %v5301_v40  ;;  %v6147_v15 = vsub.f32 1.0, %v5228_v55 }
 0x410   : > { %v2839_v32 = vadd.f32 %v2807_v48, %v2615_v42  ;;  %v5366_v52 = vadd.f32 1e-06, %v2498_v11  ;;  %v2690_v62 = vmul.f32 9.9999, %v2658_v50  ;;  %v4265_v22 = vpop.eup %4264  ;;  %4284 = vrcp.f32 %v2246_v2  ;;  %v2009_v42 = vpop.xlane.xlu1 %2008  ;;  %v2091_v2 = vld [vmem:[%s4713_s28 + $0xc0] sm:$0xff] }
 0x411   : > { %v2750_v45 = vmul.f32 0.6931472, %v4263_v14  ;;  %v5372_v25 = vadd.f32 1e-06, %v2494_v51  ;;  %v4267_v9 = vpop.eup %4266  ;;  %v2618_v40 = vmul.f32 %v2558_v10, %v5228_v55  ;;  %v2243_v1 = vadd.f32 1.0, %v4265_v22 }
 0x412   : > { %v2871_v28 = vsel %vm2390_vm5, %v2839_v32, 0.0  ;;  %4286 = vpow2.f32 %v3666_v47  ;;  %v2722_v48 = vadd.f32 1e-06, %v2690_v62  ;;  %v4269_v31 = vpop.eup %4268  ;;  %v2244_v35 = vadd.f32 1.0, %v4267_v9 }
 0x413   : > { %2903 = vst.msk [vmem:[%s4723_s19] sm:$0xff] %vm2454_vm4, %v2871_v28  ;;  %v2810_v11 = vmul.f32 %v2750_v45, %v6147_v15  ;;  %4288 = vlog2.f32 %v5315_v54  ;;  %v2654_v32 = vsub.f32 1.0, %v5357_v23  ;;  %v4271_v51 = vpop.eup %4270  ;;  %v2554_v14 = vmul.f32 0.6931472, %v4269_v31  ;;  %v2092_v31 = vld [vmem:[%s4713_s28 + $0xc8] sm:$0xff] }
 0x414   : > { %4290 = vrcp.f32 %v2243_v1  ;;  %v2059_v10 = vadd.f32 %v5034_v0, %v2006_v29  ;;  %v2060_v47 = vadd.f32 %v5034_v0, %v2009_v42  ;;  %v4273_v62 = vpop.eup %4272  ;;  %v2746_v55 = vmul.f32 0.6931472, %v4271_v51 }
 0x415   : > { %v2842_v22 = vadd.f32 %v2810_v11, %v2618_v40  ;;  %4292 = vrcp.f32 %v2244_v35  ;;  %v2686_v28 = vmul.f32 9.9999, %v2654_v32  ;;  %v4275_v54 = vpop.eup %4274  ;;  %v2616_v45 = vmul.f32 %v2554_v14, %v5253_v43 }
 0x416   : > { %v2249_v9 = vadd.f32 1.0, %v4273_v62  ;;  %4294 = vlog2.f32 %v5337_v36  ;;  %v2123_v1 = vadd.f32 %v2091_v2, %v2059_v10  ;;  %v4277_v15 = vpop.eup %4276  ;;  %v6148_v42 = vsub.f32 1.0, %v5253_v43 }
 0x417   : > { %v2874_v29 = vsel %vm2393_vm6, %v2842_v22, 0.0  ;;  %v2250_v11 = vadd.f32 1.0, %v4275_v54  ;;  %4296 = vpow2.f32 %v3671_v3  ;;  %v5394_v35 = vpop.eup %4278  ;;  %v2564_v51 = vmul.f32 0.6931472, %v4277_v15 }
 0x418   : > { %v2808_v40 = vmul.f32 %v2746_v55, %v6148_v42  ;;  %2906 = vst.msk [vmem:[%s4723_s19 + $0x18] sm:$0xff] %vm2454_vm4, %v2874_v29  ;;  %4298 = vrcp.f32 %v2249_v9  ;;  %v2718_v14 = vadd.f32 1e-06, %v2686_v28  ;;  %v3669_v36 = vmul.f32 -1.442695, %v2123_v1  ;;  %v4281_v2 = vpop.eup %4280  ;;  %v2095_v29 = vld [vmem:[%s4713_s28 + $0xe0] sm:$0xff] }
 0x419   : > { %4300 = vrcp.f32 %v2250_v11  ;;  %v2124_v16 = vadd.f32 %v2092_v31, %v2060_v47  ;;  %v5402_v43 = vsel %vm2399_vm12, %v5308_v8, 0.0  ;;  %v4283_v3 = vpop.eup %4282  ;;  %v2621_v62 = vmul.f32 %v2564_v51, %v5274_v30  ;;  %v2018_v47 = vpop.xlane.xlu0 %2017 }
 0x41a   : > { %v2840_v10 = vadd.f32 %v2808_v40, %v2616_v45  ;;  %v2756_v22 = vmul.f32 0.6931472, %v4281_v2  ;;  %4302 = vpow2.f32 %v5350_v37  ;;  %2464 = vst.msk [vmem:[%s4718_s17 + $0x48] sm:$0xff] %vm2454_vm4, %v5402_v43  ;;  %v2496_v55 = vmul.f32 1.1111112, %v5402_v43  ;;  %3046 = vperm.xlu0 %4180, %v5402_v43   ;;  %v5412_v8 = vpop.eup %4284 }
 0x41b   : > { %v2247_v54 = vadd.f32 1.0, %v4283_v3  ;;  %4304 = vlog2.f32 %v5366_v52  ;;  %v3670_v37 = vmul.f32 -1.442695, %v2124_v16  ;;  %v6149_v9 = vsub.f32 1.0, %v5274_v30  ;;  %v2027_v3 = vpop.xlane.xlu1 %2026 }
 0x41c   : > { %v2872_v28 = vsel %vm2391_vm7, %v2840_v10, 0.0  ;;  %v4287_v45 = vpop.eup %4286  ;;  %4306 = vlog2.f32 %v2722_v48  ;;  %v2528_v31 = vadd.f32 1e-06, %v2496_v55  ;;  %v2656_v15 = vsub.f32 1.0, %v5402_v43 }
 0x41d   : > { %2904 = vst.msk [vmem:[%s4723_s19 + $0x8] sm:$0xff] %vm2454_vm4, %v2872_v28  ;;  %v2813_v1 = vmul.f32 %v2756_v22, %v6149_v9  ;;  %v4289_v42 = vpop.eup %4288  ;;  %4308 = vrcp.f32 %v2247_v54  ;;  %v2248_v19 = vadd.f32 1.0, %v4287_v45  ;;  %v5426_v52 = vsel %vm2395_vm13, %v5265_v63, 0.0 }
 0x41e   : > { %v2063_v40 = vadd.f32 %v5034_v0, %v2018_v47  ;;  %v5429_v11 = vpop.eup %4290  ;;  %v2560_v51 = vmul.f32 0.6931472, %v4289_v42  ;;  %4310 = vlog2.f32 %v5372_v25  ;;  %v2688_v48 = vmul.f32 9.9999, %v2656_v15  ;;  %2460 = vst.msk [vmem:[%s4718_s17 + $0x28] sm:$0xff] %vm2454_vm4, %v5426_v52  ;;  %3026 = vperm.xlu1 %4179, %v5426_v52   ;;  %v2098_v47 = vld [vmem:[%s4713_s28 + $0xf8] sm:$0xff] }
 0x41f   : > { %v2845_v30 = vadd.f32 %v2813_v1, %v2621_v62  ;;  %v5438_v63 = vpop.eup %4292  ;;  %4312 = vrcp.f32 %v2248_v19  ;;  %v2492_v2 = vmul.f32 1.1111112, %v5426_v52  ;;  %v2652_v10 = vsub.f32 1.0, %v5426_v52 }
 0x420   : > { %v2127_v16 = vadd.f32 %v2095_v29, %v2063_v40  ;;  %v4295_v62 = vpop.eup %4294  ;;  %v2619_v22 = vmul.f32 %v2560_v51, %v5298_v21  ;;  %4314 = vlog2.f32 %v2718_v14  ;;  %v2720_v55 = vadd.f32 1e-06, %v2688_v48 }
 0x421   : > { %v2877_v25 = vsel %vm2396_vm8, %v2845_v30, 0.0  ;;  %v4297_v28 = vpop.eup %4296  ;;  %v2752_v54 = vmul.f32 0.6931472, %v4295_v62  ;;  %4316 = vpow2.f32 %v3669_v36  ;;  %v2524_v45 = vadd.f32 1e-06, %v2492_v2 }
 0x422   : > { %2909 = vst.msk [vmem:[%s4723_s19 + $0x30] sm:$0xff] %vm2454_vm4, %v2877_v25  ;;  %v2684_v9 = vmul.f32 9.9999, %v2652_v10  ;;  %v5450_v1 = vpop.eup %4298  ;;  %v2253_v29 = vadd.f32 1.0, %v4297_v28  ;;  %4318 = vpow2.f32 %v3670_v37  ;;  %v3673_v20 = vmul.f32 -1.442695, %v2127_v16 }
 0x423   : > { %v2066_v42 = vadd.f32 %v5034_v0, %v2027_v3  ;;  %v5453_v14 = vpop.eup %4300  ;;  %v2811_v19 = vmul.f32 %v2752_v54, %v2651_v49  ;;  %4320 = vlog2.f32 %v2528_v31  ;;  %v5460_v36 = vsel %vm2405_vm14, %v5319_v53, 0.0 }
 0x424   : > { %v2716_v40 = vadd.f32 1e-06, %v2684_v9  ;;  %v4303_v30 = vpop.eup %4302  ;;  %4322 = vrcp.f32 %v2253_v29  ;;  %2470 = vst.msk [vmem:[%s4718_s17 + $0x78] sm:$0xff] %vm2454_vm4, %v5460_v36  ;;  %v2502_v0 = vmul.f32 1.1111112, %v5460_v36  ;;  %v2662_v37 = vsub.f32 1.0, %v5460_v36  ;;  %3076 = vperm.xlu0 %4180, %v5460_v36  }
 0x425   : > { %v2130_v51 = vadd.f32 %v2098_v47, %v2066_v42  ;;  %v4305_v49 = vpop.eup %4304  ;;  %v2843_v53 = vadd.f32 %v2811_v19, %v2619_v22  ;;  %v2254_v21 = vadd.f32 1.0, %v4303_v30  ;;  %4324 = vlog2.f32 %v2720_v55  ;;  %v2024_v55 = vpop.xlane.xlu0 %2023  ;;  %v2097_v19 = vld [vmem:[%s4713_s28 + $0xf0] sm:$0xff] }
 0x426   : > { %v5473_v31 = vsel %vm2400_vm15, %v5283_v13, 0.0  ;;  %v4307_v48 = vpop.eup %4306  ;;  %v2574_v2 = vmul.f32 0.6931472, %v4305_v49  ;;  %4326 = vlog2.f32 %v2524_v45  ;;  %v2534_v3 = vadd.f32 1e-06, %v2502_v0 }
 0x427   : > { %v3676_v16 = vmul.f32 -1.442695, %v2130_v51  ;;  %3051 = vperm.xlu1 %4179, %v5473_v31   ;;  %2465 = vst.msk [vmem:[%s4718_s17 + $0x50] sm:$0xff] %vm2454_vm4, %v5473_v31  ;;  %v5479_v62 = vpop.eup %4308  ;;  %v2875_v25 = vsel %vm2394_vm9, %v2843_v53, 0.0  ;;  %4328 = vrcp.f32 %v2254_v21  ;;  %v2766_v22 = vmul.f32 0.6931472, %v4307_v48 }
 0x428   : > { %v2694_v13 = vmul.f32 9.9999, %v2662_v37  ;;  %v4311_v47 = vpop.eup %4310  ;;  %2907 = vst.msk [vmem:[%s4723_s19 + $0x20] sm:$0xff] %vm2454_vm4, %v2875_v25  ;;  %v2626_v28 = vmul.f32 %v2574_v2, %v5331_v17  ;;  %4330 = vlog2.f32 %v2716_v40  ;;  %v2497_v54 = vmul.f32 1.1111112, %v5473_v31  ;;  %v2021_v17 = vpop.xlane.xlu1 %2020 }
 0x429   : > { %v2657_v45 = vsub.f32 1.0, %v5473_v31  ;;  %v5490_v9 = vpop.eup %4312  ;;  %v2818_v26 = vmul.f32 %v2766_v22, %v2658_v50  ;;  %v2566_v29 = vmul.f32 0.6931472, %v4311_v47  ;;  %4332 = vpow2.f32 %v3673_v20  ;;  %v4440_v40 = vld [vmem:[#allocation3] ss:$0 sm:$0xff] }
 0x42a   : > { %v2726_v42 = vadd.f32 1e-06, %v2694_v13  ;;  %v4315_v30 = vpop.eup %4314  ;;  %4334 = vpow2.f32 %v3676_v16  ;;  %v2529_v51 = vadd.f32 1e-06, %v2497_v54  ;;  %v2065_v49 = vadd.f32 %v4440_v40, %v2024_v55 }
 0x42b   : > { %v2689_v0 = vmul.f32 9.9999, %v2657_v45  ;;  %v4317_v53 = vpop.eup %4316  ;;  %v2850_v21 = vadd.f32 %v2818_v26, %v2626_v28  ;;  %v2622_v48 = vmul.f32 %v2566_v29, %v5357_v23  ;;  %v2758_v2 = vmul.f32 0.6931472, %v4315_v30  ;;  %v2096_v28 = vld [vmem:[%s4713_s28 + $0xe8] sm:$0xff] }
 0x42c   : > { %4336 = vlog2.f32 %v2534_v3  ;;  %v4319_v50 = vpop.eup %4318  ;;  %v2251_v20 = vadd.f32 1.0, %v4317_v53  ;;  %v2129_v16 = vadd.f32 %v2097_v19, %v2065_v49  ;;  %v2064_v29 = vadd.f32 %v4440_v40, %v2021_v17 }
 0x42d   : > { %4338 = vlog2.f32 %v2726_v42  ;;  %v2721_v25 = vadd.f32 1e-06, %v2689_v0  ;;  %v4321_v22 = vpop.eup %4320  ;;  %v2882_v13 = vsel %vm2401_vm10, %v2850_v21, 0.0  ;;  %v2814_v55 = vmul.f32 %v2758_v2, %v2654_v32 }
 0x42e   : > { %v2252_v47 = vadd.f32 1.0, %v4319_v50  ;;  %4340 = vlog2.f32 %v2529_v51  ;;  %v5504_v54 = vpop.eup %4322  ;;  %2914 = vst.msk [vmem:[%s4723_s19 + $0x58] sm:$0xff] %vm2454_vm4, %v2882_v13  ;;  %v2570_v3 = vmul.f32 0.6931472, %v4321_v22  ;;  %v3675_v26 = vmul.f32 -1.442695, %v2129_v16 }
 0x42f   : > { %4342 = vrcp.f32 %v2251_v20  ;;  %v4325_v33 = vpop.eup %4324  ;;  %v2846_v42 = vadd.f32 %v2814_v55, %v2622_v48  ;;  %v5511_v23 = vsel %vm2403_vm0, %v5344_v60, 0.0  ;;  %v5516_v32 = vsel %vm2398_vm1, %v5288_v39, 0.0 }
 0x430   : > { %4344 = vrcp.f32 %v2252_v47  ;;  %vm2404_vm3 = vcmp.lt.s32.totalorder %v5112_v61, 300  ;;  %v4327_v19 = vpop.eup %4326  ;;  %v2624_v30 = vmul.f32 %v2570_v3, %v5402_v43  ;;  %v2762_v51 = vmul.f32 0.6931472, %v4325_v33  ;;  %2468 = vst.msk [vmem:[%s4718_s17 + $0x68] sm:$0xff] %vm2454_vm4, %v5511_v23  ;;  %3066 = vperm.xlu0 %4180, %v5511_v23   ;;  %3041 = vperm.xlu1 %4179, %v5516_v32   ;;  %2463 = vst.msk [vmem:[%s4718_s17 + $0x40] sm:$0xff] %vm2454_vm4, %v5516_v32 }
 0x431   : > { %4346 = vlog2.f32 %v2721_v25  ;;  %v2128_v0 = vadd.f32 %v2096_v28, %v2064_v29  ;;  %v5528_v39 = vpop.eup %4328  ;;  %v2878_v60 = vsel %vm2397_vm11, %v2846_v42, 0.0  ;;  %v2562_v40 = vmul.f32 0.6931472, %v4327_v19 }
 0x432   : > { %4348 = vpow2.f32 %v3675_v26  ;;  %v2500_v49 = vmul.f32 1.1111112, %v5511_v23  ;;  %v4331_v53 = vpop.eup %4330  ;;  %2910 = vst.msk [vmem:[%s4723_s19 + $0x38] sm:$0xff] %vm2454_vm4, %v2878_v60  ;;  %v2816_v21 = vmul.f32 %v2762_v51, %v2656_v15  ;;  %v2660_v2 = vsub.f32 1.0, %v5511_v23 }
 0x433   : > { %v3674_v48 = vmul.f32 -1.442695, %v2128_v0  ;;  %v2495_v17 = vmul.f32 1.1111112, %v5516_v32  ;;  %vm2407_vm5 = vcmp.lt.s32.totalorder %v5128_v12, 300  ;;  %v4333_v50 = vpop.eup %4332  ;;  %v2620_v27 = vmul.f32 %v2562_v40, %v5426_v52 }
 0x434   : > { %v2754_v20 = vmul.f32 0.6931472, %v4331_v53  ;;  %v2532_v25 = vadd.f32 1e-06, %v2500_v49  ;;  %v2655_v16 = vsub.f32 1.0, %v5516_v32  ;;  %v4335_v22 = vpop.eup %4334  ;;  %v2848_v13 = vadd.f32 %v2816_v21, %v2624_v30 }
 0x435   : > { %v2255_v55 = vadd.f32 1.0, %v4333_v50  ;;  %4350 = vpow2.f32 %v3674_v48  ;;  %v2692_v43 = vmul.f32 9.9999, %v2660_v2  ;;  %v2258_v28 = vadd.f32 1.0, %v4335_v22 }
 0x436   : > { %v4337_v15 = vpop.eup %4336  ;;  %v2812_v47 = vmul.f32 %v2754_v20, %v2652_v10  ;;  %4352 = vlog2.f32 %v2532_v25  ;;  %v2527_v3 = vadd.f32 1e-06, %v2495_v17  ;;  %v2880_v29 = vsel %vm2399_vm12, %v2848_v13, 0.0 }
 0x437   : > { %v4339_v26 = vpop.eup %4338  ;;  %4354 = vrcp.f32 %v2255_v55  ;;  %v2582_v33 = vmul.f32 0.6931472, %v4337_v15  ;;  %v2724_v42 = vadd.f32 1e-06, %v2692_v43  ;;  %vm2402_vm6 = vcmp.lt.s32.totalorder %v5120_v5, 300  ;;  %2912 = vst.msk [vmem:[%s4723_s19 + $0x48] sm:$0xff] %vm2454_vm4, %v2880_v29 }
 0x438   : > { %v4341_v19 = vpop.eup %4340  ;;  %v2844_v30 = vadd.f32 %v2812_v47, %v2620_v27  ;;  %4356 = vrcp.f32 %v2258_v28  ;;  %v2774_v52 = vmul.f32 0.6931472, %v4339_v26  ;;  %v2687_v10 = vmul.f32 9.9999, %v2655_v16 }
 0x439   : > { %v5553_v51 = vpop.eup %4342  ;;  %v2630_v41 = vmul.f32 %v2582_v33, %v5460_v36  ;;  %v2572_v0 = vmul.f32 0.6931472, %v4341_v19  ;;  %4358 = vlog2.f32 %v2724_v42  ;;  %v5559_v60 = vsel %vm2409_vm2, %v5412_v8, 0.0 }
 0x43a   : > { %vm2413_vm7 = vcmp.lt.s32.totalorder %v5137_v24, 300  ;;  %v5562_v40 = vpop.eup %4344  ;;  %v2876_v49 = vsel %vm2395_vm13, %v2844_v30, 0.0  ;;  %v2822_v53 = vmul.f32 %v2774_v52, %v2662_v37  ;;  %4360 = vlog2.f32 %v2527_v3  ;;  %2474 = vst.msk [vmem:[%s4718_s17 + $0x98] sm:$0xff] %vm2454_vm4, %v5559_v60  ;;  %3096 = vperm.xlu0 %4180, %v5559_v60  }
 0x43b   : > { %v2719_v21 = vadd.f32 1e-06, %v2687_v10  ;;  %v4347_v8 = vpop.eup %4346  ;;  %2908 = vst.msk [vmem:[%s4723_s19 + $0x28] sm:$0xff] %vm2454_vm4, %v2876_v49  ;;  %v2625_v48 = vmul.f32 %v2572_v0, %v5473_v31  ;;  %v2506_v17 = vmul.f32 1.1111112, %v5559_v60  ;;  %v2666_v34 = vsub.f32 1.0, %v5559_v60 }
 0x43c   : > { %v5580_v36 = vsel %vm2404_vm3, %v5311_v57, 0.0  ;;  %v4349_v37 = vpop.eup %4348  ;;  %v2854_v50 = vadd.f32 %v2822_v53, %v2630_v41  ;;  %v2764_v27 = vmul.f32 0.6931472, %v4347_v8  ;;  %vm2408_vm8 = vcmp.lt.s32.totalorder %v5123_v6, 300 }
 0x43d   : > { %4362 = vlog2.f32 %v2719_v21  ;;  %3071 = vperm.xlu1 %4179, %v5580_v36   ;;  %2469 = vst.msk [vmem:[%s4718_s17 + $0x70] sm:$0xff] %vm2454_vm4, %v5580_v36  ;;  %v2501_v20 = vmul.f32 1.1111112, %v5580_v36  ;;  %v2257_v25 = vadd.f32 1.0, %v4349_v37  ;;  %v2538_v22 = vadd.f32 1e-06, %v2506_v17 }
 0x43e   : > { %v2698_v13 = vmul.f32 9.9999, %v2666_v34  ;;  %v2661_v57 = vsub.f32 1.0, %v5580_v36  ;;  %v2886_v55 = vsel %vm2405_vm14, %v2854_v50, 0.0  ;;  %v2817_v43 = vmul.f32 %v2764_v27, %v2657_v45 }
 0x43f   : > { %v2533_v15 = vadd.f32 1e-06, %v2501_v20  ;;  %v5598_v47 = vsel %vm2407_vm5, %v5438_v63, 0.0  ;;  %v4351_v28 = vpop.eup %4350  ;;  %2918 = vst.msk [vmem:[%s4723_s19 + $0x78] sm:$0xff] %vm2454_vm4, %v2886_v55  ;;  %4364 = vrcp.f32 %v2257_v25  ;;  %vm2411_vm9 = vcmp.lt.s32.totalorder %v5146_v46, 300 }
 0x440   : > { %v2730_v3 = vadd.f32 1e-06, %v2698_v13  ;;  %v2693_v26 = vmul.f32 9.9999, %v2661_v57  ;;  %2472 = vst.msk [vmem:[%s4718_s17 + $0x88] sm:$0xff] %vm2454_vm4, %v5598_v47  ;;  %3086 = vperm.xlu0 %4180, %v5598_v47   ;;  %v4353_v31 = vpop.eup %4352  ;;  %v2849_v63 = vadd.f32 %v2817_v43, %v2625_v48  ;;  %v2256_v45 = vadd.f32 1.0, %v4351_v28 }
 0x441   : > { %v2504_v44 = vmul.f32 1.1111112, %v5598_v47  ;;  %4366 = vlog2.f32 %v2538_v22  ;;  %v2664_v29 = vsub.f32 1.0, %v5598_v47  ;;  %v5611_v33 = vpop.eup %4354  ;;  %v2578_v42 = vmul.f32 0.6931472, %v4353_v31 }
 0x442   : > { %4368 = vlog2.f32 %v2730_v3  ;;  %v2725_v19 = vadd.f32 1e-06, %v2693_v26  ;;  %v5613_v52 = vpop.eup %4356  ;;  %v2881_v10 = vsel %vm2400_vm15, %v2849_v63, 0.0  ;;  %v5622_v0 = vsel %vm2402_vm6, %v5339_v7, 0.0 }
 0x443   : > { %v2536_v30 = vadd.f32 1e-06, %v2504_v44  ;;  %4370 = vrcp.f32 %v2256_v45  ;;  %v2696_v41 = vmul.f32 9.9999, %v2664_v29  ;;  %v4359_v49 = vpop.eup %4358  ;;  %2913 = vst.msk [vmem:[%s4723_s19 + $0x50] sm:$0xff] %vm2454_vm4, %v2881_v10  ;;  %v2628_v53 = vmul.f32 %v2578_v42, %v5511_v23  ;;  %3061 = vperm.xlu1 %4179, %v5622_v0   ;;  %2467 = vst.msk [vmem:[%s4718_s17 + $0x60] sm:$0xff] %vm2454_vm4, %v5622_v0 }
 0x444   : > { %4372 = vlog2.f32 %v2533_v15  ;;  %v2499_v38 = vmul.f32 1.1111112, %v5622_v0  ;;  %v2659_v21 = vsub.f32 1.0, %v5622_v0  ;;  %v4361_v8 = vpop.eup %4360  ;;  %v2770_v48 = vmul.f32 0.6931472, %v4359_v49 }
 0x445   : > { %4374 = vlog2.f32 %v2725_v19  ;;  %v2728_v7 = vadd.f32 1e-06, %v2696_v41  ;;  %v5636_v17 = vsel %vm2413_vm7, %v5453_v14, 0.0  ;;  %vm2406_vm10 = vcmp.lt.s32.totalorder %v5133_v18, 300 }
 0x446   : > { %vm2417_vm11 = vcmp.lt.s32.totalorder %v5159_v59, 300  ;;  %v2568_v37 = vmul.f32 0.6931472, %v4361_v8  ;;  %4376 = vlog2.f32 %v2536_v30  ;;  %v2531_v50 = vadd.f32 1e-06, %v2499_v38  ;;  %2478 = vst.msk [vmem:[%s4718_s17 + $0xb8] sm:$0xff] %vm2454_vm4, %v5636_v17  ;;  %3116 = vperm.xlu0 %4180, %v5636_v17  }
 0x447   : > { %v2691_v27 = vmul.f32 9.9999, %v2659_v21  ;;  %v4363_v20 = vpop.eup %4362  ;;  %v2820_v14 = vmul.f32 %v2770_v48, %v2660_v2  ;;  %4378 = vlog2.f32 %v2728_v7  ;;  %v2510_v25 = vmul.f32 1.1111112, %v5636_v17 }
 0x448   : > { %v2670_v22 = vsub.f32 1.0, %v5636_v17  ;;  %v2623_v13 = vmul.f32 %v2568_v37, %v5516_v32  ;;  %v2760_v55 = vmul.f32 0.6931472, %v4363_v20  ;;  %4380 = vlog2.f32 %v2531_v50 }
 0x449   : > { %v2723_v43 = vadd.f32 1e-06, %v2691_v27  ;;  %v2852_v15 = vadd.f32 %v2820_v14, %v2628_v53  ;;  %v2542_v28 = vadd.f32 1e-06, %v2510_v25  ;;  %v5656_v23 = vsel %vm2408_vm8, %v5394_v35, 0.0  ;;  %v5658_v2 = vpop.eup %4364  ;;  %v6150_v53 = vld [vmem:[#allocation12_spill] sm:$0xff] }
 0x44a   : > { %v2702_v3 = vmul.f32 9.9999, %v2670_v22  ;;  %v2815_v26 = vmul.f32 %v2760_v55, %v2655_v16  ;;  %3091 = vperm.xlu1 %4179, %v5656_v23   ;;  %2473 = vst.msk [vmem:[%s4718_s17 + $0x90] sm:$0xff] %vm2454_vm4, %v5656_v23  ;;  %v2505_v44 = vmul.f32 1.1111112, %v5656_v23  ;;  %v2665_v31 = vsub.f32 1.0, %v5656_v23 }
 0x44b   : > { %4382 = vlog2.f32 %v2723_v43  ;;  %v4367_v63 = vpop.eup %4366  ;;  %v2884_v35 = vsel %vm2403_vm0, %v2852_v15, 0.0  ;;  %v5673_v32 = vsel %vm2411_vm9, %v5490_v9, 0.0  ;;  %vm2412_vm12 = vcmp.lt.s32.totalorder %v6150_v53, 300 }
 0x44c   : > { %4384 = vlog2.f32 %v2542_v28  ;;  %v2734_v45 = vadd.f32 1e-06, %v2702_v3  ;;  %v4369_v16 = vpop.eup %4368  ;;  %2916 = vst.msk [vmem:[%s4723_s19 + $0x68] sm:$0xff] %vm2454_vm4, %v2884_v35  ;;  %v2847_v42 = vadd.f32 %v2815_v26, %v2623_v13  ;;  %v2590_v19 = vmul.f32 0.6931472, %v4367_v63  ;;  %2476 = vst.msk [vmem:[%s4718_s17 + $0xa8] sm:$0xff] %vm2454_vm4, %v5673_v32  ;;  %3106 = vperm.xlu0 %4180, %v5673_v32  }
 0x44d   : > { %v2537_v30 = vadd.f32 1e-06, %v2505_v44  ;;  %v2697_v10 = vmul.f32 9.9999, %v2665_v31  ;;  %v5683_v58 = vpop.eup %4370  ;;  %v2782_v41 = vmul.f32 0.6931472, %v4369_v16 }
 0x44e   : > { %4386 = vlog2.f32 %v2734_v45  ;;  %v2508_v9 = vmul.f32 1.1111112, %v5673_v32  ;;  %v2668_v49 = vsub.f32 1.0, %v5673_v32  ;;  %v4373_v38 = vpop.eup %4372  ;;  %v2879_v8 = vsel %vm2398_vm1, %v2847_v42, 0.0  ;;  %v6151_v44 = vld [vmem:[#allocation15_spill] sm:$0xff]  ;;  %v6152_v63 = vld [vmem:[#allocation13_spill] sm:$0xff] }
 0x44f   : > { %v2634_v48 = vmul.f32 %v2590_v19, %v5559_v60  ;;  %4388 = vlog2.f32 %v2537_v30  ;;  %v2729_v7 = vadd.f32 1e-06, %v2697_v10  ;;  %v4375_v37 = vpop.eup %4374  ;;  %2911 = vst.msk [vmem:[%s4723_s19 + $0x40] sm:$0xff] %vm2454_vm4, %v2879_v8  ;;  %v2826_v50 = vmul.f32 %v2782_v41, %v2666_v34  ;;  %v6153_v8 = vld [vmem:[#allocation14_spill] sm:$0xff] }
 0x450   : > { %v2580_v27 = vmul.f32 0.6931472, %v4373_v38  ;;  %v2540_v20 = vadd.f32 1e-06, %v2508_v9  ;;  %v2700_v14 = vmul.f32 9.9999, %v2668_v49  ;;  %v4377_v25 = vpop.eup %4376 }
 0x451   : > { %v2772_v56 = vmul.f32 0.6931472, %v4375_v37  ;;  %4390 = vlog2.f32 %v2729_v7  ;;  %v5700_v13 = vsel %vm2406_vm10, %v5429_v11, 0.0  ;;  %v5705_v60 = vsel %vm2417_vm11, %v5528_v39, 0.0  ;;  %v4379_v34 = vpop.eup %4378 }
 0x452   : > { %v2858_v55 = vadd.f32 %v2826_v50, %v2634_v48  ;;  %v2629_v43 = vmul.f32 %v2580_v27, %v5580_v36  ;;  %v2586_v15 = vmul.f32 0.6931472, %v4377_v25  ;;  %4392 = vlog2.f32 %v2540_v20  ;;  %3081 = vperm.xlu1 %4179, %v5700_v13   ;;  %2471 = vst.msk [vmem:[%s4718_s17 + $0x80] sm:$0xff] %vm2454_vm4, %v5700_v13  ;;  %2482 = vst.msk [vmem:[%s4718_s17 + $0xd8] sm:$0xff] %vm2454_vm4, %v5705_v60  ;;  %v4381_v11 = vpop.eup %4380 }
 0x453   : > { %3136 = vperm.xlu0 %4180, %v5705_v60   ;;  %v2821_v39 = vmul.f32 %v2772_v56, %v2661_v57  ;;  %v2778_v28 = vmul.f32 0.6931472, %v4379_v34  ;;  %v2732_v3 = vadd.f32 1e-06, %v2700_v14  ;;  %v2503_v26 = vmul.f32 1.1111112, %v5700_v13 }
 0x454   : > { %vm2415_vm13 = vcmp.lt.s32.totalorder %v6151_v44, 300  ;;  %vm2410_vm14 = vcmp.lt.s32.totalorder %v6152_v63, 300  ;;  %v2890_v35 = vsel %vm2409_vm2, %v2858_v55, 0.0  ;;  %v2632_v45 = vmul.f32 %v2586_v15, %v5598_v47 }
 0x455   : > { %v2576_v16 = vmul.f32 0.6931472, %v4381_v11  ;;  %v2663_v42 = vsub.f32 1.0, %v5700_v13  ;;  %v4383_v19 = vpop.eup %4382  ;;  %2922 = vst.msk [vmem:[%s4723_s19 + $0x98] sm:$0xff] %vm2454_vm4, %v2890_v35  ;;  %v2853_v36 = vadd.f32 %v2821_v39, %v2629_v43  ;;  %v2824_v57 = vmul.f32 %v2778_v28, %v2664_v29  ;;  %v6154_v35 = vld [vmem:[#allocation17_spill] sm:$0xff] }
 0x456   : > { %4394 = vlog2.f32 %v2732_v3  ;;  %v2535_v30 = vadd.f32 1e-06, %v2503_v26  ;;  %v4385_v10 = vpop.eup %4384  ;;  %v2768_v4 = vmul.f32 0.6931472, %v4383_v19  ;;  %v2514_v38 = vmul.f32 1.1111112, %v5705_v60 }
 0x457   : > { %v2627_v41 = vmul.f32 %v2576_v16, %v5622_v0  ;;  %v2695_v9 = vmul.f32 9.9999, %v2663_v42  ;;  %vm2416_vm15 = vcmp.lt.s32.totalorder %v6153_v8, 300  ;;  %v2885_v48 = vsel %vm2404_vm3, %v2853_v36, 0.0 }
 0x458   : > { %v2856_v7 = vadd.f32 %v2824_v57, %v2632_v45  ;;  %v2598_v47 = vmul.f32 0.6931472, %v4385_v10  ;;  %4396 = vlog2.f32 %v2535_v30  ;;  %v4387_v29 = vpop.eup %4386  ;;  %2917 = vst.msk [vmem:[%s4723_s19 + $0x70] sm:$0xff] %vm2454_vm4, %v2885_v48  ;;  %v2819_v37 = vmul.f32 %v2768_v4, %v2659_v21  ;;  %v6155_v45 = vld [vmem:[#allocation16_spill] sm:$0xff]  ;;  %v5798_v4 = vld [vmem:[%s4708_s0 + $0x8] sm:$0xff]  }
 0x459   : > { %v2727_v50 = vadd.f32 1e-06, %v2695_v9  ;;  %v2546_v27 = vadd.f32 1e-06, %v2514_v38  ;;  %v2674_v20 = vsub.f32 1.0, %v5705_v60  ;;  %v4389_v14 = vpop.eup %4388  ;;  %v5747_v34 = vsel %vm2412_vm12, %v5450_v1, 0.0 }
 0x45a   : > { %v2888_v61 = vsel %vm2407_vm5, %v2856_v7, 0.0  ;;  %v2638_v25 = vmul.f32 %v2598_v47, %v5636_v17  ;;  %v2790_v56 = vmul.f32 0.6931472, %v4387_v29  ;;  %v2851_v0 = vadd.f32 %v2819_v37, %v2627_v41  ;;  %3111 = vperm.xlu1 %4179, %v5747_v34   ;;  %2477 = vst.msk [vmem:[%s4718_s17 + $0xb0] sm:$0xff] %vm2454_vm4, %v5747_v34 }
 0x45b   : > { %2920 = vst.msk [vmem:[%s4723_s19 + $0x88] sm:$0xff] %vm2454_vm4, %v2888_v61  ;;  %v2588_v21 = vmul.f32 0.6931472, %v4389_v14  ;;  %4398 = vlog2.f32 %v2727_v50  ;;  %v2706_v55 = vmul.f32 9.9999, %v2674_v20  ;;  %v4391_v12 = vpop.eup %4390  ;;  %v2669_v15 = vsub.f32 1.0, %v5747_v34 }
 0x45c   : > { %v2830_v43 = vmul.f32 %v2790_v56, %v2670_v22  ;;  %4400 = vlog2.f32 %v2546_v27  ;;  %v2509_v1 = vmul.f32 1.1111112, %v5747_v34  ;;  %v4393_v11 = vpop.eup %4392  ;;  %v2883_v39 = vsel %vm2402_vm6, %v2851_v0, 0.0 }
 0x45d   : > { %v2633_v28 = vmul.f32 %v2588_v21, %v5656_v23  ;;  %v2780_v3 = vmul.f32 0.6931472, %v4391_v12  ;;  %v2738_v26 = vadd.f32 1e-06, %v2706_v55  ;;  %vm2419_vm0 = vcmp.lt.s32.totalorder %v6154_v35, 300  ;;  %2915 = vst.msk [vmem:[%s4723_s19 + $0x60] sm:$0xff] %vm2454_vm4, %v2883_v39 }
 0x45e   : > { %vm2414_vm1 = vcmp.lt.s32.totalorder %v6155_v45, 300  ;;  %v2862_v17 = vadd.f32 %v2830_v43, %v2638_v25  ;;  %v2594_v22 = vmul.f32 0.6931472, %v4393_v11  ;;  %v2541_v16 = vadd.f32 1e-06, %v2509_v1 }
 0x45f   : > { %v2701_v5 = vmul.f32 9.9999, %v2669_v15  ;;  %v2825_v19 = vmul.f32 %v2780_v3, %v2665_v31  ;;  %4402 = vlog2.f32 %v2738_v26  ;;  %v5775_v36 = vsel %vm2415_vm13, %v5562_v40, 0.0  ;;  %v5842_v3 = vld [vmem:[%s4708_s0] sm:$0xff]  }
 0x460   : > { %v5780_v57 = vsel %vm2410_vm14, %v5479_v62, 0.0  ;;  %v4395_v30 = vpop.eup %4394  ;;  %v2894_v10 = vsel %vm2413_vm7, %v2862_v17, 0.0  ;;  %v2636_v41 = vmul.f32 %v2594_v22, %v5673_v32  ;;  %4404 = vlog2.f32 %v2541_v16  ;;  %2480 = vst.msk [vmem:[%s4718_s17 + $0xc8] sm:$0xff] %vm2454_vm4, %v5775_v36  ;;  %3126 = vperm.xlu0 %4180, %v5775_v36  }
 0x461   : > { %v2733_v23 = vadd.f32 1e-06, %v2701_v5  ;;  %3101 = vperm.xlu1 %4179, %v5780_v57   ;;  %2475 = vst.msk [vmem:[%s4718_s17 + $0xa0] sm:$0xff] %vm2454_vm4, %v5780_v57  ;;  %2926 = vst.msk [vmem:[%s4723_s19 + $0xb8] sm:$0xff] %vm2454_vm4, %v2894_v10  ;;  %v2857_v24 = vadd.f32 %v2825_v19, %v2633_v28  ;;  %v2786_v62 = vmul.f32 0.6931472, %v4395_v30  ;;  %v3751_v6 = vunpack.c.l.bf16 %v5798_v4 }
 0x462   : > { %v2512_v40 = vmul.f32 1.1111112, %v5775_v36  ;;  %v2672_v31 = vsub.f32 1.0, %v5775_v36  ;;  %v4397_v9 = vpop.eup %4396  ;;  %v2507_v38 = vmul.f32 1.1111112, %v5780_v57  ;;  %v2667_v48 = vsub.f32 1.0, %v5780_v57 }
 0x463   : > { %4406 = vlog2.f32 %v2733_v23  ;;  %v5805_v7 = vsel %vm2416_vm15, %v5504_v54, 0.0  ;;  %v2889_v47 = vsel %vm2408_vm8, %v2857_v24, 0.0  ;;  %v2828_v29 = vmul.f32 %v2786_v62, %v2668_v49 }
 0x464   : > { %v2584_v37 = vmul.f32 0.6931472, %v4397_v9  ;;  %v2544_v50 = vadd.f32 1e-06, %v2512_v40  ;;  %2481 = vst.msk [vmem:[%s4718_s17 + $0xd0] sm:$0xff] %vm2454_vm4, %v5805_v7  ;;  %2921 = vst.msk [vmem:[%s4723_s19 + $0x90] sm:$0xff] %vm2454_vm4, %v2889_v47  ;;  %v3747_v10 = vunpack.c.l.bf16 %v5842_v3 }
 0x465   : > { %v2704_v27 = vmul.f32 9.9999, %v2672_v31  ;;  %v2539_v14 = vadd.f32 1e-06, %v2507_v38  ;;  %v2699_v54 = vmul.f32 9.9999, %v2667_v48  ;;  %3131 = vperm.xlu1 %4179, %v5805_v7   ;;  %v4399_v32 = vpop.eup %4398  ;;  %v2860_v49 = vadd.f32 %v2828_v29, %v2636_v41 }
 0x466   : > { %v2631_v61 = vmul.f32 %v2584_v37, %v5700_v13  ;;  %4408 = vlog2.f32 %v2544_v50  ;;  %v2513_v25 = vmul.f32 1.1111112, %v5805_v7  ;;  %v4401_v56 = vpop.eup %4400  ;;  %v2776_v0 = vmul.f32 0.6931472, %v4399_v32 }
 0x467   : > { %v2736_v21 = vadd.f32 1e-06, %v2704_v27  ;;  %4410 = vlog2.f32 %v2539_v14  ;;  %v2731_v55 = vadd.f32 1e-06, %v2699_v54  ;;  %v2892_v12 = vsel %vm2411_vm9, %v2860_v49, 0.0  ;;  %v6156_v27 = vld [vmem:[#allocation18_spill] sm:$0xff] }
 0x468   : > { %v2606_v43 = vmul.f32 0.6931472, %v4401_v56  ;;  %v2545_v1 = vadd.f32 1e-06, %v2513_v25  ;;  %v2673_v11 = vsub.f32 1.0, %v5805_v7  ;;  %2924 = vst.msk [vmem:[%s4723_s19 + $0xa8] sm:$0xff] %vm2454_vm4, %v2892_v12  ;;  %v2823_v39 = vmul.f32 %v2776_v0, %v2663_v42 }
 0x469   : > { %4412 = vlog2.f32 %v2736_v21  ;;  %v5834_v28 = vsel %vm2419_vm0, %v5683_v58, 0.0  ;;  %v5839_v46 = vsel %vm2414_vm1, %v5553_v51, 0.0  ;;  %v4403_v26 = vpop.eup %4402  ;;  %vm2421_vm2 = vcmp.lt.s32.totalorder %v6156_v27, 300  ;;  %v6157_v14 = vld [vmem:[#allocation19_spill] sm:$0xff] }
 0x46a   : > { %v2642_v17 = vmul.f32 %v2606_v43, %v5705_v60  ;;  %4414 = vlog2.f32 %v2731_v55  ;;  %v2705_v13 = vmul.f32 9.9999, %v2673_v11  ;;  %2484 = vst.msk [vmem:[%s4718_s17 + $0xe8] sm:$0xff] %vm2454_vm4, %v5834_v28  ;;  %v2516_v58 = vmul.f32 1.1111112, %v5834_v28  ;;  %3146 = vperm.xlu0 %4180, %v5834_v28   ;;  %3121 = vperm.xlu1 %4179, %v5839_v46   ;;  %2479 = vst.msk [vmem:[%s4718_s17 + $0xc0] sm:$0xff] %vm2454_vm4, %v5839_v46  ;;  %v4405_v51 = vpop.eup %4404 }
 0x46b   : > { %v2855_v42 = vadd.f32 %v2823_v39, %v2631_v61  ;;  %v2798_v22 = vmul.f32 0.6931472, %v4403_v26  ;;  %4416 = vlog2.f32 %v2545_v1  ;;  %v2676_v16 = vsub.f32 1.0, %v5834_v28 }
 0x46c   : > { %v2596_v5 = vmul.f32 0.6931472, %v4405_v51  ;;  %v2737_v19 = vadd.f32 1e-06, %v2705_v13  ;;  %v2548_v30 = vadd.f32 1e-06, %v2516_v58 }
 0x46d   : > { %v4407_v41 = vpop.eup %4406  ;;  %v2887_v23 = vsel %vm2406_vm10, %v2855_v42, 0.0  ;;  %v2834_v24 = vmul.f32 %v2798_v22, %v2674_v20  ;;  %v2708_v62 = vmul.f32 9.9999, %v2676_v16  ;;  %v2511_v40 = vmul.f32 1.1111112, %v5839_v46 }
 0x46e   : > { %2919 = vst.msk [vmem:[%s4723_s19 + $0x80] sm:$0xff] %vm2454_vm4, %v2887_v23  ;;  %v2637_v9 = vmul.f32 %v2596_v5, %v5747_v34  ;;  %v2788_v38 = vmul.f32 0.6931472, %v4407_v41  ;;  %4418 = vlog2.f32 %v2737_v19  ;;  %v2671_v47 = vsub.f32 1.0, %v5839_v46  ;;  %v3012_v39 = vpop.permute.xlu1 %3011 }
 0x46f   : > { %v2866_v29 = vadd.f32 %v2834_v24, %v2642_v17  ;;  %4420 = vlog2.f32 %v2548_v30  ;;  %v2740_v18 = vadd.f32 1e-06, %v2708_v62  ;;  %v2543_v37 = vadd.f32 1e-06, %v2511_v40  ;;  %v6158_v30 = vld [vmem:[#allocation10_spill] sm:$0xff] }
 0x470   : > { %v4409_v60 = vpop.eup %4408  ;;  %v2829_v20 = vmul.f32 %v2788_v38, %v2669_v15  ;;  %v2703_v50 = vmul.f32 9.9999, %v2671_v47  ;;  %vm2418_vm3 = vcmp.lt.s32.totalorder %v6157_v14, 300  ;;  %v5880_v61 = vsel %vm2421_vm2, %v5613_v52, 0.0 }
 0x471   : > { %v4411_v54 = vpop.eup %4410  ;;  %v2898_v32 = vsel %vm2417_vm11, %v2866_v29, 0.0  ;;  %v2602_v49 = vmul.f32 0.6931472, %v4409_v60  ;;  %4422 = vlog2.f32 %v2740_v18  ;;  %2486 = vst.msk [vmem:[%s4718_s17 + $0xf8] sm:$0xff] %vm2454_vm4, %v5880_v61  ;;  %3156 = vperm.xlu0 %4180, %v5880_v61   ;;  %v2518_v0 = vmul.f32 1.1111112, %v5880_v61 }
 0x472   : > { %2930 = vst.msk [vmem:[%s4723_s19 + $0xd8] sm:$0xff] %vm2454_vm4, %v2898_v32  ;;  %v2861_v34 = vadd.f32 %v2829_v20, %v2637_v9  ;;  %v2592_v15 = vmul.f32 0.6931472, %v4411_v54  ;;  %4424 = vlog2.f32 %v2543_v37  ;;  %v2735_v25 = vadd.f32 1e-06, %v2703_v50  ;;  %v3002_v50 = vpop.permute.xlu0 %3001 }
 0x473   : > { %v4413_v59 = vpop.eup %4412  ;;  %v2640_v56 = vmul.f32 %v2602_v49, %v5775_v36  ;;  %v2678_v52 = vsub.f32 1.0, %v5880_v61  ;;  %v5894_v21 = vsel %vm2418_vm3, %v5611_v33, 0.0  ;;  %v2550_v33 = vadd.f32 1e-06, %v2518_v0 }
 0x474   : > { %v4415_v55 = vpop.eup %4414  ;;  %v2893_v12 = vsel %vm2412_vm12, %v2861_v34, 0.0  ;;  %v2794_v43 = vmul.f32 0.6931472, %v4413_v59  ;;  %v2635_v1 = vmul.f32 %v2592_v15, %v5780_v57  ;;  %4426 = vlog2.f32 %v2735_v25  ;;  %3141 = vperm.xlu1 %4179, %v5894_v21   ;;  %2483 = vst.msk [vmem:[%s4718_s17 + $0xe0] sm:$0xff] %vm2454_vm4, %v5894_v21  ;;  %v6159_v57 = vld [vmem:[#allocation11_spill] sm:$0xff] }
 0x475   : > { %v4417_v26 = vpop.eup %4416  ;;  %2925 = vst.msk [vmem:[%s4723_s19 + $0xb0] sm:$0xff] %vm2454_vm4, %v2893_v12  ;;  %v2784_v17 = vmul.f32 0.6931472, %v4415_v55  ;;  %v2710_v13 = vmul.f32 9.9999, %v2678_v52  ;;  %v3161_v53 = vmul.f32 %v3751_v6, %v3012_v39  ;;  %v2675_v22 = vsub.f32 1.0, %v5894_v21 }
 0x476   : > { %v2832_v58 = vmul.f32 %v2794_v43, %v2672_v31  ;;  %v2604_v51 = vmul.f32 0.6931472, %v4417_v26  ;;  %v2515_v42 = vmul.f32 1.1111112, %v5894_v21  ;;  %4428 = vlog2.f32 %v2550_v33  ;;  %v3017_v49 = vpop.permute.xlu1 %3016  ;;  %v5951_v55 = vld [vmem:[%s4708_s0 + $0x18] sm:$0xff]  }
 0x477   : > { %v2827_v5 = vmul.f32 %v2784_v17, %v2667_v48  ;;  %v2742_v19 = vadd.f32 1e-06, %v2710_v13  ;;  %v2354_v41 = vadd.s32 240, %v6158_v30  ;;  %v2707_v36 = vmul.f32 9.9999, %v2675_v22 }
 0x478   : > { %v4419_v23 = vpop.eup %4418  ;;  %v2864_v24 = vadd.f32 %v2832_v58, %v2640_v56  ;;  %v2641_v6 = vmul.f32 %v2604_v51, %v5805_v7  ;;  %v2547_v62 = vadd.f32 1e-06, %v2515_v42  ;;  %vm3319_vm6 = vcmask 125952  }
 0x479   : > { %v4421_v31 = vpop.eup %4420  ;;  %v2859_v40 = vadd.f32 %v2827_v5, %v2635_v1  ;;  %v2796_v9 = vmul.f32 0.6931472, %v4419_v23  ;;  %4430 = vlog2.f32 %v2742_v19  ;;  %v5920_v48 = vadd.s32 %v6159_v57, %v2354_v41  ;;  %v3810_v19 = vld [vmem:[%s4708_s0 + $0x10] sm:$0xff]  }
 0x47a   : > { %v2896_v38 = vsel %vm2415_vm13, %v2864_v24, 0.0  ;;  %v2610_v29 = vmul.f32 0.6931472, %v4421_v31  ;;  %4432 = vlog2.f32 %v2547_v62  ;;  %v2739_v18 = vadd.f32 1e-06, %v2707_v36 }
 0x47b   : > { %v4423_v37 = vpop.eup %4422  ;;  %2928 = vst.msk [vmem:[%s4723_s19 + $0xc8] sm:$0xff] %vm2454_vm4, %v2896_v38  ;;  %v2891_v60 = vsel %vm2410_vm14, %v2859_v40, 0.0  ;;  %v2833_v20 = vmul.f32 %v2796_v9, %v2673_v11  ;;  %vm2420_vm5 = vcmp.lt.s32.totalorder %v5920_v48, 300  ;;  %v3159_v56 = vmul.f32 %v3747_v10, %v3002_v50  ;;  %v3007_v33 = vpop.permute.xlu1 %3006  ;;  %v3813_v38 = vld [vmem:[%s4708_s0 + $0x28] sm:$0xff]  }
 0x47c   : > { %v4425_v54 = vpop.eup %4424  ;;  %2923 = vst.msk [vmem:[%s4723_s19 + $0xa0] sm:$0xff] %vm2454_vm4, %v2891_v60  ;;  %v2644_v44 = vmul.f32 %v2610_v29, %v5834_v28  ;;  %v2802_v32 = vmul.f32 0.6931472, %v4423_v37  ;;  %4434 = vlog2.f32 %v2739_v18  ;;  %v5937_v63 = vsel %vm2420_vm5, %v5658_v2, 0.0 }
 0x47d   : > { %v2865_v7 = vadd.f32 %v2833_v20, %v2641_v6  ;;  %v2600_v11 = vmul.f32 0.6931472, %v4425_v54  ;;  %3151 = vperm.xlu1 %4179, %v5937_v63   ;;  %2485 = vst.msk [vmem:[%s4718_s17 + $0xf0] sm:$0xff] %vm2454_vm4, %v5937_v63  ;;  %v2517_v34 = vmul.f32 1.1111112, %v5937_v63  ;;  %v2677_v15 = vsub.f32 1.0, %v5937_v63 }
 0x47e   : > { %v4427_v25 = vpop.eup %4426  ;;  %v2836_v59 = vmul.f32 %v2802_v32, %v2676_v16  ;;  %v3715_v2 = vpack.c.bf16 %v3161_v53, %v3161_v53  ;;  %v3752_v0 = vunpack.c.h.bf16 %v5798_v4  ;;  %v3713_v4 = vpack.c.bf16 %v3159_v56, %v3159_v56 }
 0x47f   : > { %v2897_v12 = vsel %vm2416_vm15, %v2865_v7, 0.0  ;;  %v2639_v43 = vmul.f32 %v2600_v11, %v5839_v46  ;;  %v2792_v1 = vmul.f32 0.6931472, %v4427_v25  ;;  %v2549_v39 = vadd.f32 1e-06, %v2517_v34  ;;  %v3032_v24 = vpop.permute.xlu1 %3031 }
 0x480   : > { %2929 = vst.msk [vmem:[%s4723_s19 + $0xd0] sm:$0xff] %vm2454_vm4, %v2897_v12  ;;  %v2868_v28 = vadd.f32 %v2836_v59, %v2644_v44  ;;  %v2709_v16 = vmul.f32 9.9999, %v2677_v15  ;;  %v3162_v10 = vmul.f32 %v3752_v0, %v3017_v49  ;;  %v4429_v26 = vpop.eup %4428  ;;  %v3748_v17 = vunpack.c.h.bf16 %v5842_v3 }
 0x481   : > { %3322 = vst.msk [vmem:[%s4728_s13 + $0x8] sm:$0xf] %vm3319_vm6, %v3715_v2  ;;  %v2831_v8 = vmul.f32 %v2792_v1, %v2671_v47  ;;  %4436 = vlog2.f32 %v2549_v39  ;;  %v3759_v13 = vunpack.c.l.bf16 %v5951_v55  ;;  %v2614_v58 = vmul.f32 0.6931472, %v4429_v26  ;;  %3320 = vst.msk [vmem:[%s4728_s13] sm:$0xf] %vm3319_vm6, %v3713_v4 }
 0x482   : > { %v2900_v53 = vsel %vm2419_vm0, %v2868_v28, 0.0  ;;  %v2741_v51 = vadd.f32 1e-06, %v2709_v16  ;;  %v3716_v42 = vpack.c.bf16 %v3162_v10, %v3162_v10  ;;  %v3160_v47 = vmul.f32 %v3748_v17, %v3007_v33  ;;  %v3815_v28 = vld [vmem:[%s4708_s0 + $0x38] sm:$0xff]  }
 0x483   : > { %v4431_v5 = vpop.eup %4430  ;;  %2932 = vst.msk [vmem:[%s4723_s19 + $0xe8] sm:$0xff] %vm2454_vm4, %v2900_v53  ;;  %v2863_v46 = vadd.f32 %v2831_v8, %v2639_v43  ;;  %v2646_v62 = vmul.f32 %v2614_v58, %v5880_v61  ;;  %v3165_v31 = vmul.f32 %v3759_v13, %v3032_v24  ;;  %v3755_v40 = vunpack.c.l.bf16 %v3810_v19  ;;  %v3022_v37 = vpop.permute.xlu1 %3021  ;;  %v3814_v58 = vld [vmem:[%s4708_s0 + $0x30] sm:$0xff]   ;;  %v3816_v24 = vld [vmem:[%s4708_s0 + $0x40] sm:$0xff]  }
 0x484   : > { %v4433_v3 = vpop.eup %4432  ;;  %v2806_v30 = vmul.f32 0.6931472, %v4431_v5  ;;  %4438 = vlog2.f32 %v2741_v51  ;;  %3323 = vst.msk [vmem:[%s4728_s13 + $0xc] sm:$0xf] %vm3319_vm6, %v3716_v42  ;;  %v3714_v23 = vpack.c.bf16 %v3160_v47, %v3160_v47  ;;  %v3768_v50 = vunpack.c.h.bf16 %v3813_v38 }
 0x485   : > { %v2895_v35 = vsel %vm2414_vm1, %v2863_v46, 0.0  ;;  %v2608_v41 = vmul.f32 0.6931472, %v4433_v3  ;;  %v3719_v57 = vpack.c.bf16 %v3165_v31, %v3165_v31  ;;  %v3760_v7 = vunpack.c.h.bf16 %v5951_v55  ;;  %v3812_v55 = vld [vmem:[%s4708_s0 + $0x20] sm:$0xff]  }
 0x486   : > { %v4435_v6 = vpop.eup %4434  ;;  %2927 = vst.msk [vmem:[%s4723_s19 + $0xc0] sm:$0xff] %vm2454_vm4, %v2895_v35  ;;  %v2838_v36 = vmul.f32 %v2806_v30, %v2678_v52  ;;  %v3163_v52 = vmul.f32 %v3755_v40, %v3022_v37  ;;  %v3756_v43 = vunpack.c.h.bf16 %v3810_v19  ;;  %v3776_v4 = vunpack.c.h.bf16 %v3815_v28  ;;  %v3817_v35 = vld [vmem:[%s4708_s0 + $0x48] sm:$0xff]  }
 0x487   : > { %v2800_v9 = vmul.f32 0.6931472, %v4435_v6  ;;  %3321 = vst.msk [vmem:[%s4728_s13 + $0x4] sm:$0xf] %vm3319_vm6, %v3714_v23  ;;  %v2643_v29 = vmul.f32 %v2608_v41, %v5894_v21  ;;  %3326 = vst.msk [vmem:[%s4728_s13 + $0x18] sm:$0xf] %vm3319_vm6, %v3719_v57  ;;  %v3767_v10 = vunpack.c.l.bf16 %v3813_v38  ;;  %v3772_v51 = vunpack.c.h.bf16 %v3814_v58 }
 0x488   : > { %v2870_v45 = vadd.f32 %v2838_v36, %v2646_v62  ;;  %v3717_v54 = vpack.c.bf16 %v3163_v52, %v3163_v52  ;;  %v3763_v42 = vunpack.c.l.bf16 %v3812_v55  ;;  %v3784_v41 = vunpack.c.h.bf16 %v3817_v35  ;;  %v3819_v38 = vld [vmem:[%s4708_s0 + $0x58] sm:$0xff]  }
 0x489   : > { %v2835_v18 = vmul.f32 %v2800_v9, %v2675_v22  ;;  %v3057_v27 = vpop.permute.xlu0 %3056  ;;  %v3775_v23 = vunpack.c.l.bf16 %v3815_v28  ;;  %v3780_v31 = vunpack.c.h.bf16 %v3816_v24 }
 0x48a   : > { %v2902_v61 = vsel %vm2421_vm2, %v2870_v45, 0.0  ;;  %3324 = vst.msk [vmem:[%s4728_s13 + $0x10] sm:$0xf] %vm3319_vm6, %v3717_v54  ;;  %v3170_v49 = vmul.f32 %v3768_v50, %v3057_v27  ;;  %v3818_v50 = vld [vmem:[%s4708_s0 + $0x50] sm:$0xff]  }
 0x48b   : > { %v4437_v60 = vpop.eup %4436  ;;  %2934 = vst.msk [vmem:[%s4723_s19 + $0xf8] sm:$0xff] %vm2454_vm4, %v2902_v61  ;;  %v2867_v20 = vadd.f32 %v2835_v18, %v2643_v29  ;;  %v3771_v18 = vunpack.c.l.bf16 %v3814_v58  ;;  %v3792_v61 = vunpack.c.h.bf16 %v3819_v38  ;;  %v3788_v27 = vunpack.c.h.bf16 %v3818_v50  ;;  %v3822_v58 = vld [vmem:[%s4708_s0 + $0x70] sm:$0xff]  }
 0x48c   : > { %v2612_v32 = vmul.f32 0.6931472, %v4437_v60  ;;  %v3724_v34 = vpack.c.bf16 %v3170_v49, %v3170_v49 }
 0x48d   : > { %v2899_v44 = vsel %vm2418_vm3, %v2867_v20, 0.0 }
 0x48e   : > { %v4439_v21 = vpop.eup %4438  ;;  %2931 = vst.msk [vmem:[%s4723_s19 + $0xe0] sm:$0xff] %vm2454_vm4, %v2899_v44  ;;  %v2645_v11 = vmul.f32 %v2612_v32, %v5937_v63  ;;  %v3037_v59 = vpop.permute.xlu1 %3036  ;;  %v3764_v63 = vunpack.c.h.bf16 %v3812_v55  ;;  %v3783_v32 = vunpack.c.l.bf16 %v3817_v35 }
 0x48f   : > { %v2804_v22 = vmul.f32 0.6931472, %v4439_v21  ;;  %3331 = vst.msk [vmem:[%s4728_s13 + $0x2c] sm:$0xf] %vm3319_vm6, %v3724_v34  ;;  %v3166_v2 = vmul.f32 %v3760_v7, %v3037_v59  ;;  %v3821_v7 = vld [vmem:[%s4708_s0 + $0x68] sm:$0xff]  }
 0x490   : > { %v3800_v59 = vunpack.c.h.bf16 %v3821_v7 }
 0x491   : > { %v2837_v14 = vmul.f32 %v2804_v22, %v2677_v15  ;;  %v3720_v0 = vpack.c.bf16 %v3166_v2, %v3166_v2 }
 0x493   : > { %v2869_v25 = vadd.f32 %v2837_v14, %v2645_v11  ;;  %3327 = vst.msk [vmem:[%s4728_s13 + $0x1c] sm:$0xf] %vm3319_vm6, %v3720_v0 }
 0x495   : > { %v2901_v56 = vsel %vm2420_vm5, %v2869_v25, 0.0  ;;  %v3779_v25 = vunpack.c.l.bf16 %v3816_v24 }
 0x496   : > { %2933 = vst.msk [vmem:[%s4723_s19 + $0xf0] sm:$0xff] %vm2454_vm4, %v2901_v56 }
 0x499   : > { %v3047_v15 = vpop.permute.xlu0 %3046 }
 0x49a   : > { %v3168_v12 = vmul.f32 %v3764_v63, %v3047_v15 }
 0x49c   : > { %v3722_v1 = vpack.c.bf16 %v3168_v12, %v3168_v12 }
 0x49d   : > { %v3027_v39 = vpop.permute.xlu1 %3026 }
 0x49e   : > { %3329 = vst.msk [vmem:[%s4728_s13 + $0x24] sm:$0xf] %vm3319_vm6, %v3722_v1  ;;  %v3164_v48 = vmul.f32 %v3756_v43, %v3027_v39  ;;  %v3791_v43 = vunpack.c.l.bf16 %v3819_v38  ;;  %v3820_v1 = vld [vmem:[%s4708_s0 + $0x60] sm:$0xff]  }
 0x4a0   : > { %v3718_v16 = vpack.c.bf16 %v3164_v48, %v3164_v48  ;;  %v3796_v48 = vunpack.c.h.bf16 %v3820_v1 }
 0x4a2   : > { %3325 = vst.msk [vmem:[%s4728_s13 + $0x14] sm:$0xf] %vm3319_vm6, %v3718_v16  ;;  %v3787_v16 = vunpack.c.l.bf16 %v3818_v50 }
 0x4a3   : > { %v3077_v26 = vpop.permute.xlu0 %3076 }
 0x4a4   : > { %v3174_v8 = vmul.f32 %v3776_v4, %v3077_v26 }
 0x4a6   : > { %v3052_v17 = vpop.permute.xlu1 %3051  ;;  %v3728_v33 = vpack.c.bf16 %v3174_v8, %v3174_v8 }
 0x4a7   : > { %v3169_v13 = vmul.f32 %v3767_v10, %v3052_v17 }
 0x4a8   : > { %3335 = vst.msk [vmem:[%s4728_s13 + $0x3c] sm:$0xf] %vm3319_vm6, %v3728_v33  ;;  %v3799_v33 = vunpack.c.l.bf16 %v3821_v7 }
 0x4a9   : > { %v3723_v53 = vpack.c.bf16 %v3169_v13, %v3169_v13 }
 0x4ab   : > { %3330 = vst.msk [vmem:[%s4728_s13 + $0x28] sm:$0xf] %vm3319_vm6, %v3723_v53 }
 0x4af   : > { %v3067_v5 = vpop.permute.xlu0 %3066  ;;  %v3042_v46 = vpop.permute.xlu1 %3041 }
 0x4b0   : > { %v3172_v47 = vmul.f32 %v3772_v51, %v3067_v5  ;;  %v3167_v19 = vmul.f32 %v3763_v42, %v3042_v46  ;;  %v3804_v5 = vunpack.c.h.bf16 %v3822_v58  ;;  %v3795_v46 = vunpack.c.l.bf16 %v3820_v1 }
 0x4b2   : > { %v3726_v3 = vpack.c.bf16 %v3172_v47, %v3172_v47  ;;  %v3721_v30 = vpack.c.bf16 %v3167_v19, %v3167_v19 }
 0x4b4   : > { %3333 = vst.msk [vmem:[%s4728_s13 + $0x34] sm:$0xf] %vm3319_vm6, %v3726_v3  ;;  %3328 = vst.msk [vmem:[%s4728_s13 + $0x20] sm:$0xf] %vm3319_vm6, %v3721_v30 }
 0x4b9   : > { %v3097_v6 = vpop.permute.xlu0 %3096 }
 0x4ba   : > { %v3178_v62 = vmul.f32 %v3784_v41, %v3097_v6  ;;  %v3823_v41 = vld [vmem:[%s4708_s0 + $0x78] sm:$0xff]  }
 0x4bb   : > { %v3808_v6 = vunpack.c.h.bf16 %v3823_v41  ;;  %v3807_v38 = vunpack.c.l.bf16 %v3823_v41 }
 0x4bc   : > { %v3072_v36 = vpop.permute.xlu1 %3071  ;;  %v3732_v40 = vpack.c.bf16 %v3178_v62, %v3178_v62  ;;  %v3803_v62 = vunpack.c.l.bf16 %v3822_v58 }
 0x4bd   : > { %v3173_v9 = vmul.f32 %v3775_v23, %v3072_v36 }
 0x4be   : > { %3339 = vst.msk [vmem:[%s4728_s13 + $0x4c] sm:$0xf] %vm3319_vm6, %v3732_v40 }
 0x4bf   : > { %v3727_v45 = vpack.c.bf16 %v3173_v9, %v3173_v9  ;;  %v3087_v57 = vpop.permute.xlu0 %3086 }
 0x4c0   : > { %v3176_v29 = vmul.f32 %v3780_v31, %v3087_v57 }
 0x4c1   : > { %3334 = vst.msk [vmem:[%s4728_s13 + $0x38] sm:$0xf] %vm3319_vm6, %v3727_v45 }
 0x4c2   : > { %v3730_v37 = vpack.c.bf16 %v3176_v29, %v3176_v29  ;;  %v3062_v52 = vpop.permute.xlu1 %3061 }
 0x4c3   : > { %v3171_v60 = vmul.f32 %v3771_v18, %v3062_v52 }
 0x4c4   : > { %3337 = vst.msk [vmem:[%s4728_s13 + $0x44] sm:$0xf] %vm3319_vm6, %v3730_v37 }
 0x4c5   : > { %v3117_v20 = vpop.permute.xlu0 %3116  ;;  %v3725_v54 = vpack.c.bf16 %v3171_v60, %v3171_v60 }
 0x4c6   : > { %v3182_v44 = vmul.f32 %v3792_v61, %v3117_v20 }
 0x4c7   : > { %3332 = vst.msk [vmem:[%s4728_s13 + $0x30] sm:$0xf] %vm3319_vm6, %v3725_v54 }
 0x4c8   : > { %v3736_v21 = vpack.c.bf16 %v3182_v44, %v3182_v44 }
 0x4c9   : > { %v3092_v22 = vpop.permute.xlu1 %3091 }
 0x4ca   : > { %3343 = vst.msk [vmem:[%s4728_s13 + $0x5c] sm:$0xf] %vm3319_vm6, %v3736_v21  ;;  %v3177_v49 = vmul.f32 %v3783_v32, %v3092_v22 }
 0x4cb   : > { %v3107_v11 = vpop.permute.xlu0 %3106 }
 0x4cc   : > { %v3731_v14 = vpack.c.bf16 %v3177_v49, %v3177_v49  ;;  %v3180_v34 = vmul.f32 %v3788_v27, %v3107_v11 }
 0x4ce   : > { %3338 = vst.msk [vmem:[%s4728_s13 + $0x48] sm:$0xf] %vm3319_vm6, %v3731_v14  ;;  %v3734_v2 = vpack.c.bf16 %v3180_v34, %v3180_v34 }
 0x4d0   : > { %3341 = vst.msk [vmem:[%s4728_s13 + $0x54] sm:$0xf] %vm3319_vm6, %v3734_v2 }
 0x4d1   : > { %v3082_v56 = vpop.permute.xlu1 %3081 }
 0x4d2   : > { %v3137_v0 = vpop.permute.xlu0 %3136  ;;  %v3175_v55 = vmul.f32 %v3779_v25, %v3082_v56 }
 0x4d3   : > { %v3186_v63 = vmul.f32 %v3800_v59, %v3137_v0 }
 0x4d4   : > { %v3729_v15 = vpack.c.bf16 %v3175_v55, %v3175_v55 }
 0x4d5   : > { %v3740_v12 = vpack.c.bf16 %v3186_v63, %v3186_v63 }
 0x4d6   : > { %3336 = vst.msk [vmem:[%s4728_s13 + $0x40] sm:$0xf] %vm3319_vm6, %v3729_v15 }
 0x4d7   : > { %3347 = vst.msk [vmem:[%s4728_s13 + $0x6c] sm:$0xf] %vm3319_vm6, %v3740_v12 }
 0x4d9   : > { %v3112_v39 = vpop.permute.xlu1 %3111 }
 0x4da   : > { %v3181_v28 = vmul.f32 %v3791_v43, %v3112_v39 }
 0x4dc   : > { %v3735_v4 = vpack.c.bf16 %v3181_v28, %v3181_v28 }
 0x4de   : > { %3342 = vst.msk [vmem:[%s4728_s13 + $0x58] sm:$0xf] %vm3319_vm6, %v3735_v4 }
 0x4df   : > { %v3127_v10 = vpop.permute.xlu0 %3126 }
 0x4e0   : > { %v3102_v26 = vpop.permute.xlu1 %3101  ;;  %v3184_v8 = vmul.f32 %v3796_v48, %v3127_v10 }
 0x4e1   : > { %v3179_v17 = vmul.f32 %v3787_v16, %v3102_v26 }
 0x4e2   : > { %v3738_v13 = vpack.c.bf16 %v3184_v8, %v3184_v8 }
 0x4e3   : > { %v3733_v53 = vpack.c.bf16 %v3179_v17, %v3179_v17 }
 0x4e4   : > { %v3132_v51 = vpop.permute.xlu1 %3131  ;;  %3345 = vst.msk [vmem:[%s4728_s13 + $0x64] sm:$0xf] %vm3319_vm6, %v3738_v13 }
 0x4e5   : > { %3340 = vst.msk [vmem:[%s4728_s13 + $0x50] sm:$0xf] %vm3319_vm6, %v3733_v53  ;;  %v3185_v42 = vmul.f32 %v3799_v33, %v3132_v51 }
 0x4e7   : > { %v3739_v47 = vpack.c.bf16 %v3185_v42, %v3185_v42 }
 0x4e9   : > { %3346 = vst.msk [vmem:[%s4728_s13 + $0x68] sm:$0xf] %vm3319_vm6, %v3739_v47  ;;  %v3147_v19 = vpop.permute.xlu0 %3146  ;;  %v3122_v3 = vpop.permute.xlu1 %3121 }
 0x4ea   : > { %v3188_v30 = vmul.f32 %v3804_v5, %v3147_v19  ;;  %v3183_v35 = vmul.f32 %v3795_v46, %v3122_v3 }
 0x4ec   : > { %v3742_v23 = vpack.c.bf16 %v3188_v30, %v3188_v30  ;;  %v3737_v24 = vpack.c.bf16 %v3183_v35, %v3183_v35 }
 0x4ee   : > { %3349 = vst.msk [vmem:[%s4728_s13 + $0x74] sm:$0xf] %vm3319_vm6, %v3742_v23  ;;  %3344 = vst.msk [vmem:[%s4728_s13 + $0x60] sm:$0xf] %vm3319_vm6, %v3737_v24 }
 0x4f0   : > { %v3157_v36 = vpop.permute.xlu0 %3156 }
 0x4f1   : > { %v3190_v31 = vmul.f32 %v3808_v6, %v3157_v36 }
 0x4f3   : > { %v3142_v40 = vpop.permute.xlu1 %3141  ;;  %v3744_v9 = vpack.c.bf16 %v3190_v31, %v3190_v31 }
 0x4f4   : > { %v3187_v45 = vmul.f32 %v3803_v62, %v3142_v40 }
 0x4f5   : > { %3351 = vst.msk [vmem:[%s4728_s13 + $0x7c] sm:$0xf] %vm3319_vm6, %v3744_v9 }
 0x4f6   : > { %v3741_v57 = vpack.c.bf16 %v3187_v45, %v3187_v45 }
 0x4f8   : > { %3348 = vst.msk [vmem:[%s4728_s13 + $0x70] sm:$0xf] %vm3319_vm6, %v3741_v57 }
 0x4fc   : > { %v3152_v29 = vpop.permute.xlu1 %3151 }
 0x4fd   : > { %v3189_v18 = vmul.f32 %v3807_v38, %v3152_v29 }
 0x4ff   : > { %v3743_v37 = vpack.c.bf16 %v3189_v18, %v3189_v18 }
 0x501   : > { %3350 = vst.msk [vmem:[%s4728_s13 + $0x78] sm:$0xf] %vm3319_vm6, %v3743_v37 }
 0x502 PF: > { %s25_s29 = sadd.s32 1, %s4495_s29   ;;  %s6160_s0 = sld [smem:[#allocation9_spill]] }
 0x503   : > { %p22_p0 = scmp.ge.s32.totalorder %s25_s29, 6   ;;  %s6161_s25 = sld [smem:[#allocation5_spill]] }
 0x504   : > { %s6162_s26 = sld [smem:[#allocation6_spill]]  ;;  %s6163_s27 = sld [smem:[#allocation7_spill]] }
 0x505   : > { %s6164_s28 = sld [smem:[#allocation8_spill]]  ;;  %s6165_s23 = smov %s4475_s24 }
 0x506   :  { %24 = sbr.rel (!%p22_p0) target bundleno = 8 (0x8), region = 174 }
 0x508   : > { %s6166_s24 = smov %s6160_s0 }

</bundles_post_ra>
